<compile_context>
chip_gen: v6e
topology: v6e:2x2x1
jax: 0.10.0
libtpu: 0.0.40
codegen_flags: <defaults>
</compile_context>

<pallas_src>
import functools

import jax
import jax.numpy as jnp
from jax.experimental import pallas as pl
from jax.experimental.pallas import tpu as pltpu

EPS = 1e-12

# ----------------------------- configuration -------------------------------
IMG_SIZE = (1, 32, 32)          # (C, H, W) -- the 32x32 branch of the module
LATENT_SPEC = {"cont": 8, "disc": [10]}
VIEW_NUM = 2
HIDDEN_DIM = 64
TEMPERATURE = 0.67
MIN_K = 20.0
LATENT_CONT = LATENT_SPEC["cont"]
LATENT_DISC = sum(LATENT_SPEC["disc"])
LATENT_DIM = LATENT_CONT + LATENT_DISC   # decoder input dim (= 18)

ROW_TILE = 512                  # M-tile for the gridded GEMM path


# ------------------------------ Pallas kernels ------------------------------
def _to_bf16(x):
    return x if x.dtype == jnp.bfloat16 else x.astype(jnp.bfloat16)


def _apply_act(y, act):
    if act == "relu":
        return jnp.maximum(y, 0.0)
    if act == "sigmoid":
        return jax.nn.sigmoid(y)
    return y


def _gemm_bias_act_kernel(x_ref, w_ref, b_ref, o_ref, *, act):
    y = jnp.dot(_to_bf16(x_ref[...]), w_ref[...],
                preferred_element_type=jnp.float32)
    o_ref[...] = _apply_act(y + b_ref[...], act).astype(o_ref.dtype)


def gemm_bias_act(x, w, b, act="none", out_dtype=jnp.bfloat16):
    """x:(M,K) @ w:(K,N) + b with fused activation.

    bf16 MXU operands, f32 accumulation + epilogue.  When M is a multiple of
    ROW_TILE the call is gridded over M (parallel axis -> both v7x cores);
    otherwise it is a single VMEM block.
    """
    M, K = x.shape
    K2, N = w.shape
    assert K == K2
    b2 = b.reshape(1, N).astype(jnp.float32)
    kern = functools.partial(_gemm_bias_act_kernel, act=act)
    out_shape = jax.ShapeDtypeStruct((M, N), out_dtype)
    if M > ROW_TILE and M % ROW_TILE == 0:
        return pl.pallas_call(
            kern,
            grid=(M // ROW_TILE,),
            in_specs=[pl.BlockSpec((ROW_TILE, K), lambda i: (i, 0)),
                      pl.BlockSpec((K, N), lambda i: (0, 0)),
                      pl.BlockSpec((1, N), lambda i: (0, 0))],
            out_specs=pl.BlockSpec((ROW_TILE, N), lambda i: (i, 0)),
            out_shape=out_shape,
            compiler_params=pltpu.CompilerParams(
                dimension_semantics=("parallel",)),
        )(x, w, b2)
    return pl.pallas_call(kern, out_shape=out_shape)(x, w, b2)


def _mid_kernel(y3_ref, wfh_ref, bfh_ref, wmk_ref, bmk_ref,
                wa1_ref, wa2_ref, ba_ref, unif_ref,
                wl1_ref, bl1_ref, wl2_ref, bl2_ref,
                heads_ref, feat_ref,
                *, n_view, latent_cont, disc_dim, min_k, temperature):
    """features_to_hidden + all heads + gumbel sample + latent_to_features.

    y3_ref : (rows, 1024)  conv3 features, rows = [view1 | view2 | pad],
             columns ordered (spatial-major, channel-minor).
    Everything between the conv3 GEMM and the first conv-T GEMM stays in VMEM.
    """
    rows = y3_ref.shape[0]

    # features_to_hidden: one full-width GEMM + ReLU.
    h = jnp.dot(_to_bf16(y3_ref[...]), wfh_ref[...],
                preferred_element_type=jnp.float32) + bfh_ref[...]
    h = jnp.maximum(h, 0.0)                              # (rows, hidden) f32
    hb = h.astype(jnp.bfloat16)

    # mu / kappa heads merged into one GEMM; f32 epilogue.
    mk = jnp.dot(hb, wmk_ref[...], preferred_element_type=jnp.float32) + bmk_ref[...]
    mu_raw = mk[:, :latent_cont]
    kap_raw = mk[:, latent_cont:latent_cont + 1]
    inv_norm = jax.lax.rsqrt(jnp.sum(mu_raw * mu_raw, axis=1, keepdims=True) + EPS)
    mu = mu_raw * inv_norm                               # mu / ||mu||
    kappa = jax.nn.softplus(kap_raw) + min_k             # softplus(k(h)) + min_k

    # alpha head on fusion = [h_view1 | h_view2] + gumbel-softmax sample.
    h1 = h[0:n_view, :].astype(jnp.bfloat16)
    h2 = h[n_view:2 * n_view, :].astype(jnp.bfloat16)
    logits = (jnp.dot(h1, wa1_ref[...], preferred_element_type=jnp.float32)
              + jnp.dot(h2, wa2_ref[...], preferred_element_type=jnp.float32)
              + ba_ref[...])
    alpha = jax.nn.softmax(logits, axis=1)               # (n_view, disc)
    gumbel = -jnp.log(-jnp.log(unif_ref[...] + EPS) + EPS)
    glogit = (jnp.log(alpha + EPS) + gumbel) / temperature
    z_disc = jax.nn.softmax(glogit, axis=1)              # (n_view, disc)

    # Broadcast the shared discrete sample / alpha across both view blocks,
    # zero-fill the padding rows.
    pad = rows - 2 * n_view
    pieces_zd = [z_disc, z_disc]
    pieces_al = [alpha, alpha]
    if pad:
        zpad = jnp.zeros((pad, disc_dim), jnp.float32)
        pieces_zd.append(zpad)
        pieces_al.append(zpad)
    zd_rows = jnp.concatenate(pieces_zd, axis=0)         # (rows, disc)
    al_rows = jnp.concatenate(pieces_al, axis=0)

    # Single merged heads output: [mu | kappa | alpha].
    heads_ref[...] = jnp.concatenate([mu, kappa, al_rows], axis=1).astype(heads_ref.dtype)

    # Reparameterize + latent_to_features (two dense+ReLU layers).
    # TODO(synk): VonMisesFisher.rsample uses data-dependent rejection sampling
    # (no clean Pallas equivalent); the continuous latent uses the vMF mode (mu).
    z_dec = jnp.concatenate([mu, zd_rows], axis=1).astype(jnp.bfloat16)  # (rows, 18)
    g = jnp.dot(z_dec, wl1_ref[...], preferred_element_type=jnp.float32) + bl1_ref[...]
    g = jnp.maximum(g, 0.0).astype(jnp.bfloat16)
    f = jnp.dot(g, wl2_ref[...], preferred_element_type=jnp.float32) + bl2_ref[...]
    feat_ref[...] = jnp.maximum(f, 0.0).astype(feat_ref.dtype)


def mid_block(y3_flat, q, unif, n_view):
    """Pad rows to a sublane multiple and run the fused mid kernel."""
    rows_real = y3_flat.shape[0]
    rows = max(8, ((rows_real + 7) // 8) * 8)
    if rows != rows_real:
        y3_flat = jnp.pad(y3_flat, ((0, rows - rows_real), (0, 0)))
    heads, feat = pl.pallas_call(
        functools.partial(_mid_kernel, n_view=n_view, latent_cont=LATENT_CONT,
                          disc_dim=LATENT_DISC, min_k=MIN_K,
                          temperature=TEMPERATURE),
        out_shape=(
            jax.ShapeDtypeStruct((rows, LATENT_CONT + 1 + LATENT_DISC), jnp.float32),
            jax.ShapeDtypeStruct((rows, 64 * 4 * 4), jnp.bfloat16),
        ),
    )(y3_flat, q["wfh"], q["bfh"], q["wmk"], q["bmk"],
      q["wa1"], q["wa2"], q["ba"], unif,
      q["wl1"], q["bl1"], q["wl2"], q["bl2"])
    return heads, feat


# ------------------------------- XLA glue ------------------------------------
def _im2col_nhwc(x, k, stride, pad):
    """x: (B,H,W,C) NHWC -> patches (B*OH*OW, k*k*C); col = (ky*k+kx)*C + c."""
    B, H, W, C = x.shape
    xp = jnp.pad(x, ((0, 0), (pad, pad), (pad, pad), (0, 0)))
    OH = (H + 2 * pad - k) // stride + 1
    OW = (W + 2 * pad - k) // stride + 1
    taps = []
    for ky in range(k):
        for kx in range(k):
            taps.append(xp[:, ky:ky + stride * OH:stride,
                           kx:kx + stride * OW:stride, :])
    p = jnp.concatenate(taps, axis=-1)                 # (B, OH, OW, k*k*C)
    return p.reshape(B * OH * OW, k * k * C), OH, OW


def _depth_to_space_nhwc(y, B, H, W, C):
    """y: (B*H*W, 4*C) with col = (qy*2+qx)*C + c  ->  (B, 2H, 2W, C) NHWC."""
    y = y.reshape(B, H, W, 2, 2, C)
    y = y.transpose(0, 1, 3, 2, 4, 5)
    return y.reshape(B, 2 * H, 2 * W, C)


# ------------------------- parameter preprocessing ---------------------------
def _conv_w_mat(w):
    """PyTorch Conv2d weight (Cout,Cin,kH,kW) -> (kH*kW*Cin, Cout)."""
    Cout, Cin, kH, kW = w.shape
    return w.transpose(2, 3, 1, 0).reshape(kH * kW * Cin, Cout)


def _convt_eff_w(w):
    """ConvTranspose2d(k=4,s=2,p=1) weight (Cin,Cout,4,4) -> sub-pixel form.

    Output phase (qy,qx) at position (m,l):
        sum_{dy,dx in {-1,0,1}} inp[m+dy, l+dx] * w[:, :, qy+1-2dy, qx+1-2dx]
    so a 3x3/stride-1/pad-1 im2col of the *un-upsampled* input against this
    (9*Cin, 4*Cout) matrix produces all four phases in one GEMM.
    """
    Cin, Cout = w.shape[0], w.shape[1]
    zeros = jnp.zeros((Cin, Cout), w.dtype)
    phase_mats = []
    for qy in range(2):
        for qx in range(2):
            taps = []
            for dy in (-1, 0, 1):
                for dx in (-1, 0, 1):
                    ky = qy + 1 - 2 * dy
                    kx = qx + 1 - 2 * dx
                    if 0 <= ky < 4 and 0 <= kx < 4:
                        taps.append(w[:, :, ky, kx])
                    else:
                        taps.append(zeros)
            phase_mats.append(jnp.concatenate(taps, axis=0))   # (9*Cin, Cout)
    return jnp.concatenate(phase_mats, axis=1)                  # (9*Cin, 4*Cout)


def init_params(key):
    """Parameters in native PyTorch layouts (same structure as the module)."""
    def nrm(key, shape, scale=0.05):
        return scale * jax.random.normal(key, shape, dtype=jnp.float32)

    keys = jax.random.split(key, 32)
    ki = iter(keys)
    p = {}
    # shared encoder (shareAE=1): Conv(1->32) ReLU, Conv(32->64) ReLU, Conv(64->64) ReLU
    p["c1_w"] = nrm(next(ki), (32, IMG_SIZE[0], 4, 4)); p["c1_b"] = nrm(next(ki), (32,))
    p["c2_w"] = nrm(next(ki), (64, 32, 4, 4));          p["c2_b"] = nrm(next(ki), (64,))
    p["c3_w"] = nrm(next(ki), (64, 64, 4, 4));          p["c3_b"] = nrm(next(ki), (64,))
    # features_to_hidden: Linear(64*4*4, hidden) + ReLU
    p["fh_w"] = nrm(next(ki), (64 * 4 * 4, HIDDEN_DIM)); p["fh_b"] = nrm(next(ki), (HIDDEN_DIM,))
    # heads
    p["mu_w"] = nrm(next(ki), (HIDDEN_DIM, LATENT_CONT)); p["mu_b"] = nrm(next(ki), (LATENT_CONT,))
    p["k_w"] = nrm(next(ki), (HIDDEN_DIM, 1));            p["k_b"] = nrm(next(ki), (1,))
    p["alpha_w"] = [nrm(next(ki), (HIDDEN_DIM * VIEW_NUM, d)) for d in LATENT_SPEC["disc"]]
    p["alpha_b"] = [nrm(next(ki), (d,)) for d in LATENT_SPEC["disc"]]
    # shared decoder: Linear(latent, hidden) ReLU, Linear(hidden, 1024) ReLU
    p["l2f1_w"] = nrm(next(ki), (LATENT_DIM, HIDDEN_DIM)); p["l2f1_b"] = nrm(next(ki), (HIDDEN_DIM,))
    p["l2f2_w"] = nrm(next(ki), (HIDDEN_DIM, 64 * 4 * 4)); p["l2f2_b"] = nrm(next(ki), (64 * 4 * 4,))
    # ConvT(64->32) ReLU, ConvT(32->32) ReLU, ConvT(32->C) Sigmoid (PyTorch ConvT layout)
    p["ct1_w"] = nrm(next(ki), (64, 32, 4, 4)); p["ct1_b"] = nrm(next(ki), (32,))
    p["ct2_w"] = nrm(next(ki), (32, 32, 4, 4)); p["ct2_b"] = nrm(next(ki), (32,))
    p["ct3_w"] = nrm(next(ki), (32, IMG_SIZE[0], 4, 4)); p["ct3_b"] = nrm(next(ki), (IMG_SIZE[0],))
    return p


def prepare_params(p):
    """One-time repack of PyTorch-layout params into kernel-ready matrices.

    GEMM weights are cast to bf16 (MXU native rate); biases stay f32 (epilogue).
    """
    bf = lambda a: a.astype(jnp.bfloat16)
    q = {}
    q["w1"] = bf(_conv_w_mat(p["c1_w"])); q["b1"] = p["c1_b"]
    q["w2"] = bf(_conv_w_mat(p["c2_w"])); q["b2"] = p["c2_b"]
    q["w3"] = bf(_conv_w_mat(p["c3_w"])); q["b3"] = p["c3_b"]
    # features_to_hidden: PyTorch flattens conv3 features as (c, h, w); the
    # mid kernel consumes them as (spatial, channel)-minor columns, so regroup
    # the weight rows from (c*16 + s) to (s*64 + c).
    q["wfh"] = bf(p["fh_w"].reshape(64, 16, HIDDEN_DIM).transpose(1, 0, 2)
                  .reshape(16 * 64, HIDDEN_DIM))
    q["bfh"] = p["fh_b"].reshape(1, -1)
    # mu + kappa merged into one (hidden, 8+1) GEMM.
    q["wmk"] = bf(jnp.concatenate([p["mu_w"], p["k_w"]], axis=1))
    q["bmk"] = jnp.concatenate([p["mu_b"], p["k_b"]], axis=0).reshape(1, -1)
    wa = p["alpha_w"][0]
    q["wa1"] = bf(wa[:HIDDEN_DIM, :])      # view-1 half of the fusion weight
    q["wa2"] = bf(wa[HIDDEN_DIM:, :])      # view-2 half
    q["ba"] = p["alpha_b"][0].reshape(1, -1)
    q["wl1"] = bf(p["l2f1_w"]); q["bl1"] = p["l2f1_b"].reshape(1, -1)
    # latent_to_features second Linear: permute output columns from PyTorch's
    # (c, h, w) flatten order to the decoder's NHWC (h, w, c) order.
    q["wl2"] = bf(p["l2f2_w"].reshape(HIDDEN_DIM, 64, 16).transpose(0, 2, 1)
                  .reshape(HIDDEN_DIM, 1024))
    q["bl2"] = p["l2f2_b"].reshape(64, 16).transpose(1, 0).reshape(1, 1024)
    q["wct1"] = bf(_convt_eff_w(p["ct1_w"])); q["bct1"] = jnp.tile(p["ct1_b"], 4)
    q["wct2"] = bf(_convt_eff_w(p["ct2_w"])); q["bct2"] = jnp.tile(p["ct2_b"], 4)
    q["wct3"] = bf(_convt_eff_w(p["ct3_w"])); q["bct3"] = jnp.tile(p["ct3_b"], 4)
    return q


# ------------------------------- forward ------------------------------------
def vae_forward(q, x1, x2, key):
    n = x1.shape[0]
    x = jnp.concatenate([x1, x2], axis=0)              # (2N, C, 32, 32), views batched
    x = x.transpose(0, 2, 3, 1).astype(jnp.bfloat16)   # NHWC, bf16 activations

    # ---------------- encoder ----------------
    p1, oh, ow = _im2col_nhwc(x, 4, 2, 1)              # (2N*256, 16)
    y1 = gemm_bias_act(p1, q["w1"], q["b1"], "relu")   # conv1 -> (2N*256, 32)
    y1 = y1.reshape(2 * n, oh, ow, 32)

    p2, oh, ow = _im2col_nhwc(y1, 4, 2, 1)             # (2N*64, 512)
    y2 = gemm_bias_act(p2, q["w2"], q["b2"], "relu")   # conv2 -> (2N*64, 64)
    y2 = y2.reshape(2 * n, oh, ow, 64)

    p3, oh, ow = _im2col_nhwc(y2, 4, 2, 1)             # (2N*16, 1024), rows sample-major
    y3 = gemm_bias_act(p3, q["w3"], q["b3"], "relu")   # conv3: ONE (2N*16,1024)@(1024,64) GEMM
    y3_flat = y3.reshape(2 * n, oh * ow * 64)          # (2N, 1024), (spatial, channel) cols

    unif = jax.random.uniform(key, (n, LATENT_DISC), dtype=jnp.float32)
    heads, feat = mid_block(y3_flat, q, unif, n)       # fused hidden/heads/gumbel/l2f
    mu = heads[:2 * n, :LATENT_CONT]
    kappa = heads[:2 * n, LATENT_CONT:LATENT_CONT + 1]
    alpha = heads[:n, LATENT_CONT + 1:]

    latent_dist = {
        "cont1": [mu[:n], kappa[:n]],
        "cont2": [mu[n:], kappa[n:]],
        "disc": [alpha],
    }

    # ---------------- decoder (both views batched) ----------------
    f = feat[:2 * n].reshape(2 * n, 4, 4, 64)          # NHWC feature map

    pt1, oh, ow = _im2col_nhwc(f, 3, 1, 1)             # (2N*16, 576)
    d1 = gemm_bias_act(pt1, q["wct1"], q["bct1"], "relu")            # (2N*16, 128)
    d1 = _depth_to_space_nhwc(d1, 2 * n, oh, ow, 32)   # (2N, 8, 8, 32)

    pt2, oh, ow = _im2col_nhwc(d1, 3, 1, 1)            # (2N*64, 288)
    d2 = gemm_bias_act(pt2, q["wct2"], q["bct2"], "relu")            # (2N*64, 128)
    d2 = _depth_to_space_nhwc(d2, 2 * n, oh, ow, 32)   # (2N, 16, 16, 32)

    pt3, oh, ow = _im2col_nhwc(d2, 3, 1, 1)            # (2N*256, 288)
    d3 = gemm_bias_act(pt3, q["wct3"], q["bct3"], "sigmoid",
                       out_dtype=jnp.float32)                        # (2N*256, 4)
    d3 = _depth_to_space_nhwc(d3, 2 * n, oh, ow, IMG_SIZE[0])        # (2N, 32, 32, C)
    imgs = d3.transpose(0, 3, 1, 2)                    # NCHW

    out_list = [imgs[:n], imgs[n:]]
    return out_list, latent_dist


# --------------------------------- main --------------------------------------
if __name__ == "__main__":
    key = jax.random.PRNGKey(0)
    key, kp, kx1, kx2, ks = jax.random.split(key, 5)
    params = init_params(kp)
    prep = prepare_params(params)

    N = 2
    x1 = jax.random.uniform(kx1, (N,) + IMG_SIZE, dtype=jnp.float32)
    x2 = jax.random.uniform(kx2, (N,) + IMG_SIZE, dtype=jnp.float32)

    fwd = jax.jit(vae_forward)
    out_list, latent_dist = fwd(prep, x1, x2, ks)

    for o in out_list:
        o = jax.block_until_ready(o)
        assert o.shape == (N,) + IMG_SIZE
        assert bool(jnp.all(jnp.isfinite(o)))
    for i in range(VIEW_NUM):
        mu, kappa = latent_dist["cont" + str(i + 1)]
        mu = jax.block_until_ready(mu)
        kappa = jax.block_until_ready(kappa)
        assert mu.shape == (N, LATENT_CONT) and kappa.shape == (N, 1)
        assert bool(jnp.all(jnp.isfinite(mu))) and bool(jnp.all(jnp.isfinite(kappa)))
    for a in latent_dist["disc"]:
        a = jax.block_until_ready(a)
        assert a.shape == (N, LATENT_SPEC["disc"][0])
        assert bool(jnp.all(jnp.isfinite(a)))

    print("KERNEL_OK")
</pallas_src>

<mosaic_0001>
module attributes {stable_mosaic.version = 11 : i64} {
  func.func @_gemm_bias_act_kernel(%arg0: i32, %arg1: memref<512x16xbf16, #tpu.memory_space<vmem>>, %arg2: memref<16x32xbf16, #tpu.memory_space<vmem>>, %arg3: memref<1x32xf32, #tpu.memory_space<vmem>>, %arg4: memref<512x32xbf16, #tpu.memory_space<vmem>>) attributes {dimension_semantics = [#tpu.dimension_semantics<parallel>], iteration_bounds = array<i64: 2>, scalar_prefetch = 0 : i64, scratch_operands = 0 : i64, tpu.core_type = #tpu.core_type<tc>, window_params = [{transform_indices = @transform_0, window_bounds = array<i64: 512, 16>}, {pipeline_mode = #tpu.pipeline_mode<synchronous>, transform_indices = @transform_1, window_bounds = array<i64: 16, 32>}, {pipeline_mode = #tpu.pipeline_mode<synchronous>, transform_indices = @transform_2, window_bounds = array<i64: 1, 32>}, {transform_indices = @transform_3, window_bounds = array<i64: 512, 32>}]} {
    %c0 = arith.constant 0 : index
    %c0_0 = arith.constant 0 : index
    %0 = vector.load %arg1[%c0, %c0_0] : memref<512x16xbf16, #tpu.memory_space<vmem>>, vector<512x16xbf16>
    %c0_1 = arith.constant 0 : index
    %c0_2 = arith.constant 0 : index
    %1 = vector.load %arg2[%c0_1, %c0_2] : memref<16x32xbf16, #tpu.memory_space<vmem>>, vector<16x32xbf16>
    %cst = arith.constant dense<0.000000e+00> : vector<512x32xf32>
    %2 = tpu.matmul %0, %1, %cst {dimension_numbers = #tpu.dot_dimension_numbers<[1], [0], [0], [1], [0, 0, 1, 1], [], []>} : vector<512x16xbf16>, vector<16x32xbf16>, vector<512x32xf32> -> vector<512x32xf32>
    %c0_3 = arith.constant 0 : index
    %c0_4 = arith.constant 0 : index
    %3 = vector.load %arg3[%c0_3, %c0_4] : memref<1x32xf32, #tpu.memory_space<vmem>>, vector<1x32xf32>
    %4 = vector.broadcast %3 : vector<1x32xf32> to vector<512x32xf32>
    %5 = arith.addf %2, %4 : vector<512x32xf32>
    %cst_5 = arith.constant 0.000000e+00 : f32
    %6 = vector.broadcast %cst_5 : f32 to vector<512x32xf32>
    %7 = arith.maximumf %5, %6 : vector<512x32xf32>
    %8 = arith.truncf %7 : vector<512x32xf32> to vector<512x32xbf16>
    %c0_6 = arith.constant 0 : index
    %c0_7 = arith.constant 0 : index
    %9 = vector.load %arg4[%c0_6, %c0_7] : memref<512x32xbf16, #tpu.memory_space<vmem>>, vector<512x32xbf16>
    tpu.vector_store %arg4[%c0_6, %c0_7], %8 {strides = array<i32>} : memref<512x32xbf16, #tpu.memory_space<vmem>>, vector<512x32xbf16>,
    return
  }
  func.func @transform_0(%arg0: i32) -> (i32, i32) {
    %c0_i32 = arith.constant 0 : i32
    %c0_i32_0 = arith.constant 0 : i32
    return %arg0, %c0_i32 : i32, i32
  }
  func.func @transform_1(%arg0: i32) -> (i32, i32) {
    %c0_i32 = arith.constant 0 : i32
    %c0_i32_0 = arith.constant 0 : i32
    %c0_i32_1 = arith.constant 0 : i32
    return %c0_i32, %c0_i32_0 : i32, i32
  }
  func.func @transform_2(%arg0: i32) -> (i32, i32) {
    %c0_i32 = arith.constant 0 : i32
    %c0_i32_0 = arith.constant 0 : i32
    %c0_i32_1 = arith.constant 0 : i32
    return %c0_i32, %c0_i32_0 : i32, i32
  }
  func.func @transform_3(%arg0: i32) -> (i32, i32) {
    %c0_i32 = arith.constant 0 : i32
    %c0_i32_0 = arith.constant 0 : i32
    return %arg0, %c0_i32 : i32, i32
  }
}

module attributes {stable_mosaic.version = 11 : i64} {
  func.func @_gemm_bias_act_kernel(%arg0: memref<256x512xbf16, #tpu.memory_space<vmem>>, %arg1: memref<512x64xbf16, #tpu.memory_space<vmem>>, %arg2: memref<1x64xf32, #tpu.memory_space<vmem>>, %arg3: memref<256x64xbf16, #tpu.memory_space<vmem>>) attributes {dimension_semantics = [], scalar_prefetch = 0 : i64, scratch_operands = 0 : i64, tpu.core_type = #tpu.core_type<tc>} {
    %c0 = arith.constant 0 : index
    %c0_0 = arith.constant 0 : index
    %0 = vector.load %arg0[%c0, %c0_0] : memref<256x512xbf16, #tpu.memory_space<vmem>>, vector<256x512xbf16>
    %c0_1 = arith.constant 0 : index
    %c0_2 = arith.constant 0 : index
    %1 = vector.load %arg1[%c0_1, %c0_2] : memref<512x64xbf16, #tpu.memory_space<vmem>>, vector<512x64xbf16>
    %cst = arith.constant dense<0.000000e+00> : vector<256x64xf32>
    %2 = tpu.matmul %0, %1, %cst {dimension_numbers = #tpu.dot_dimension_numbers<[1], [0], [0], [1], [0, 0, 1, 1], [], []>} : vector<256x512xbf16>, vector<512x64xbf16>, vector<256x64xf32> -> vector<256x64xf32>
    %c0_3 = arith.constant 0 : index
    %c0_4 = arith.constant 0 : index
    %3 = vector.load %arg2[%c0_3, %c0_4] : memref<1x64xf32, #tpu.memory_space<vmem>>, vector<1x64xf32>
    %4 = vector.broadcast %3 : vector<1x64xf32> to vector<256x64xf32>
    %5 = arith.addf %2, %4 : vector<256x64xf32>
    %cst_5 = arith.constant 0.000000e+00 : f32
    %6 = vector.broadcast %cst_5 : f32 to vector<256x64xf32>
    %7 = arith.maximumf %5, %6 : vector<256x64xf32>
    %8 = arith.truncf %7 : vector<256x64xf32> to vector<256x64xbf16>
    %c0_6 = arith.constant 0 : index
    %c0_7 = arith.constant 0 : index
    %9 = vector.load %arg3[%c0_6, %c0_7] : memref<256x64xbf16, #tpu.memory_space<vmem>>, vector<256x64xbf16>
    tpu.vector_store %arg3[%c0_6, %c0_7], %8 {strides = array<i32>} : memref<256x64xbf16, #tpu.memory_space<vmem>>, vector<256x64xbf16>,
    return
  }
}

module attributes {stable_mosaic.version = 11 : i64} {
  func.func @_gemm_bias_act_kernel(%arg0: memref<64x1024xbf16, #tpu.memory_space<vmem>>, %arg1: memref<1024x64xbf16, #tpu.memory_space<vmem>>, %arg2: memref<1x64xf32, #tpu.memory_space<vmem>>, %arg3: memref<64x64xbf16, #tpu.memory_space<vmem>>) attributes {dimension_semantics = [], scalar_prefetch = 0 : i64, scratch_operands = 0 : i64, tpu.core_type = #tpu.core_type<tc>} {
    %c0 = arith.constant 0 : index
    %c0_0 = arith.constant 0 : index
    %0 = vector.load %arg0[%c0, %c0_0] : memref<64x1024xbf16, #tpu.memory_space<vmem>>, vector<64x1024xbf16>
    %c0_1 = arith.constant 0 : index
    %c0_2 = arith.constant 0 : index
    %1 = vector.load %arg1[%c0_1, %c0_2] : memref<1024x64xbf16, #tpu.memory_space<vmem>>, vector<1024x64xbf16>
    %cst = arith.constant dense<0.000000e+00> : vector<64x64xf32>
    %2 = tpu.matmul %0, %1, %cst {dimension_numbers = #tpu.dot_dimension_numbers<[1], [0], [0], [1], [0, 0, 1, 1], [], []>} : vector<64x1024xbf16>, vector<1024x64xbf16>, vector<64x64xf32> -> vector<64x64xf32>
    %c0_3 = arith.constant 0 : index
    %c0_4 = arith.constant 0 : index
    %3 = vector.load %arg2[%c0_3, %c0_4] : memref<1x64xf32, #tpu.memory_space<vmem>>, vector<1x64xf32>
    %4 = vector.broadcast %3 : vector<1x64xf32> to vector<64x64xf32>
    %5 = arith.addf %2, %4 : vector<64x64xf32>
    %cst_5 = arith.constant 0.000000e+00 : f32
    %6 = vector.broadcast %cst_5 : f32 to vector<64x64xf32>
    %7 = arith.maximumf %5, %6 : vector<64x64xf32>
    %8 = arith.truncf %7 : vector<64x64xf32> to vector<64x64xbf16>
    %c0_6 = arith.constant 0 : index
    %c0_7 = arith.constant 0 : index
    %9 = vector.load %arg3[%c0_6, %c0_7] : memref<64x64xbf16, #tpu.memory_space<vmem>>, vector<64x64xbf16>
    tpu.vector_store %arg3[%c0_6, %c0_7], %8 {strides = array<i32>} : memref<64x64xbf16, #tpu.memory_space<vmem>>, vector<64x64xbf16>,
    return
  }
}

module attributes {stable_mosaic.version = 11 : i64} {
  func.func @_mid_kernel(%arg0: memref<8x1024xbf16, #tpu.memory_space<vmem>>, %arg1: memref<1024x64xbf16, #tpu.memory_space<vmem>>, %arg2: memref<1x64xf32, #tpu.memory_space<vmem>>, %arg3: memref<64x9xbf16, #tpu.memory_space<vmem>>, %arg4: memref<1x9xf32, #tpu.memory_space<vmem>>, %arg5: memref<64x10xbf16, #tpu.memory_space<vmem>>, %arg6: memref<64x10xbf16, #tpu.memory_space<vmem>>, %arg7: memref<1x10xf32, #tpu.memory_space<vmem>>, %arg8: memref<2x10xf32, #tpu.memory_space<vmem>>, %arg9: memref<18x64xbf16, #tpu.memory_space<vmem>>, %arg10: memref<1x64xf32, #tpu.memory_space<vmem>>, %arg11: memref<64x1024xbf16, #tpu.memory_space<vmem>>, %arg12: memref<1x1024xf32, #tpu.memory_space<vmem>>, %arg13: memref<8x19xf32, #tpu.memory_space<vmem>>, %arg14: memref<8x1024xbf16, #tpu.memory_space<vmem>>) attributes {dimension_semantics = [], scalar_prefetch = 0 : i64, scratch_operands = 0 : i64, tpu.core_type = #tpu.core_type<tc>} {
    %c0 = arith.constant 0 : index
    %c0_0 = arith.constant 0 : index
    %0 = vector.load %arg0[%c0, %c0_0] : memref<8x1024xbf16, #tpu.memory_space<vmem>>, vector<8x1024xbf16>
    %c0_1 = arith.constant 0 : index
    %c0_2 = arith.constant 0 : index
    %1 = vector.load %arg1[%c0_1, %c0_2] : memref<1024x64xbf16, #tpu.memory_space<vmem>>, vector<1024x64xbf16>
    %cst = arith.constant dense<0.000000e+00> : vector<8x64xf32>
    %2 = tpu.matmul %0, %1, %cst {dimension_numbers = #tpu.dot_dimension_numbers<[1], [0], [0], [1], [0, 0, 1, 1], [], []>} : vector<8x1024xbf16>, vector<1024x64xbf16>, vector<8x64xf32> -> vector<8x64xf32>
    %c0_3 = arith.constant 0 : index
    %c0_4 = arith.constant 0 : index
    %3 = vector.load %arg2[%c0_3, %c0_4] : memref<1x64xf32, #tpu.memory_space<vmem>>, vector<1x64xf32>
    %4 = vector.broadcast %3 : vector<1x64xf32> to vector<8x64xf32>
    %5 = arith.addf %2, %4 : vector<8x64xf32>
    %cst_5 = arith.constant 0.000000e+00 : f32
    %6 = vector.broadcast %cst_5 : f32 to vector<8x64xf32>
    %7 = arith.maximumf %5, %6 : vector<8x64xf32>
    %8 = arith.truncf %7 : vector<8x64xf32> to vector<8x64xbf16>
    %c0_6 = arith.constant 0 : index
    %c0_7 = arith.constant 0 : index
    %9 = vector.load %arg3[%c0_6, %c0_7] : memref<64x9xbf16, #tpu.memory_space<vmem>>, vector<64x9xbf16>
    %cst_8 = arith.constant dense<0.000000e+00> : vector<8x9xf32>
    %10 = tpu.matmul %8, %9, %cst_8 {dimension_numbers = #tpu.dot_dimension_numbers<[1], [0], [0], [1], [0, 0, 1, 1], [], []>} : vector<8x64xbf16>, vector<64x9xbf16>, vector<8x9xf32> -> vector<8x9xf32>
    %c0_9 = arith.constant 0 : index
    %c0_10 = arith.constant 0 : index
    %11 = vector.load %arg4[%c0_9, %c0_10] : memref<1x9xf32, #tpu.memory_space<vmem>>, vector<1x9xf32>
    %12 = vector.broadcast %11 : vector<1x9xf32> to vector<8x9xf32>
    %13 = arith.addf %10, %12 : vector<8x9xf32>
    %14 = vector.extract_strided_slice %13 {offsets = [0, 0], sizes = [8, 8], strides = [1, 1]} : vector<8x9xf32> to vector<8x8xf32>
    %15 = vector.extract_strided_slice %13 {offsets = [0, 8], sizes = [8, 1], strides = [1, 1]} : vector<8x9xf32> to vector<8x1xf32>
    %16 = arith.mulf %14, %14 : vector<8x8xf32>
    %cst_11 = arith.constant dense<0.000000e+00> : vector<8xf32>
    %17 = vector.multi_reduction <add>, %16, %cst_11 [1] : vector<8x8xf32> to vector<8xf32>
    %18 = vector.shape_cast %17 : vector<8xf32> to vector<8x1xf32>
    %cst_12 = arith.constant 9.99999996E-13 : f32
    %19 = vector.broadcast %cst_12 : f32 to vector<8x1xf32>
    %20 = arith.addf %18, %19 : vector<8x1xf32>
    %21 = math.rsqrt %20 : vector<8x1xf32>
    %22 = vector.broadcast %21 : vector<8x1xf32> to vector<8x8xf32>
    %23 = arith.mulf %14, %22 : vector<8x8xf32>
    %cst_13 = arith.constant 0.000000e+00 : f32
    %24 = vector.broadcast %cst_13 : f32 to vector<8x1xf32>
    %25 = arith.maximumf %15, %24 : vector<8x1xf32>
    %26 = vector.broadcast %cst_13 : f32 to vector<8x1xf32>
    %27 = arith.subf %15, %26 : vector<8x1xf32>
    %28 = arith.cmpf one, %27, %27 : vector<8x1xf32>
    %29 = vector.broadcast %cst_13 : f32 to vector<8x1xf32>
    %30 = arith.addf %15, %29 : vector<8x1xf32>
    %31 = math.absf %27 : vector<8x1xf32>
    %cst_14 = arith.constant 0.000000e+00 : f32
    %32 = vector.broadcast %cst_14 : f32 to vector<8x1xf32>
    %33 = arith.subf %32, %31 : vector<8x1xf32>
    %34 = math.exp %33 : vector<8x1xf32>
    %35 = math.log1p %34 : vector<8x1xf32>
    %36 = arith.addf %25, %35 : vector<8x1xf32>
    %37 = arith.select %28, %30, %36 : vector<8x1xi1>, vector<8x1xf32>
    %cst_15 = arith.constant 2.000000e+01 : f32
    %38 = vector.broadcast %cst_15 : f32 to vector<8x1xf32>
    %39 = arith.addf %37, %38 : vector<8x1xf32>
    %40 = vector.extract_strided_slice %7 {offsets = [0, 0], sizes = [2, 64], strides = [1, 1]} : vector<8x64xf32> to vector<2x64xf32>
    %41 = arith.truncf %40 : vector<2x64xf32> to vector<2x64xbf16>
    %42 = vector.extract_strided_slice %7 {offsets = [2, 0], sizes = [2, 64], strides = [1, 1]} : vector<8x64xf32> to vector<2x64xf32>
    %43 = arith.truncf %42 : vector<2x64xf32> to vector<2x64xbf16>
    %c0_16 = arith.constant 0 : index
    %c0_17 = arith.constant 0 : index
    %44 = vector.load %arg5[%c0_16, %c0_17] : memref<64x10xbf16, #tpu.memory_space<vmem>>, vector<64x10xbf16>
    %cst_18 = arith.constant dense<0.000000e+00> : vector<2x10xf32>
    %45 = tpu.matmul %41, %44, %cst_18 {dimension_numbers = #tpu.dot_dimension_numbers<[1], [0], [0], [1], [0, 0, 1, 1], [], []>} : vector<2x64xbf16>, vector<64x10xbf16>, vector<2x10xf32> -> vector<2x10xf32>
    %c0_19 = arith.constant 0 : index
    %c0_20 = arith.constant 0 : index
    %46 = vector.load %arg6[%c0_19, %c0_20] : memref<64x10xbf16, #tpu.memory_space<vmem>>, vector<64x10xbf16>
    %cst_21 = arith.constant dense<0.000000e+00> : vector<2x10xf32>
    %47 = tpu.matmul %43, %46, %cst_21 {dimension_numbers = #tpu.dot_dimension_numbers<[1], [0], [0], [1], [0, 0, 1, 1], [], []>} : vector<2x64xbf16>, vector<64x10xbf16>, vector<2x10xf32> -> vector<2x10xf32>
    %48 = arith.addf %45, %47 : vector<2x10xf32>
    %c0_22 = arith.constant 0 : index
    %c0_23 = arith.constant 0 : index
    %49 = vector.load %arg7[%c0_22, %c0_23] : memref<1x10xf32, #tpu.memory_space<vmem>>, vector<1x10xf32>
    %50 = vector.broadcast %49 : vector<1x10xf32> to vector<2x10xf32>
    %51 = arith.addf %48, %50 : vector<2x10xf32>
    %cst_24 = arith.constant dense<0xFF800000> : vector<2xf32>
    %52 = vector.multi_reduction <maximumf>, %51, %cst_24 [1] : vector<2x10xf32> to vector<2xf32>
    %cst_25 = arith.constant 0xFF800000 : f32
    %53 = vector.broadcast %cst_25 : f32 to vector<2xf32>
    %54 = arith.maximumf %53, %52 : vector<2xf32>
    %55 = vector.shape_cast %54 : vector<2xf32> to vector<2x1xf32>
    %56 = vector.broadcast %55 : vector<2x1xf32> to vector<2x10xf32>
    %57 = arith.subf %51, %56 : vector<2x10xf32>
    %58 = math.exp %57 : vector<2x10xf32>
    %cst_26 = arith.constant dense<0.000000e+00> : vector<2xf32>
    %59 = vector.multi_reduction <add>, %58, %cst_26 [1] : vector<2x10xf32> to vector<2xf32>
    %60 = vector.shape_cast %59 : vector<2xf32> to vector<2x1xf32>
    %61 = vector.broadcast %60 : vector<2x1xf32> to vector<2x10xf32>
    %62 = arith.divf %58, %61 : vector<2x10xf32>
    %c0_27 = arith.constant 0 : index
    %c0_28 = arith.constant 0 : index
    %63 = vector.load %arg8[%c0_27, %c0_28] : memref<2x10xf32, #tpu.memory_space<vmem>>, vector<2x10xf32>
    %cst_29 = arith.constant 9.99999996E-13 : f32
    %64 = vector.broadcast %cst_29 : f32 to vector<2x10xf32>
    %65 = arith.addf %63, %64 : vector<2x10xf32>
    %66 = math.log %65 : vector<2x10xf32>
    %cst_30 = arith.constant 0.000000e+00 : f32
    %67 = vector.broadcast %cst_30 : f32 to vector<2x10xf32>
    %68 = arith.subf %67, %66 : vector<2x10xf32>
    %cst_31 = arith.constant 9.99999996E-13 : f32
    %69 = vector.broadcast %cst_31 : f32 to vector<2x10xf32>
    %70 = arith.addf %68, %69 : vector<2x10xf32>
    %71 = math.log %70 : vector<2x10xf32>
    %cst_32 = arith.constant 0.000000e+00 : f32
    %72 = vector.broadcast %cst_32 : f32 to vector<2x10xf32>
    %73 = arith.subf %72, %71 : vector<2x10xf32>
    %cst_33 = arith.constant 9.99999996E-13 : f32
    %74 = vector.broadcast %cst_33 : f32 to vector<2x10xf32>
    %75 = arith.addf %62, %74 : vector<2x10xf32>
    %76 = math.log %75 : vector<2x10xf32>
    %77 = arith.addf %76, %73 : vector<2x10xf32>
    %cst_34 = arith.constant 6.700000e-01 : f32
    %78 = vector.broadcast %cst_34 : f32 to vector<2x10xf32>
    %79 = arith.divf %77, %78 : vector<2x10xf32>
    %cst_35 = arith.constant dense<0xFF800000> : vector<2xf32>
    %80 = vector.multi_reduction <maximumf>, %79, %cst_35 [1] : vector<2x10xf32> to vector<2xf32>
    %cst_36 = arith.constant 0xFF800000 : f32
    %81 = vector.broadcast %cst_36 : f32 to vector<2xf32>
    %82 = arith.maximumf %81, %80 : vector<2xf32>
    %83 = vector.shape_cast %82 : vector<2xf32> to vector<2x1xf32>
    %84 = vector.broadcast %83 : vector<2x1xf32> to vector<2x10xf32>
    %85 = arith.subf %79, %84 : vector<2x10xf32>
    %86 = math.exp %85 : vector<2x10xf32>
    %cst_37 = arith.constant dense<0.000000e+00> : vector<2xf32>
    %87 = vector.multi_reduction <add>, %86, %cst_37 [1] : vector<2x10xf32> to vector<2xf32>
    %88 = vector.shape_cast %87 : vector<2xf32> to vector<2x1xf32>
    %89 = vector.broadcast %88 : vector<2x1xf32> to vector<2x10xf32>
    %90 = arith.divf %86, %89 : vector<2x10xf32>
    %cst_38 = arith.constant 0.000000e+00 : f32
    %91 = vector.broadcast %cst_38 : f32 to vector<4x10xf32>
    %92 = tpu.concatenate %90, %90, %91 in 0 : vector<2x10xf32>, vector<2x10xf32>, vector<4x10xf32> -> vector<8x10xf32>
    %93 = tpu.concatenate %62, %62, %91 in 0 : vector<2x10xf32>, vector<2x10xf32>, vector<4x10xf32> -> vector<8x10xf32>
    %94 = tpu.concatenate %23, %39, %93 in 1 : vector<8x8xf32>, vector<8x1xf32>, vector<8x10xf32> -> vector<8x19xf32>
    %c0_39 = arith.constant 0 : index
    %c0_40 = arith.constant 0 : index
    %95 = vector.load %arg13[%c0_39, %c0_40] : memref<8x19xf32, #tpu.memory_space<vmem>>, vector<8x19xf32>
    tpu.vector_store %arg13[%c0_39, %c0_40], %94 {strides = array<i32>} : memref<8x19xf32, #tpu.memory_space<vmem>>, vector<8x19xf32>,
    %96 = tpu.concatenate %23, %92 in 1 : vector<8x8xf32>, vector<8x10xf32> -> vector<8x18xf32>
    %97 = arith.truncf %96 : vector<8x18xf32> to vector<8x18xbf16>
    %c0_41 = arith.constant 0 : index
    %c0_42 = arith.constant 0 : index
    %98 = vector.load %arg9[%c0_41, %c0_42] : memref<18x64xbf16, #tpu.memory_space<vmem>>, vector<18x64xbf16>
    %cst_43 = arith.constant dense<0.000000e+00> : vector<8x64xf32>
    %99 = tpu.matmul %97, %98, %cst_43 {dimension_numbers = #tpu.dot_dimension_numbers<[1], [0], [0], [1], [0, 0, 1, 1], [], []>} : vector<8x18xbf16>, vector<18x64xbf16>, vector<8x64xf32> -> vector<8x64xf32>
    %c0_44 = arith.constant 0 : index
    %c0_45 = arith.constant 0 : index
    %100 = vector.load %arg10[%c0_44, %c0_45] : memref<1x64xf32, #tpu.memory_space<vmem>>, vector<1x64xf32>
    %101 = vector.broadcast %100 : vector<1x64xf32> to vector<8x64xf32>
    %102 = arith.addf %99, %101 : vector<8x64xf32>
    %cst_46 = arith.constant 0.000000e+00 : f32
    %103 = vector.broadcast %cst_46 : f32 to vector<8x64xf32>
    %104 = arith.maximumf %102, %103 : vector<8x64xf32>
    %105 = arith.truncf %104 : vector<8x64xf32> to vector<8x64xbf16>
    %c0_47 = arith.constant 0 : index
    %c0_48 = arith.constant 0 : index
    %106 = vector.load %arg11[%c0_47, %c0_48] : memref<64x1024xbf16, #tpu.memory_space<vmem>>, vector<64x1024xbf16>
    %cst_49 = arith.constant dense<0.000000e+00> : vector<8x1024xf32>
    %107 = tpu.matmul %105, %106, %cst_49 {dimension_numbers = #tpu.dot_dimension_numbers<[1], [0], [0], [1], [0, 0, 1, 1], [], []>} : vector<8x64xbf16>, vector<64x1024xbf16>, vector<8x1024xf32> -> vector<8x1024xf32>
    %c0_50 = arith.constant 0 : index
    %c0_51 = arith.constant 0 : index
    %108 = vector.load %arg12[%c0_50, %c0_51] : memref<1x1024xf32, #tpu.memory_space<vmem>>, vector<1x1024xf32>
    %109 = vector.broadcast %108 : vector<1x1024xf32> to vector<8x1024xf32>
    %110 = arith.addf %107, %109 : vector<8x1024xf32>
    %cst_52 = arith.constant 0.000000e+00 : f32
    %111 = vector.broadcast %cst_52 : f32 to vector<8x1024xf32>
    %112 = arith.maximumf %110, %111 : vector<8x1024xf32>
    %113 = arith.truncf %112 : vector<8x1024xf32> to vector<8x1024xbf16>
    %c0_53 = arith.constant 0 : index
    %c0_54 = arith.constant 0 : index
    %114 = vector.load %arg14[%c0_53, %c0_54] : memref<8x1024xbf16, #tpu.memory_space<vmem>>, vector<8x1024xbf16>
    tpu.vector_store %arg14[%c0_53, %c0_54], %113 {strides = array<i32>} : memref<8x1024xbf16, #tpu.memory_space<vmem>>, vector<8x1024xbf16>,
    return
  }
}

module attributes {stable_mosaic.version = 11 : i64} {
  func.func @_gemm_bias_act_kernel(%arg0: memref<64x576xbf16, #tpu.memory_space<vmem>>, %arg1: memref<576x128xbf16, #tpu.memory_space<vmem>>, %arg2: memref<1x128xf32, #tpu.memory_space<vmem>>, %arg3: memref<64x128xbf16, #tpu.memory_space<vmem>>) attributes {dimension_semantics = [], scalar_prefetch = 0 : i64, scratch_operands = 0 : i64, tpu.core_type = #tpu.core_type<tc>} {
    %c0 = arith.constant 0 : index
    %c0_0 = arith.constant 0 : index
    %0 = vector.load %arg0[%c0, %c0_0] : memref<64x576xbf16, #tpu.memory_space<vmem>>, vector<64x576xbf16>
    %c0_1 = arith.constant 0 : index
    %c0_2 = arith.constant 0 : index
    %1 = vector.load %arg1[%c0_1, %c0_2] : memref<576x128xbf16, #tpu.memory_space<vmem>>, vector<576x128xbf16>
    %cst = arith.constant dense<0.000000e+00> : vector<64x128xf32>
    %2 = tpu.matmul %0, %1, %cst {dimension_numbers = #tpu.dot_dimension_numbers<[1], [0], [0], [1], [0, 0, 1, 1], [], []>} : vector<64x576xbf16>, vector<576x128xbf16>, vector<64x128xf32> -> vector<64x128xf32>
    %c0_3 = arith.constant 0 : index
    %c0_4 = arith.constant 0 : index
    %3 = vector.load %arg2[%c0_3, %c0_4] : memref<1x128xf32, #tpu.memory_space<vmem>>, vector<1x128xf32>
    %4 = vector.broadcast %3 : vector<1x128xf32> to vector<64x128xf32>
    %5 = arith.addf %2, %4 : vector<64x128xf32>
    %cst_5 = arith.constant 0.000000e+00 : f32
    %6 = vector.broadcast %cst_5 : f32 to vector<64x128xf32>
    %7 = arith.maximumf %5, %6 : vector<64x128xf32>
    %8 = arith.truncf %7 : vector<64x128xf32> to vector<64x128xbf16>
    %c0_6 = arith.constant 0 : index
    %c0_7 = arith.constant 0 : index
    %9 = vector.load %arg3[%c0_6, %c0_7] : memref<64x128xbf16, #tpu.memory_space<vmem>>, vector<64x128xbf16>
    tpu.vector_store %arg3[%c0_6, %c0_7], %8 {strides = array<i32>} : memref<64x128xbf16, #tpu.memory_space<vmem>>, vector<64x128xbf16>,
    return
  }
}

module attributes {stable_mosaic.version = 11 : i64} {
  func.func @_gemm_bias_act_kernel(%arg0: memref<256x288xbf16, #tpu.memory_space<vmem>>, %arg1: memref<288x128xbf16, #tpu.memory_space<vmem>>, %arg2: memref<1x128xf32, #tpu.memory_space<vmem>>, %arg3: memref<256x128xbf16, #tpu.memory_space<vmem>>) attributes {dimension_semantics = [], scalar_prefetch = 0 : i64, scratch_operands = 0 : i64, tpu.core_type = #tpu.core_type<tc>} {
    %c0 = arith.constant 0 : index
    %c0_0 = arith.constant 0 : index
    %0 = vector.load %arg0[%c0, %c0_0] : memref<256x288xbf16, #tpu.memory_space<vmem>>, vector<256x288xbf16>
    %c0_1 = arith.constant 0 : index
    %c0_2 = arith.constant 0 : index
    %1 = vector.load %arg1[%c0_1, %c0_2] : memref<288x128xbf16, #tpu.memory_space<vmem>>, vector<288x128xbf16>
    %cst = arith.constant dense<0.000000e+00> : vector<256x128xf32>
    %2 = tpu.matmul %0, %1, %cst {dimension_numbers = #tpu.dot_dimension_numbers<[1], [0], [0], [1], [0, 0, 1, 1], [], []>} : vector<256x288xbf16>, vector<288x128xbf16>, vector<256x128xf32> -> vector<256x128xf32>
    %c0_3 = arith.constant 0 : index
    %c0_4 = arith.constant 0 : index
    %3 = vector.load %arg2[%c0_3, %c0_4] : memref<1x128xf32, #tpu.memory_space<vmem>>, vector<1x128xf32>
    %4 = vector.broadcast %3 : vector<1x128xf32> to vector<256x128xf32>
    %5 = arith.addf %2, %4 : vector<256x128xf32>
    %cst_5 = arith.constant 0.000000e+00 : f32
    %6 = vector.broadcast %cst_5 : f32 to vector<256x128xf32>
    %7 = arith.maximumf %5, %6 : vector<256x128xf32>
    %8 = arith.truncf %7 : vector<256x128xf32> to vector<256x128xbf16>
    %c0_6 = arith.constant 0 : index
    %c0_7 = arith.constant 0 : index
    %9 = vector.load %arg3[%c0_6, %c0_7] : memref<256x128xbf16, #tpu.memory_space<vmem>>, vector<256x128xbf16>
    tpu.vector_store %arg3[%c0_6, %c0_7], %8 {strides = array<i32>} : memref<256x128xbf16, #tpu.memory_space<vmem>>, vector<256x128xbf16>,
    return
  }
}

module attributes {stable_mosaic.version = 11 : i64} {
  func.func @_gemm_bias_act_kernel(%arg0: i32, %arg1: memref<512x288xbf16, #tpu.memory_space<vmem>>, %arg2: memref<288x4xbf16, #tpu.memory_space<vmem>>, %arg3: memref<1x4xf32, #tpu.memory_space<vmem>>, %arg4: memref<512x4xf32, #tpu.memory_space<vmem>>) attributes {dimension_semantics = [#tpu.dimension_semantics<parallel>], iteration_bounds = array<i64: 2>, scalar_prefetch = 0 : i64, scratch_operands = 0 : i64, tpu.core_type = #tpu.core_type<tc>, window_params = [{transform_indices = @transform_0, window_bounds = array<i64: 512, 288>}, {pipeline_mode = #tpu.pipeline_mode<synchronous>, transform_indices = @transform_1, window_bounds = array<i64: 288, 4>}, {pipeline_mode = #tpu.pipeline_mode<synchronous>, transform_indices = @transform_2, window_bounds = array<i64: 1, 4>}, {transform_indices = @transform_3, window_bounds = array<i64: 512, 4>}]} {
    %c0 = arith.constant 0 : index
    %c0_0 = arith.constant 0 : index
    %0 = vector.load %arg1[%c0, %c0_0] : memref<512x288xbf16, #tpu.memory_space<vmem>>, vector<512x288xbf16>
    %c0_1 = arith.constant 0 : index
    %c0_2 = arith.constant 0 : index
    %1 = vector.load %arg2[%c0_1, %c0_2] : memref<288x4xbf16, #tpu.memory_space<vmem>>, vector<288x4xbf16>
    %cst = arith.constant dense<0.000000e+00> : vector<512x4xf32>
    %2 = tpu.matmul %0, %1, %cst {dimension_numbers = #tpu.dot_dimension_numbers<[1], [0], [0], [1], [0, 0, 1, 1], [], []>} : vector<512x288xbf16>, vector<288x4xbf16>, vector<512x4xf32> -> vector<512x4xf32>
    %c0_3 = arith.constant 0 : index
    %c0_4 = arith.constant 0 : index
    %3 = vector.load %arg3[%c0_3, %c0_4] : memref<1x4xf32, #tpu.memory_space<vmem>>, vector<1x4xf32>
    %4 = vector.broadcast %3 : vector<1x4xf32> to vector<512x4xf32>
    %5 = arith.addf %2, %4 : vector<512x4xf32>
    %6 = arith.negf %5 : vector<512x4xf32>
    %7 = math.exp %6 : vector<512x4xf32>
    %cst_5 = arith.constant 1.000000e+00 : f32
    %8 = vector.broadcast %cst_5 : f32 to vector<512x4xf32>
    %9 = arith.addf %8, %7 : vector<512x4xf32>
    %10 = arith.divf %8, %9 : vector<512x4xf32>
    %c0_6 = arith.constant 0 : index
    %c0_7 = arith.constant 0 : index
    %11 = vector.load %arg4[%c0_6, %c0_7] : memref<512x4xf32, #tpu.memory_space<vmem>>, vector<512x4xf32>
    tpu.vector_store %arg4[%c0_6, %c0_7], %10 {strides = array<i32>} : memref<512x4xf32, #tpu.memory_space<vmem>>, vector<512x4xf32>,
    return
  }
  func.func @transform_0(%arg0: i32) -> (i32, i32) {
    %c0_i32 = arith.constant 0 : i32
    %c0_i32_0 = arith.constant 0 : i32
    return %arg0, %c0_i32 : i32, i32
  }
  func.func @transform_1(%arg0: i32) -> (i32, i32) {
    %c0_i32 = arith.constant 0 : i32
    %c0_i32_0 = arith.constant 0 : i32
    %c0_i32_1 = arith.constant 0 : i32
    return %c0_i32, %c0_i32_0 : i32, i32
  }
  func.func @transform_2(%arg0: i32) -> (i32, i32) {
    %c0_i32 = arith.constant 0 : i32
    %c0_i32_0 = arith.constant 0 : i32
    %c0_i32_1 = arith.constant 0 : i32
    return %c0_i32, %c0_i32_0 : i32, i32
  }
  func.func @transform_3(%arg0: i32) -> (i32, i32) {
    %c0_i32 = arith.constant 0 : i32
    %c0_i32_0 = arith.constant 0 : i32
    return %arg0, %c0_i32 : i32, i32
  }
}

</mosaic_0001>

<bundles_post_ra>
// kernel: vae_forward.7
= control target key start
LH: loop header
LB: loop body
LE: loop exit
PB: predicated region body
PF: predicated region fallthrough
CT: control target
= control target key end

     0   :  { %s1616_s12 = smov 0   ;;  %s1908_s0 = inlined_call_operand.vmem [shape: bf16[1024,16], index: 0, kind: input, shape index: {}]   ;;  %s1909_s1 = inlined_call_operand.vmem [shape: bf16[16,32], index: 1, kind: input, shape index: {}]   ;;  %s1910_s2 = inlined_call_operand.vmem [shape: f32[1,32], index: 2, kind: input, shape index: {}]   ;;  %s1911_s3 = inlined_call_operand.vmem [shape: bf16[1024,32], index: 3, kind: output, shape index: {}]  }
   0x1 LB: > { %s1241_s13 = sadd.s32 4294967295, %s1594_s12   ;;  %p1245_p0 = scmp.ge.s32.totalorder %s1594_s12, 1  ;;  %s1594_s12 = sphi %s1616_s12, %s13_s12  }
   0x2   : > { %p138_p1 = scmp.lt.s32.totalorder %s1594_s12, 3 }
   0x4   : > { %p139_p2 = pnand %p1245_p0, %p138_p1 }
   0x5   : > { %s1246_s16 = sshll.u32 (!%p139_p2), %s1241_s13, 6 }
   0x6   : > { %142 = sbr.rel (%p139_p2) target bundleno = 279 (0x117), region = 32  ;;  %p163_p3 = scmp.lt.s32.totalorder (!%p139_p2), %s1246_s16, 127 }
   0xb   : > { %v1555_v0 = vld [vmem:[%s1909_s1] sm:$0xff]   ;;  %s1913_s16 = smov (!%p163_p3, %s1246_s16), 127  ;;  %vm414_vm0 = vcmask 130048   ;;  %vm1120_vm1 = vcmask 257024  }
   0xc   : > { %1479 = vmatprep.subr.bf16.mxu0 %v1555_v0  ;;  %1545 = vmatprep.subr.bf16.mxu1 %v1555_v0  ;;  %s1247_s17 = sshll.u32 %s1913_s16, 2  ;;  %v1704_v33 = vld [vmem:[%s1910_s2] ss:$0 sm:$0xff] }
   0xd   : > { %1480 = vmatpush3.bf16.msra.mxu0 %v1555_v0  ;;  %1546 = vmatpush3.bf16.msra.mxu1 %v1555_v0  ;;  %s1635_s20 = scalar_lea.vmem %s1908_s0, %s1247_s17  ;;  %s1714_s25 = scalar_lea.vmem %s1911_s3, %s1247_s17 }
   0xe   : > { %v1556_v1 = vld [vmem:[%s1635_s20] sm:$0xff]   ;;  %v1558_v3 = vld [vmem:[%s1635_s20 + $0x8] sm:$0xff]   ;;  %v1560_v5 = vld [vmem:[%s1635_s20 + $0x10] sm:$0xff]  }
   0xf   : > { %v1557_v2 = vld [vmem:[%s1635_s20 + $0x80] sm:$0xff]   ;;  %1481 = vmatprep.mubr.msk.bf16.mxu0 %vm414_vm0, %v1556_v1  ;;  %v1559_v4 = vld [vmem:[%s1635_s20 + $0x88] sm:$0xff]   ;;  %v1561_v6 = vld [vmem:[%s1635_s20 + $0x90] sm:$0xff]  }
  0x10   : > { %1513 = vmatprep.mubr.msk.bf16.mxu1 %vm414_vm0, %v1557_v2  ;;  %1482 = vmatmul.mubr.msk.bf16.vlgmr.msra.gmra.mxu0 %vm414_vm0, %v1558_v3  ;;  %v1562_v7 = vld [vmem:[%s1635_s20 + $0x18] sm:$0xff]   ;;  %v1564_v9 = vld [vmem:[%s1635_s20 + $0x20] sm:$0xff]   ;;  %v1566_v11 = vld [vmem:[%s1635_s20 + $0x28] sm:$0xff]  }
  0x11   : > { %1514 = vmatmul.mubr.msk.bf16.vlgmr.msra.gmra.mxu1 %vm414_vm0, %v1559_v4  ;;  %1485 = vmatprep.mubr.msk.bf16.mxu0 %vm414_vm0, %v1560_v5  ;;  %v1563_v8 = vld [vmem:[%s1635_s20 + $0x98] sm:$0xff]   ;;  %v1565_v10 = vld [vmem:[%s1635_s20 + $0xa0] sm:$0xff]   ;;  %v1567_v12 = vld [vmem:[%s1635_s20 + $0xa8] sm:$0xff]  }
  0x12   : > { %1517 = vmatprep.mubr.msk.bf16.mxu1 %vm414_vm0, %v1561_v6  ;;  %v1568_v13 = vld [vmem:[%s1635_s20 + $0x30] sm:$0xff]   ;;  %v1570_v15 = vld [vmem:[%s1635_s20 + $0x38] sm:$0xff]   ;;  %v1572_v17 = vld [vmem:[%s1635_s20 + $0x40] sm:$0xff]  }
  0x13   : > { %v1569_v14 = vld [vmem:[%s1635_s20 + $0xb0] sm:$0xff]   ;;  %v1571_v16 = vld [vmem:[%s1635_s20 + $0xb8] sm:$0xff]   ;;  %v1573_v18 = vld [vmem:[%s1635_s20 + $0xc0] sm:$0xff]  }
  0x14   : > { %v1574_v19 = vld [vmem:[%s1635_s20 + $0x48] sm:$0xff]   ;;  %v1576_v21 = vld [vmem:[%s1635_s20 + $0x50] sm:$0xff]   ;;  %v1578_v23 = vld [vmem:[%s1635_s20 + $0x58] sm:$0xff]  }
  0x15   : > { %v1575_v20 = vld [vmem:[%s1635_s20 + $0xc8] sm:$0xff]   ;;  %v1577_v22 = vld [vmem:[%s1635_s20 + $0xd0] sm:$0xff]   ;;  %v1579_v24 = vld [vmem:[%s1635_s20 + $0xd8] sm:$0xff]  }
  0x16   : > { %v1580_v25 = vld [vmem:[%s1635_s20 + $0x60] sm:$0xff]   ;;  %v1582_v27 = vld [vmem:[%s1635_s20 + $0x68] sm:$0xff]   ;;  %v1584_v29 = vld [vmem:[%s1635_s20 + $0x70] sm:$0xff]  }
  0x17   : > { %v1581_v26 = vld [vmem:[%s1635_s20 + $0xe0] sm:$0xff]   ;;  %v1583_v28 = vld [vmem:[%s1635_s20 + $0xe8] sm:$0xff]   ;;  %v1585_v30 = vld [vmem:[%s1635_s20 + $0xf0] sm:$0xff]  }
  0x18   : > { %1486 = vmatmul.mubr.msk.bf16.gmra.mxu0 %vm414_vm0, %v1562_v7  ;;  %v1586_v31 = vld [vmem:[%s1635_s20 + $0x78] sm:$0xff]  }
  0x19   : > { %1518 = vmatmul.mubr.msk.bf16.gmra.mxu1 %vm414_vm0, %v1563_v8  ;;  %1489 = vmatprep.mubr.msk.bf16.mxu0 %vm414_vm0, %v1564_v9  ;;  %v1587_v32 = vld [vmem:[%s1635_s20 + $0xf8] sm:$0xff]  }
  0x1a   : > { %1521 = vmatprep.mubr.msk.bf16.mxu1 %vm414_vm0, %v1565_v10 }
  0x20   : > { %1490 = vmatmul.mubr.msk.bf16.gmra.mxu0 %vm414_vm0, %v1566_v11 }
  0x21   : > { %1522 = vmatmul.mubr.msk.bf16.gmra.mxu1 %vm414_vm0, %v1567_v12  ;;  %1493 = vmatprep.mubr.msk.bf16.mxu0 %vm414_vm0, %v1568_v13 }
  0x22   : > { %1525 = vmatprep.mubr.msk.bf16.mxu1 %vm414_vm0, %v1569_v14 }
  0x28   : > { %1494 = vmatmul.mubr.msk.bf16.gmra.mxu0 %vm414_vm0, %v1570_v15 }
  0x29   : > { %1526 = vmatmul.mubr.msk.bf16.gmra.mxu1 %vm414_vm0, %v1571_v16  ;;  %1497 = vmatprep.mubr.msk.bf16.mxu0 %vm414_vm0, %v1572_v17 }
  0x2a   : > { %1529 = vmatprep.mubr.msk.bf16.mxu1 %vm414_vm0, %v1573_v18 }
  0x30   : > { %1498 = vmatmul.mubr.msk.bf16.gmra.mxu0 %vm414_vm0, %v1574_v19 }
  0x31   : > { %1530 = vmatmul.mubr.msk.bf16.gmra.mxu1 %vm414_vm0, %v1575_v20  ;;  %1501 = vmatprep.mubr.msk.bf16.mxu0 %vm414_vm0, %v1576_v21 }
  0x32   : > { %1533 = vmatprep.mubr.msk.bf16.mxu1 %vm414_vm0, %v1577_v22 }
  0x38   : > { %1502 = vmatmul.mubr.msk.bf16.gmra.mxu0 %vm414_vm0, %v1578_v23 }
  0x39   : > { %1534 = vmatmul.mubr.msk.bf16.gmra.mxu1 %vm414_vm0, %v1579_v24  ;;  %1505 = vmatprep.mubr.msk.bf16.mxu0 %vm414_vm0, %v1580_v25 }
  0x3a   : > { %1537 = vmatprep.mubr.msk.bf16.mxu1 %vm414_vm0, %v1581_v26 }
  0x40   : > { %1506 = vmatmul.mubr.msk.bf16.gmra.mxu0 %vm414_vm0, %v1582_v27 }
  0x41   : > { %1538 = vmatmul.mubr.msk.bf16.gmra.mxu1 %vm414_vm0, %v1583_v28  ;;  %1509 = vmatprep.mubr.msk.bf16.mxu0 %vm414_vm0, %v1584_v29 }
  0x42   : > { %1541 = vmatprep.mubr.msk.bf16.mxu1 %vm414_vm0, %v1585_v30 }
  0x48   : > { %1510 = vmatmul.mubr.msk.bf16.gmra.mxu0 %vm414_vm0, %v1586_v31 }
  0x49   : > { %1542 = vmatmul.mubr.msk.bf16.gmra.mxu1 %vm414_vm0, %v1587_v32 }
  0xd0   : > { %v1483_v34 = vpop.f32.mrf.mxu0 }
  0xd1   : > { %v554_v35 = vadd.f32 %v1483_v34, %v1704_v33  ;;  %v1515_v36 = vpop.f32.mrf.mxu1 }
  0xd2   : > { %v682_v37 = vadd.f32 %v1515_v36, %v1704_v33  ;;  %v545_v38 = vpop.f32.mrf.mxu0 }
  0xd3   : > { %v802_v39 = vmax.f32 %v554_v35, 0.0  ;;  %v546_v40 = vadd.f32 %v1704_v33, %v545_v38  ;;  %v673_v41 = vpop.f32.mrf.mxu1 }
  0xd4   : > { %v834_v42 = vmax.f32 %v682_v37, 0.0  ;;  %v674_v43 = vadd.f32 %v1704_v33, %v673_v41  ;;  %v1484_v44 = vpop.f32.mrf.mxu0 }
  0xd5   : > { %v1384_v45 = vpack.c.bf16 %v802_v39, %v802_v39  ;;  %v800_v46 = vmax.f32 %v546_v40, 0.0  ;;  %v557_v47 = vadd.f32 %v1484_v44, %v1704_v33  ;;  %v1516_v48 = vpop.f32.mrf.mxu1 }
  0xd6   : > { %v1416_v49 = vpack.c.bf16 %v834_v42, %v834_v42  ;;  %v832_v50 = vmax.f32 %v674_v43, 0.0  ;;  %v685_v51 = vadd.f32 %v1516_v48, %v1704_v33  ;;  %v548_v52 = vpop.f32.mrf.mxu0 }
  0xd7   : > { %1123 = vst.msk [vmem:[%s1714_s25 + $0x8] sm:$0xf] %vm1120_vm1, %v1384_v45  ;;  %v1382_v53 = vpack.c.bf16 %v800_v46, %v800_v46  ;;  %v803_v54 = vmax.f32 %v557_v47, 0.0  ;;  %v549_v55 = vadd.f32 %v1704_v33, %v548_v52  ;;  %v676_v56 = vpop.f32.mrf.mxu1 }
  0xd8   : > { %1155 = vst.msk [vmem:[%s1714_s25 + $0x88] sm:$0xf] %vm1120_vm1, %v1416_v49  ;;  %v1414_v57 = vpack.c.bf16 %v832_v50, %v832_v50  ;;  %v835_v58 = vmax.f32 %v685_v51, 0.0  ;;  %v677_v59 = vadd.f32 %v1704_v33, %v676_v56  ;;  %v1487_v60 = vpop.f32.mrf.mxu0 }
  0xd9   : > { %1121 = vst.msk [vmem:[%s1714_s25] sm:$0xf] %vm1120_vm1, %v1382_v53  ;;  %v1385_v61 = vpack.c.bf16 %v803_v54, %v803_v54  ;;  %v801_v62 = vmax.f32 %v549_v55, 0.0  ;;  %v570_v63 = vadd.f32 %v1487_v60, %v1704_v33  ;;  %v1519_v0 = vpop.f32.mrf.mxu1 }
  0xda   : > { %1153 = vst.msk [vmem:[%s1714_s25 + $0x80] sm:$0xf] %vm1120_vm1, %v1414_v57  ;;  %v1417_v1 = vpack.c.bf16 %v835_v58, %v835_v58  ;;  %v833_v2 = vmax.f32 %v677_v59, 0.0  ;;  %v698_v3 = vadd.f32 %v1519_v0, %v1704_v33  ;;  %v561_v4 = vpop.f32.mrf.mxu0 }
  0xdb   : > { %1124 = vst.msk [vmem:[%s1714_s25 + $0xc] sm:$0xf] %vm1120_vm1, %v1385_v61  ;;  %v1383_v5 = vpack.c.bf16 %v801_v62, %v801_v62  ;;  %v806_v6 = vmax.f32 %v570_v63, 0.0  ;;  %v562_v7 = vadd.f32 %v1704_v33, %v561_v4  ;;  %v689_v8 = vpop.f32.mrf.mxu1 }
  0xdc   : > { %1156 = vst.msk [vmem:[%s1714_s25 + $0x8c] sm:$0xf] %vm1120_vm1, %v1417_v1  ;;  %v1415_v9 = vpack.c.bf16 %v833_v2, %v833_v2  ;;  %v838_v10 = vmax.f32 %v698_v3, 0.0  ;;  %v690_v11 = vadd.f32 %v1704_v33, %v689_v8  ;;  %v1488_v12 = vpop.f32.mrf.mxu0 }
  0xdd   : > { %1122 = vst.msk [vmem:[%s1714_s25 + $0x4] sm:$0xf] %vm1120_vm1, %v1383_v5  ;;  %v1388_v13 = vpack.c.bf16 %v806_v6, %v806_v6  ;;  %v804_v14 = vmax.f32 %v562_v7, 0.0  ;;  %v573_v15 = vadd.f32 %v1488_v12, %v1704_v33  ;;  %v1520_v16 = vpop.f32.mrf.mxu1 }
  0xde   : > { %1154 = vst.msk [vmem:[%s1714_s25 + $0x84] sm:$0xf] %vm1120_vm1, %v1415_v9  ;;  %v1420_v17 = vpack.c.bf16 %v838_v10, %v838_v10  ;;  %v836_v18 = vmax.f32 %v690_v11, 0.0  ;;  %v701_v19 = vadd.f32 %v1520_v16, %v1704_v33  ;;  %v564_v20 = vpop.f32.mrf.mxu0 }
  0xdf   : > { %1127 = vst.msk [vmem:[%s1714_s25 + $0x18] sm:$0xf] %vm1120_vm1, %v1388_v13  ;;  %v1386_v21 = vpack.c.bf16 %v804_v14, %v804_v14  ;;  %v807_v22 = vmax.f32 %v573_v15, 0.0  ;;  %v565_v23 = vadd.f32 %v1704_v33, %v564_v20  ;;  %v692_v24 = vpop.f32.mrf.mxu1 }
  0xe0   : > { %1159 = vst.msk [vmem:[%s1714_s25 + $0x98] sm:$0xf] %vm1120_vm1, %v1420_v17  ;;  %v1418_v25 = vpack.c.bf16 %v836_v18, %v836_v18  ;;  %v839_v26 = vmax.f32 %v701_v19, 0.0  ;;  %v693_v27 = vadd.f32 %v1704_v33, %v692_v24  ;;  %v1491_v28 = vpop.f32.mrf.mxu0 }
  0xe1   : > { %1125 = vst.msk [vmem:[%s1714_s25 + $0x10] sm:$0xf] %vm1120_vm1, %v1386_v21  ;;  %v1389_v29 = vpack.c.bf16 %v807_v22, %v807_v22  ;;  %v805_v30 = vmax.f32 %v565_v23, 0.0  ;;  %v586_v31 = vadd.f32 %v1491_v28, %v1704_v33  ;;  %v1523_v32 = vpop.f32.mrf.mxu1 }
  0xe2   : > { %1157 = vst.msk [vmem:[%s1714_s25 + $0x90] sm:$0xf] %vm1120_vm1, %v1418_v25  ;;  %v1421_v34 = vpack.c.bf16 %v839_v26, %v839_v26  ;;  %v837_v35 = vmax.f32 %v693_v27, 0.0  ;;  %v714_v36 = vadd.f32 %v1523_v32, %v1704_v33  ;;  %v577_v37 = vpop.f32.mrf.mxu0 }
  0xe3   : > { %1128 = vst.msk [vmem:[%s1714_s25 + $0x1c] sm:$0xf] %vm1120_vm1, %v1389_v29  ;;  %v1387_v38 = vpack.c.bf16 %v805_v30, %v805_v30  ;;  %v810_v39 = vmax.f32 %v586_v31, 0.0  ;;  %v578_v40 = vadd.f32 %v1704_v33, %v577_v37  ;;  %v705_v41 = vpop.f32.mrf.mxu1 }
  0xe4   : > { %1160 = vst.msk [vmem:[%s1714_s25 + $0x9c] sm:$0xf] %vm1120_vm1, %v1421_v34  ;;  %v1419_v42 = vpack.c.bf16 %v837_v35, %v837_v35  ;;  %v842_v43 = vmax.f32 %v714_v36, 0.0  ;;  %v706_v44 = vadd.f32 %v1704_v33, %v705_v41  ;;  %v1492_v45 = vpop.f32.mrf.mxu0 }
  0xe5   : > { %1126 = vst.msk [vmem:[%s1714_s25 + $0x14] sm:$0xf] %vm1120_vm1, %v1387_v38  ;;  %v1392_v46 = vpack.c.bf16 %v810_v39, %v810_v39  ;;  %v808_v47 = vmax.f32 %v578_v40, 0.0  ;;  %v589_v48 = vadd.f32 %v1492_v45, %v1704_v33  ;;  %v1524_v49 = vpop.f32.mrf.mxu1 }
  0xe6   : > { %1158 = vst.msk [vmem:[%s1714_s25 + $0x94] sm:$0xf] %vm1120_vm1, %v1419_v42  ;;  %v1424_v50 = vpack.c.bf16 %v842_v43, %v842_v43  ;;  %v840_v51 = vmax.f32 %v706_v44, 0.0  ;;  %v717_v52 = vadd.f32 %v1524_v49, %v1704_v33  ;;  %v580_v53 = vpop.f32.mrf.mxu0 }
  0xe7   : > { %1131 = vst.msk [vmem:[%s1714_s25 + $0x28] sm:$0xf] %vm1120_vm1, %v1392_v46  ;;  %v1390_v54 = vpack.c.bf16 %v808_v47, %v808_v47  ;;  %v811_v55 = vmax.f32 %v589_v48, 0.0  ;;  %v581_v56 = vadd.f32 %v1704_v33, %v580_v53  ;;  %v708_v57 = vpop.f32.mrf.mxu1 }
  0xe8   : > { %1163 = vst.msk [vmem:[%s1714_s25 + $0xa8] sm:$0xf] %vm1120_vm1, %v1424_v50  ;;  %v1422_v58 = vpack.c.bf16 %v840_v51, %v840_v51  ;;  %v843_v59 = vmax.f32 %v717_v52, 0.0  ;;  %v709_v60 = vadd.f32 %v1704_v33, %v708_v57  ;;  %v1495_v61 = vpop.f32.mrf.mxu0 }
  0xe9   : > { %1129 = vst.msk [vmem:[%s1714_s25 + $0x20] sm:$0xf] %vm1120_vm1, %v1390_v54  ;;  %v1393_v62 = vpack.c.bf16 %v811_v55, %v811_v55  ;;  %v809_v63 = vmax.f32 %v581_v56, 0.0  ;;  %v602_v0 = vadd.f32 %v1495_v61, %v1704_v33  ;;  %v1527_v1 = vpop.f32.mrf.mxu1 }
  0xea   : > { %1161 = vst.msk [vmem:[%s1714_s25 + $0xa0] sm:$0xf] %vm1120_vm1, %v1422_v58  ;;  %v1425_v2 = vpack.c.bf16 %v843_v59, %v843_v59  ;;  %v841_v3 = vmax.f32 %v709_v60, 0.0  ;;  %v730_v4 = vadd.f32 %v1527_v1, %v1704_v33  ;;  %v593_v5 = vpop.f32.mrf.mxu0 }
  0xeb   : > { %1132 = vst.msk [vmem:[%s1714_s25 + $0x2c] sm:$0xf] %vm1120_vm1, %v1393_v62  ;;  %v1391_v6 = vpack.c.bf16 %v809_v63, %v809_v63  ;;  %v814_v7 = vmax.f32 %v602_v0, 0.0  ;;  %v594_v8 = vadd.f32 %v1704_v33, %v593_v5  ;;  %v721_v9 = vpop.f32.mrf.mxu1 }
  0xec   : > { %1164 = vst.msk [vmem:[%s1714_s25 + $0xac] sm:$0xf] %vm1120_vm1, %v1425_v2  ;;  %v1423_v10 = vpack.c.bf16 %v841_v3, %v841_v3  ;;  %v846_v11 = vmax.f32 %v730_v4, 0.0  ;;  %v722_v12 = vadd.f32 %v1704_v33, %v721_v9  ;;  %v1496_v13 = vpop.f32.mrf.mxu0 }
  0xed   : > { %1130 = vst.msk [vmem:[%s1714_s25 + $0x24] sm:$0xf] %vm1120_vm1, %v1391_v6  ;;  %v1396_v14 = vpack.c.bf16 %v814_v7, %v814_v7  ;;  %v812_v15 = vmax.f32 %v594_v8, 0.0  ;;  %v605_v16 = vadd.f32 %v1496_v13, %v1704_v33  ;;  %v1528_v17 = vpop.f32.mrf.mxu1 }
  0xee   : > { %1162 = vst.msk [vmem:[%s1714_s25 + $0xa4] sm:$0xf] %vm1120_vm1, %v1423_v10  ;;  %v1428_v18 = vpack.c.bf16 %v846_v11, %v846_v11  ;;  %v844_v19 = vmax.f32 %v722_v12, 0.0  ;;  %v733_v20 = vadd.f32 %v1528_v17, %v1704_v33  ;;  %v596_v21 = vpop.f32.mrf.mxu0 }
  0xef   : > { %1135 = vst.msk [vmem:[%s1714_s25 + $0x38] sm:$0xf] %vm1120_vm1, %v1396_v14  ;;  %v1394_v22 = vpack.c.bf16 %v812_v15, %v812_v15  ;;  %v815_v23 = vmax.f32 %v605_v16, 0.0  ;;  %v597_v24 = vadd.f32 %v1704_v33, %v596_v21  ;;  %v724_v25 = vpop.f32.mrf.mxu1 }
  0xf0   : > { %1167 = vst.msk [vmem:[%s1714_s25 + $0xb8] sm:$0xf] %vm1120_vm1, %v1428_v18  ;;  %v1426_v26 = vpack.c.bf16 %v844_v19, %v844_v19  ;;  %v847_v27 = vmax.f32 %v733_v20, 0.0  ;;  %v725_v28 = vadd.f32 %v1704_v33, %v724_v25  ;;  %v1499_v29 = vpop.f32.mrf.mxu0 }
  0xf1   : > { %1133 = vst.msk [vmem:[%s1714_s25 + $0x30] sm:$0xf] %vm1120_vm1, %v1394_v22  ;;  %v1397_v30 = vpack.c.bf16 %v815_v23, %v815_v23  ;;  %v813_v31 = vmax.f32 %v597_v24, 0.0  ;;  %v618_v32 = vadd.f32 %v1499_v29, %v1704_v33  ;;  %v1531_v34 = vpop.f32.mrf.mxu1 }
  0xf2   : > { %1165 = vst.msk [vmem:[%s1714_s25 + $0xb0] sm:$0xf] %vm1120_vm1, %v1426_v26  ;;  %v1429_v35 = vpack.c.bf16 %v847_v27, %v847_v27  ;;  %v845_v36 = vmax.f32 %v725_v28, 0.0  ;;  %v746_v37 = vadd.f32 %v1531_v34, %v1704_v33  ;;  %v609_v38 = vpop.f32.mrf.mxu0 }
  0xf3   : > { %1136 = vst.msk [vmem:[%s1714_s25 + $0x3c] sm:$0xf] %vm1120_vm1, %v1397_v30  ;;  %v1395_v39 = vpack.c.bf16 %v813_v31, %v813_v31  ;;  %v818_v40 = vmax.f32 %v618_v32, 0.0  ;;  %v610_v41 = vadd.f32 %v1704_v33, %v609_v38  ;;  %v737_v42 = vpop.f32.mrf.mxu1 }
  0xf4   : > { %1168 = vst.msk [vmem:[%s1714_s25 + $0xbc] sm:$0xf] %vm1120_vm1, %v1429_v35  ;;  %v1427_v43 = vpack.c.bf16 %v845_v36, %v845_v36  ;;  %v850_v44 = vmax.f32 %v746_v37, 0.0  ;;  %v738_v45 = vadd.f32 %v1704_v33, %v737_v42  ;;  %v1500_v46 = vpop.f32.mrf.mxu0 }
  0xf5   : > { %1134 = vst.msk [vmem:[%s1714_s25 + $0x34] sm:$0xf] %vm1120_vm1, %v1395_v39  ;;  %v1400_v47 = vpack.c.bf16 %v818_v40, %v818_v40  ;;  %v816_v48 = vmax.f32 %v610_v41, 0.0  ;;  %v621_v49 = vadd.f32 %v1500_v46, %v1704_v33  ;;  %v1532_v50 = vpop.f32.mrf.mxu1 }
  0xf6   : > { %1166 = vst.msk [vmem:[%s1714_s25 + $0xb4] sm:$0xf] %vm1120_vm1, %v1427_v43  ;;  %v1432_v51 = vpack.c.bf16 %v850_v44, %v850_v44  ;;  %v848_v52 = vmax.f32 %v738_v45, 0.0  ;;  %v749_v53 = vadd.f32 %v1532_v50, %v1704_v33  ;;  %v612_v54 = vpop.f32.mrf.mxu0 }
  0xf7   : > { %1139 = vst.msk [vmem:[%s1714_s25 + $0x48] sm:$0xf] %vm1120_vm1, %v1400_v47  ;;  %v1398_v55 = vpack.c.bf16 %v816_v48, %v816_v48  ;;  %v819_v56 = vmax.f32 %v621_v49, 0.0  ;;  %v613_v57 = vadd.f32 %v1704_v33, %v612_v54  ;;  %v740_v58 = vpop.f32.mrf.mxu1 }
  0xf8   : > { %1171 = vst.msk [vmem:[%s1714_s25 + $0xc8] sm:$0xf] %vm1120_vm1, %v1432_v51  ;;  %v1430_v59 = vpack.c.bf16 %v848_v52, %v848_v52  ;;  %v851_v60 = vmax.f32 %v749_v53, 0.0  ;;  %v741_v61 = vadd.f32 %v1704_v33, %v740_v58  ;;  %v1503_v62 = vpop.f32.mrf.mxu0 }
  0xf9   : > { %1137 = vst.msk [vmem:[%s1714_s25 + $0x40] sm:$0xf] %vm1120_vm1, %v1398_v55  ;;  %v1401_v63 = vpack.c.bf16 %v819_v56, %v819_v56  ;;  %v817_v0 = vmax.f32 %v613_v57, 0.0  ;;  %v634_v1 = vadd.f32 %v1503_v62, %v1704_v33  ;;  %v1535_v2 = vpop.f32.mrf.mxu1 }
  0xfa   : > { %1169 = vst.msk [vmem:[%s1714_s25 + $0xc0] sm:$0xf] %vm1120_vm1, %v1430_v59  ;;  %v1433_v3 = vpack.c.bf16 %v851_v60, %v851_v60  ;;  %v849_v4 = vmax.f32 %v741_v61, 0.0  ;;  %v762_v5 = vadd.f32 %v1535_v2, %v1704_v33  ;;  %v625_v6 = vpop.f32.mrf.mxu0 }
  0xfb   : > { %1140 = vst.msk [vmem:[%s1714_s25 + $0x4c] sm:$0xf] %vm1120_vm1, %v1401_v63  ;;  %v1399_v7 = vpack.c.bf16 %v817_v0, %v817_v0  ;;  %v822_v8 = vmax.f32 %v634_v1, 0.0  ;;  %v626_v9 = vadd.f32 %v1704_v33, %v625_v6  ;;  %v753_v10 = vpop.f32.mrf.mxu1 }
  0xfc   : > { %1172 = vst.msk [vmem:[%s1714_s25 + $0xcc] sm:$0xf] %vm1120_vm1, %v1433_v3  ;;  %v1431_v11 = vpack.c.bf16 %v849_v4, %v849_v4  ;;  %v854_v12 = vmax.f32 %v762_v5, 0.0  ;;  %v754_v13 = vadd.f32 %v1704_v33, %v753_v10  ;;  %v1504_v14 = vpop.f32.mrf.mxu0 }
  0xfd   : > { %1138 = vst.msk [vmem:[%s1714_s25 + $0x44] sm:$0xf] %vm1120_vm1, %v1399_v7  ;;  %v1404_v15 = vpack.c.bf16 %v822_v8, %v822_v8  ;;  %v820_v16 = vmax.f32 %v626_v9, 0.0  ;;  %v637_v17 = vadd.f32 %v1504_v14, %v1704_v33  ;;  %v1536_v18 = vpop.f32.mrf.mxu1 }
  0xfe   : > { %1170 = vst.msk [vmem:[%s1714_s25 + $0xc4] sm:$0xf] %vm1120_vm1, %v1431_v11  ;;  %v1436_v19 = vpack.c.bf16 %v854_v12, %v854_v12  ;;  %v852_v20 = vmax.f32 %v754_v13, 0.0  ;;  %v765_v21 = vadd.f32 %v1536_v18, %v1704_v33  ;;  %v628_v22 = vpop.f32.mrf.mxu0 }
  0xff   : > { %1143 = vst.msk [vmem:[%s1714_s25 + $0x58] sm:$0xf] %vm1120_vm1, %v1404_v15  ;;  %v1402_v23 = vpack.c.bf16 %v820_v16, %v820_v16  ;;  %v823_v24 = vmax.f32 %v637_v17, 0.0  ;;  %v629_v25 = vadd.f32 %v1704_v33, %v628_v22  ;;  %v756_v26 = vpop.f32.mrf.mxu1 }
 0x100   : > { %1175 = vst.msk [vmem:[%s1714_s25 + $0xd8] sm:$0xf] %vm1120_vm1, %v1436_v19  ;;  %v1434_v27 = vpack.c.bf16 %v852_v20, %v852_v20  ;;  %v855_v28 = vmax.f32 %v765_v21, 0.0  ;;  %v757_v29 = vadd.f32 %v1704_v33, %v756_v26  ;;  %v1507_v30 = vpop.f32.mrf.mxu0 }
 0x101   : > { %1141 = vst.msk [vmem:[%s1714_s25 + $0x50] sm:$0xf] %vm1120_vm1, %v1402_v23  ;;  %v1405_v31 = vpack.c.bf16 %v823_v24, %v823_v24  ;;  %v821_v32 = vmax.f32 %v629_v25, 0.0  ;;  %v650_v34 = vadd.f32 %v1507_v30, %v1704_v33  ;;  %v1539_v35 = vpop.f32.mrf.mxu1 }
 0x102   : > { %1173 = vst.msk [vmem:[%s1714_s25 + $0xd0] sm:$0xf] %vm1120_vm1, %v1434_v27  ;;  %v1437_v36 = vpack.c.bf16 %v855_v28, %v855_v28  ;;  %v853_v37 = vmax.f32 %v757_v29, 0.0  ;;  %v778_v38 = vadd.f32 %v1539_v35, %v1704_v33  ;;  %v641_v39 = vpop.f32.mrf.mxu0 }
 0x103   : > { %1144 = vst.msk [vmem:[%s1714_s25 + $0x5c] sm:$0xf] %vm1120_vm1, %v1405_v31  ;;  %v1403_v40 = vpack.c.bf16 %v821_v32, %v821_v32  ;;  %v826_v41 = vmax.f32 %v650_v34, 0.0  ;;  %v642_v42 = vadd.f32 %v1704_v33, %v641_v39  ;;  %v769_v43 = vpop.f32.mrf.mxu1 }
 0x104   : > { %1176 = vst.msk [vmem:[%s1714_s25 + $0xdc] sm:$0xf] %vm1120_vm1, %v1437_v36  ;;  %v1435_v44 = vpack.c.bf16 %v853_v37, %v853_v37  ;;  %v858_v45 = vmax.f32 %v778_v38, 0.0  ;;  %v770_v46 = vadd.f32 %v1704_v33, %v769_v43  ;;  %v1508_v47 = vpop.f32.mrf.mxu0 }
 0x105   : > { %1142 = vst.msk [vmem:[%s1714_s25 + $0x54] sm:$0xf] %vm1120_vm1, %v1403_v40  ;;  %v1408_v48 = vpack.c.bf16 %v826_v41, %v826_v41  ;;  %v824_v49 = vmax.f32 %v642_v42, 0.0  ;;  %v653_v50 = vadd.f32 %v1508_v47, %v1704_v33  ;;  %v1540_v51 = vpop.f32.mrf.mxu1 }
 0x106   : > { %1174 = vst.msk [vmem:[%s1714_s25 + $0xd4] sm:$0xf] %vm1120_vm1, %v1435_v44  ;;  %v1440_v52 = vpack.c.bf16 %v858_v45, %v858_v45  ;;  %v856_v53 = vmax.f32 %v770_v46, 0.0  ;;  %v781_v54 = vadd.f32 %v1540_v51, %v1704_v33  ;;  %v644_v55 = vpop.f32.mrf.mxu0 }
 0x107   : > { %1147 = vst.msk [vmem:[%s1714_s25 + $0x68] sm:$0xf] %vm1120_vm1, %v1408_v48  ;;  %v1406_v56 = vpack.c.bf16 %v824_v49, %v824_v49  ;;  %v827_v57 = vmax.f32 %v653_v50, 0.0  ;;  %v645_v58 = vadd.f32 %v1704_v33, %v644_v55  ;;  %v772_v59 = vpop.f32.mrf.mxu1 }
 0x108   : > { %1179 = vst.msk [vmem:[%s1714_s25 + $0xe8] sm:$0xf] %vm1120_vm1, %v1440_v52  ;;  %v1438_v60 = vpack.c.bf16 %v856_v53, %v856_v53  ;;  %v859_v61 = vmax.f32 %v781_v54, 0.0  ;;  %v773_v62 = vadd.f32 %v1704_v33, %v772_v59  ;;  %v1511_v63 = vpop.f32.mrf.mxu0 }
 0x109   : > { %1145 = vst.msk [vmem:[%s1714_s25 + $0x60] sm:$0xf] %vm1120_vm1, %v1406_v56  ;;  %v1409_v0 = vpack.c.bf16 %v827_v57, %v827_v57  ;;  %v825_v1 = vmax.f32 %v645_v58, 0.0  ;;  %v666_v2 = vadd.f32 %v1511_v63, %v1704_v33  ;;  %v1543_v3 = vpop.f32.mrf.mxu1 }
 0x10a   : > { %1177 = vst.msk [vmem:[%s1714_s25 + $0xe0] sm:$0xf] %vm1120_vm1, %v1438_v60  ;;  %v1441_v4 = vpack.c.bf16 %v859_v61, %v859_v61  ;;  %v857_v5 = vmax.f32 %v773_v62, 0.0  ;;  %v794_v6 = vadd.f32 %v1543_v3, %v1704_v33  ;;  %v657_v7 = vpop.f32.mrf.mxu0 }
 0x10b   : > { %1148 = vst.msk [vmem:[%s1714_s25 + $0x6c] sm:$0xf] %vm1120_vm1, %v1409_v0  ;;  %v1407_v8 = vpack.c.bf16 %v825_v1, %v825_v1  ;;  %v830_v9 = vmax.f32 %v666_v2, 0.0  ;;  %v658_v10 = vadd.f32 %v1704_v33, %v657_v7  ;;  %v785_v11 = vpop.f32.mrf.mxu1 }
 0x10c   : > { %1180 = vst.msk [vmem:[%s1714_s25 + $0xec] sm:$0xf] %vm1120_vm1, %v1441_v4  ;;  %v1439_v12 = vpack.c.bf16 %v857_v5, %v857_v5  ;;  %v862_v13 = vmax.f32 %v794_v6, 0.0  ;;  %v786_v14 = vadd.f32 %v1704_v33, %v785_v11  ;;  %v1512_v15 = vpop.f32.mrf.mxu0 }
 0x10d   : > { %1146 = vst.msk [vmem:[%s1714_s25 + $0x64] sm:$0xf] %vm1120_vm1, %v1407_v8  ;;  %v1412_v16 = vpack.c.bf16 %v830_v9, %v830_v9  ;;  %v828_v17 = vmax.f32 %v658_v10, 0.0  ;;  %v669_v18 = vadd.f32 %v1512_v15, %v1704_v33  ;;  %v1544_v19 = vpop.f32.mrf.mxu1 }
 0x10e   : > { %1178 = vst.msk [vmem:[%s1714_s25 + $0xe4] sm:$0xf] %vm1120_vm1, %v1439_v12  ;;  %v1444_v20 = vpack.c.bf16 %v862_v13, %v862_v13  ;;  %v860_v21 = vmax.f32 %v786_v14, 0.0  ;;  %v797_v22 = vadd.f32 %v1544_v19, %v1704_v33  ;;  %v660_v23 = vpop.f32.mrf.mxu0 }
 0x10f   : > { %1151 = vst.msk [vmem:[%s1714_s25 + $0x78] sm:$0xf] %vm1120_vm1, %v1412_v16  ;;  %v1410_v24 = vpack.c.bf16 %v828_v17, %v828_v17  ;;  %v831_v25 = vmax.f32 %v669_v18, 0.0  ;;  %v661_v26 = vadd.f32 %v1704_v33, %v660_v23  ;;  %v788_v27 = vpop.f32.mrf.mxu1 }
 0x110   : > { %1183 = vst.msk [vmem:[%s1714_s25 + $0xf8] sm:$0xf] %vm1120_vm1, %v1444_v20  ;;  %v1442_v28 = vpack.c.bf16 %v860_v21, %v860_v21  ;;  %v863_v29 = vmax.f32 %v797_v22, 0.0  ;;  %v789_v30 = vadd.f32 %v1704_v33, %v788_v27 }
 0x111   : > { %1149 = vst.msk [vmem:[%s1714_s25 + $0x70] sm:$0xf] %vm1120_vm1, %v1410_v24  ;;  %v1413_v31 = vpack.c.bf16 %v831_v25, %v831_v25  ;;  %v829_v32 = vmax.f32 %v661_v26, 0.0 }
 0x112   : > { %1181 = vst.msk [vmem:[%s1714_s25 + $0xf0] sm:$0xf] %vm1120_vm1, %v1442_v28  ;;  %v1445_v34 = vpack.c.bf16 %v863_v29, %v863_v29  ;;  %v861_v35 = vmax.f32 %v789_v30, 0.0 }
 0x113   : > { %1152 = vst.msk [vmem:[%s1714_s25 + $0x7c] sm:$0xf] %vm1120_vm1, %v1413_v31  ;;  %v1411_v36 = vpack.c.bf16 %v829_v32, %v829_v32 }
 0x114   : > { %1184 = vst.msk [vmem:[%s1714_s25 + $0xfc] sm:$0xf] %vm1120_vm1, %v1445_v34  ;;  %v1443_v37 = vpack.c.bf16 %v861_v35, %v861_v35 }
 0x115   : > { %1150 = vst.msk [vmem:[%s1714_s25 + $0x74] sm:$0xf] %vm1120_vm1, %v1411_v36 }
 0x116   : > { %1182 = vst.msk [vmem:[%s1714_s25 + $0xf4] sm:$0xf] %vm1120_vm1, %v1443_v37 }
 0x117 PF: > { %s13_s12 = sadd.s32 1, %s1594_s12  }
 0x118   : > { %p10_p4 = scmp.ge.s32.totalorder %s13_s12, 4  }
 0x11a   :  { %12 = sbr.rel (!%p10_p4) target bundleno = 1 (0x1), region = 62 }

// kernel: vae_forward.8
= control target key start
LH: loop header
LB: loop body
LE: loop exit
PB: predicated region body
PF: predicated region fallthrough
CT: control target
= control target key end

     0   :  { %vm1144_vm0 = vcmask 519168   ;;  %s2167_s1 = inlined_call_operand.vmem [shape: bf16[512,64], index: 1, kind: input, shape index: {}]   ;;  %s2168_s0 = inlined_call_operand.vmem [shape: bf16[256,512], index: 0, kind: input, shape index: {}]   ;;  %s2169_s2 = inlined_call_operand.vmem [shape: f32[1,64], index: 2, kind: input, shape index: {}]   ;;  %s2170_s3 = inlined_call_operand.vmem [shape: bf16[256,64], index: 3, kind: output, shape index: {}]  }
   0x1   :  { %v1566_v0 = vld [vmem:[%s2167_s1 + $0x78] sm:$0xff]   ;;  %v1570_v4 = vld [vmem:[%s2167_s1 + $0x70] sm:$0xff]   ;;  %v1574_v8 = vld [vmem:[%s2167_s1 + $0x68] sm:$0xff]  }
   0x2   :  { %v1567_v1 = vld [vmem:[%s2167_s1 + $0xf8] sm:$0xff]   ;;  %1342 = vmatprep.subr.bf16.mxu0 %v1566_v0  ;;  %v1571_v5 = vld [vmem:[%s2167_s1 + $0xf0] sm:$0xff]   ;;  %v1575_v9 = vld [vmem:[%s2167_s1 + $0xe8] sm:$0xff]  }
   0x3   :  { %v1568_v2 = vld [vmem:[%s2167_s1 + $0x38] sm:$0xff]   ;;  %1454 = vmatprep.subr.bf16.mxu1 %v1567_v1  ;;  %v1572_v6 = vld [vmem:[%s2167_s1 + $0x30] sm:$0xff]   ;;  %v1576_v10 = vld [vmem:[%s2167_s1 + $0x28] sm:$0xff]  }
   0x4   :  { %v1569_v3 = vld [vmem:[%s2167_s1 + $0xb8] sm:$0xff]   ;;  %1343 = vmatpush3.bf16.msra.mxu0 %v1568_v2  ;;  %v1573_v7 = vld [vmem:[%s2167_s1 + $0xb0] sm:$0xff]   ;;  %v1577_v11 = vld [vmem:[%s2167_s1 + $0xa8] sm:$0xff]  }
   0x5   :  { %1455 = vmatpush3.bf16.msra.mxu1 %v1569_v3  ;;  %1344 = vmatprep.subr.bf16.mxu0 %v1570_v4  ;;  %v1578_v12 = vld [vmem:[%s2167_s1 + $0x60] sm:$0xff]   ;;  %v1582_v16 = vld [vmem:[%s2167_s1 + $0x58] sm:$0xff]   ;;  %v1586_v20 = vld [vmem:[%s2167_s1 + $0x50] sm:$0xff]  }
   0x6   :  { %1456 = vmatprep.subr.bf16.mxu1 %v1571_v5  ;;  %v1579_v13 = vld [vmem:[%s2167_s1 + $0xe0] sm:$0xff]   ;;  %v1583_v17 = vld [vmem:[%s2167_s1 + $0xd8] sm:$0xff]   ;;  %v1587_v21 = vld [vmem:[%s2167_s1 + $0xd0] sm:$0xff]  }
   0x7   :  { %v1580_v14 = vld [vmem:[%s2167_s1 + $0x20] sm:$0xff]   ;;  %v1584_v18 = vld [vmem:[%s2167_s1 + $0x18] sm:$0xff]   ;;  %v1588_v22 = vld [vmem:[%s2167_s1 + $0x10] sm:$0xff]  }
   0x8   :  { %1345 = vmatpush3.bf16.msra.mxu0 %v1572_v6  ;;  %v1581_v15 = vld [vmem:[%s2167_s1 + $0xa0] sm:$0xff]   ;;  %v1585_v19 = vld [vmem:[%s2167_s1 + $0x98] sm:$0xff]   ;;  %v1589_v23 = vld [vmem:[%s2167_s1 + $0x90] sm:$0xff]  }
   0x9   :  { %1457 = vmatpush3.bf16.msra.mxu1 %v1573_v7  ;;  %1346 = vmatprep.subr.bf16.mxu0 %v1574_v8  ;;  %v1590_v24 = vld [vmem:[%s2167_s1 + $0x48] sm:$0xff]   ;;  %v1594_v28 = vld [vmem:[%s2167_s1 + $0x40] sm:$0xff]  }
   0xa   :  { %1458 = vmatprep.subr.bf16.mxu1 %v1575_v9  ;;  %v1591_v25 = vld [vmem:[%s2167_s1 + $0xc8] sm:$0xff]   ;;  %v1595_v29 = vld [vmem:[%s2167_s1 + $0xc0] sm:$0xff]  }
   0xb   :  { %v1592_v26 = vld [vmem:[%s2167_s1 + $0x8] sm:$0xff]   ;;  %v1596_v30 = vld [vmem:[%s2167_s1] sm:$0xff]  }
   0xc   :  { %1347 = vmatpush3.bf16.msra.mxu0 %v1576_v10  ;;  %v1593_v27 = vld [vmem:[%s2167_s1 + $0x88] sm:$0xff]   ;;  %v1597_v31 = vld [vmem:[%s2167_s1 + $0x80] sm:$0xff]  }
   0xd   :  { %1459 = vmatpush3.bf16.msra.mxu1 %v1577_v11  ;;  %1348 = vmatprep.subr.bf16.mxu0 %v1578_v12  ;;  %v1598_v32 = vld [vmem:[%s2168_s0] ss:$16 sps:$4 sm:$0xff]   ;;  %v1600_v33 = vld [vmem:[%s2168_s0 + $0x4] ss:$16 sps:$4 sm:$0xff]   ;;  %v1601_v34 = vld [vmem:[%s2168_s0 + $0x8] ss:$16 sps:$4 sm:$0xff]  }
   0xe   :  { %1460 = vmatprep.subr.bf16.mxu1 %v1579_v13  ;;  %v1603_v35 = vld [vmem:[%s2168_s0 + $0xc] ss:$16 sps:$4 sm:$0xff]   ;;  %694 = vmatprep.mubr.bf16.mxu0 %v1600_v33  ;;  %v1604_v36 = vld [vmem:[%s2168_s0 + $0x24] ss:$16 sps:$4 sm:$0xff]   ;;  %v1608_v38 = vld [vmem:[%s2168_s0 + $0x20] ss:$16 sps:$4 sm:$0xff]  }
   0xf   :  { %855 = vmatprep.mubr.bf16.mxu1 %v1603_v35  ;;  %v1606_v37 = vld [vmem:[%s2168_s0 + $0x2c] ss:$16 sps:$4 sm:$0xff]   ;;  %v1609_v39 = vld [vmem:[%s2168_s0 + $0x28] ss:$16 sps:$4 sm:$0xff]   ;;  %v1610_v40 = vld [vmem:[%s2168_s0 + $0x44] ss:$16 sps:$4 sm:$0xff]  }
  0x10   :  { %1349 = vmatpush3.bf16.msra.mxu0 %v1580_v14  ;;  %v1612_v41 = vld [vmem:[%s2168_s0 + $0x4c] ss:$16 sps:$4 sm:$0xff]   ;;  %v1614_v42 = vld [vmem:[%s2168_s0 + $0x40] ss:$16 sps:$4 sm:$0xff]   ;;  %v1615_v43 = vld [vmem:[%s2168_s0 + $0x48] ss:$16 sps:$4 sm:$0xff]  }
  0x11   :  { %1461 = vmatpush3.bf16.msra.mxu1 %v1581_v15  ;;  %1350 = vmatprep.subr.bf16.mxu0 %v1582_v16  ;;  %v1616_v44 = vld [vmem:[%s2168_s0 + $0x64] ss:$16 sps:$4 sm:$0xff]   ;;  %v1618_v45 = vld [vmem:[%s2168_s0 + $0x6c] ss:$16 sps:$4 sm:$0xff]   ;;  %v1620_v46 = vld [vmem:[%s2168_s0 + $0x60] ss:$16 sps:$4 sm:$0xff]  }
  0x12   :  { %1462 = vmatprep.subr.bf16.mxu1 %v1583_v17  ;;  %v1621_v47 = vld [vmem:[%s2168_s0 + $0x68] ss:$16 sps:$4 sm:$0xff]   ;;  %v1622_v48 = vld [vmem:[%s2168_s0 + $0x84] ss:$16 sps:$4 sm:$0xff]   ;;  %v1624_v49 = vld [vmem:[%s2168_s0 + $0x8c] ss:$16 sps:$4 sm:$0xff]  }
  0x13   :  { %v1626_v50 = vld [vmem:[%s2168_s0 + $0x80] ss:$16 sps:$4 sm:$0xff]   ;;  %v1627_v51 = vld [vmem:[%s2168_s0 + $0x88] ss:$16 sps:$4 sm:$0xff]   ;;  %v1628_v52 = vld [vmem:[%s2168_s0 + $0xa4] ss:$16 sps:$4 sm:$0xff]  }
  0x14   :  { %1351 = vmatpush3.bf16.msra.mxu0 %v1584_v18  ;;  %v1630_v53 = vld [vmem:[%s2168_s0 + $0xac] ss:$16 sps:$4 sm:$0xff]   ;;  %v1632_v54 = vld [vmem:[%s2168_s0 + $0xa0] ss:$16 sps:$4 sm:$0xff]   ;;  %v1633_v55 = vld [vmem:[%s2168_s0 + $0xa8] ss:$16 sps:$4 sm:$0xff]  }
  0x15   :  { %1463 = vmatpush3.bf16.msra.mxu1 %v1585_v19  ;;  %1352 = vmatprep.subr.bf16.mxu0 %v1586_v20  ;;  %v1634_v56 = vld [vmem:[%s2168_s0 + $0xc4] ss:$16 sps:$4 sm:$0xff]   ;;  %v1636_v57 = vld [vmem:[%s2168_s0 + $0xcc] ss:$16 sps:$4 sm:$0xff]   ;;  %v1638_v58 = vld [vmem:[%s2168_s0 + $0xc0] ss:$16 sps:$4 sm:$0xff]  }
  0x16   :  { %1464 = vmatprep.subr.bf16.mxu1 %v1587_v21  ;;  %v1639_v59 = vld [vmem:[%s2168_s0 + $0xc8] ss:$16 sps:$4 sm:$0xff]   ;;  %v1640_v60 = vld [vmem:[%s2168_s0 + $0xe4] ss:$16 sps:$4 sm:$0xff]   ;;  %v1642_v61 = vld [vmem:[%s2168_s0 + $0xec] ss:$16 sps:$4 sm:$0xff]  }
  0x17   :  { %v1644_v62 = vld [vmem:[%s2168_s0 + $0xe0] ss:$16 sps:$4 sm:$0xff]   ;;  %v1645_v63 = vld [vmem:[%s2168_s0 + $0xe8] ss:$16 sps:$4 sm:$0xff]   ;;  %v1646_v0 = vld [vmem:[%s2168_s0 + $0x104] ss:$16 sps:$4 sm:$0xff]  }
  0x18   :  { %1353 = vmatpush3.bf16.msra.mxu0 %v1588_v22  ;;  %v1648_v1 = vld [vmem:[%s2168_s0 + $0x10c] ss:$16 sps:$4 sm:$0xff]   ;;  %v1650_v2 = vld [vmem:[%s2168_s0 + $0x100] ss:$16 sps:$4 sm:$0xff]   ;;  %v1651_v3 = vld [vmem:[%s2168_s0 + $0x108] ss:$16 sps:$4 sm:$0xff]  }
  0x19   :  { %1465 = vmatpush3.bf16.msra.mxu1 %v1589_v23  ;;  %1354 = vmatprep.subr.bf16.mxu0 %v1590_v24  ;;  %v1652_v4 = vld [vmem:[%s2168_s0 + $0x124] ss:$16 sps:$4 sm:$0xff]   ;;  %v1654_v5 = vld [vmem:[%s2168_s0 + $0x12c] ss:$16 sps:$4 sm:$0xff]   ;;  %v1656_v6 = vld [vmem:[%s2168_s0 + $0x120] ss:$16 sps:$4 sm:$0xff]  }
  0x1a   :  { %1466 = vmatprep.subr.bf16.mxu1 %v1591_v25  ;;  %v1657_v7 = vld [vmem:[%s2168_s0 + $0x128] ss:$16 sps:$4 sm:$0xff]   ;;  %v1658_v8 = vld [vmem:[%s2168_s0 + $0x144] ss:$16 sps:$4 sm:$0xff]   ;;  %v1660_v9 = vld [vmem:[%s2168_s0 + $0x14c] ss:$16 sps:$4 sm:$0xff]  }
  0x1b   :  { %v1662_v10 = vld [vmem:[%s2168_s0 + $0x140] ss:$16 sps:$4 sm:$0xff]   ;;  %v1663_v11 = vld [vmem:[%s2168_s0 + $0x148] ss:$16 sps:$4 sm:$0xff]   ;;  %v1664_v12 = vld [vmem:[%s2168_s0 + $0x164] ss:$16 sps:$4 sm:$0xff]  }
  0x1c   :  { %1355 = vmatpush3.bf16.msra.mxu0 %v1592_v26  ;;  %v1666_v13 = vld [vmem:[%s2168_s0 + $0x16c] ss:$16 sps:$4 sm:$0xff]   ;;  %v1668_v14 = vld [vmem:[%s2168_s0 + $0x160] ss:$16 sps:$4 sm:$0xff]   ;;  %v1669_v15 = vld [vmem:[%s2168_s0 + $0x168] ss:$16 sps:$4 sm:$0xff]  }
  0x1d   :  { %1467 = vmatpush3.bf16.msra.mxu1 %v1593_v27  ;;  %1356 = vmatprep.subr.bf16.mxu0 %v1594_v28  ;;  %v1670_v16 = vld [vmem:[%s2168_s0 + $0x184] ss:$16 sps:$4 sm:$0xff]   ;;  %v1672_v17 = vld [vmem:[%s2168_s0 + $0x18c] ss:$16 sps:$4 sm:$0xff]   ;;  %v1674_v18 = vld [vmem:[%s2168_s0 + $0x180] ss:$16 sps:$4 sm:$0xff]  }
  0x1e   :  { %1468 = vmatprep.subr.bf16.mxu1 %v1595_v29  ;;  %v1675_v19 = vld [vmem:[%s2168_s0 + $0x188] ss:$16 sps:$4 sm:$0xff]   ;;  %v1676_v20 = vld [vmem:[%s2168_s0 + $0x1a4] ss:$16 sps:$4 sm:$0xff]   ;;  %v1678_v21 = vld [vmem:[%s2168_s0 + $0x1ac] ss:$16 sps:$4 sm:$0xff]  }
  0x1f   :  { %v1680_v22 = vld [vmem:[%s2168_s0 + $0x1a0] ss:$16 sps:$4 sm:$0xff]   ;;  %v1681_v23 = vld [vmem:[%s2168_s0 + $0x1a8] ss:$16 sps:$4 sm:$0xff]   ;;  %v1682_v24 = vld [vmem:[%s2168_s0 + $0x1c4] ss:$16 sps:$4 sm:$0xff]  }
  0x20   :  { %1357 = vmatpush3.bf16.msra.mxu0 %v1596_v30  ;;  %v1684_v25 = vld [vmem:[%s2168_s0 + $0x1cc] ss:$16 sps:$4 sm:$0xff]   ;;  %v1686_v26 = vld [vmem:[%s2168_s0 + $0x1c0] ss:$16 sps:$4 sm:$0xff]   ;;  %v1687_v27 = vld [vmem:[%s2168_s0 + $0x1c8] ss:$16 sps:$4 sm:$0xff]  }
  0x21   :  { %1469 = vmatpush3.bf16.msra.mxu1 %v1597_v31  ;;  %v1688_v28 = vld [vmem:[%s2168_s0 + $0x1e4] ss:$16 sps:$4 sm:$0xff]   ;;  %v1690_v29 = vld [vmem:[%s2168_s0 + $0x1ec] ss:$16 sps:$4 sm:$0xff]   ;;  %v1692_v30 = vld [vmem:[%s2168_s0 + $0x1e0] ss:$16 sps:$4 sm:$0xff]  }
  0x22   :  { %v1693_v31 = vld [vmem:[%s2168_s0 + $0x1e8] ss:$16 sps:$4 sm:$0xff]  }
  0x23   :  { %695 = vmatmul.mubr.bf16.vlgmr.msra.gmra.mxu0 %v1598_v32 }
  0x24   :  { %856 = vmatmul.mubr.bf16.vlgmr.msra.gmra.mxu1 %v1601_v34  ;;  %702 = vmatprep.mubr.bf16.mxu0 %v1604_v36  ;;  %v2005_v34 = vld [vmem:[%s2169_s2] ss:$0 sm:$0xff] }
  0x25   :  { %863 = vmatprep.mubr.bf16.mxu1 %v1606_v37 }
  0x2b   :  { %703 = vmatmul.mubr.bf16.gmra.mxu0 %v1608_v38 }
  0x2c   :  { %864 = vmatmul.mubr.bf16.gmra.mxu1 %v1609_v39  ;;  %710 = vmatprep.mubr.bf16.mxu0 %v1610_v40 }
  0x2d   :  { %871 = vmatprep.mubr.bf16.mxu1 %v1612_v41 }
  0x33   :  { %711 = vmatmul.mubr.bf16.gmra.mxu0 %v1614_v42 }
  0x34   :  { %872 = vmatmul.mubr.bf16.gmra.mxu1 %v1615_v43  ;;  %718 = vmatprep.mubr.bf16.mxu0 %v1616_v44 }
  0x35   :  { %879 = vmatprep.mubr.bf16.mxu1 %v1618_v45 }
  0x3b   :  { %719 = vmatmul.mubr.bf16.gmra.mxu0 %v1620_v46 }
  0x3c   :  { %880 = vmatmul.mubr.bf16.gmra.mxu1 %v1621_v47  ;;  %726 = vmatprep.mubr.bf16.mxu0 %v1622_v48 }
  0x3d   :  { %887 = vmatprep.mubr.bf16.mxu1 %v1624_v49 }
  0x43   :  { %727 = vmatmul.mubr.bf16.gmra.mxu0 %v1626_v50 }
  0x44   :  { %888 = vmatmul.mubr.bf16.gmra.mxu1 %v1627_v51  ;;  %734 = vmatprep.mubr.bf16.mxu0 %v1628_v52 }
  0x45   :  { %895 = vmatprep.mubr.bf16.mxu1 %v1630_v53 }
  0x4b   :  { %735 = vmatmul.mubr.bf16.gmra.mxu0 %v1632_v54 }
  0x4c   :  { %896 = vmatmul.mubr.bf16.gmra.mxu1 %v1633_v55  ;;  %742 = vmatprep.mubr.bf16.mxu0 %v1634_v56 }
  0x4d   :  { %903 = vmatprep.mubr.bf16.mxu1 %v1636_v57 }
  0x53   :  { %743 = vmatmul.mubr.bf16.gmra.mxu0 %v1638_v58 }
  0x54   :  { %904 = vmatmul.mubr.bf16.gmra.mxu1 %v1639_v59  ;;  %750 = vmatprep.mubr.bf16.mxu0 %v1640_v60 }
  0x55   :  { %911 = vmatprep.mubr.bf16.mxu1 %v1642_v61 }
  0x5b   :  { %751 = vmatmul.mubr.bf16.gmra.mxu0 %v1644_v62 }
  0x5c   :  { %912 = vmatmul.mubr.bf16.gmra.mxu1 %v1645_v63  ;;  %758 = vmatprep.mubr.bf16.mxu0 %v1646_v0 }
  0x5d   :  { %919 = vmatprep.mubr.bf16.mxu1 %v1648_v1 }
  0x63   :  { %759 = vmatmul.mubr.bf16.gmra.mxu0 %v1650_v2 }
  0x64   :  { %920 = vmatmul.mubr.bf16.gmra.mxu1 %v1651_v3  ;;  %766 = vmatprep.mubr.bf16.mxu0 %v1652_v4 }
  0x65   :  { %927 = vmatprep.mubr.bf16.mxu1 %v1654_v5 }
  0x6b   :  { %767 = vmatmul.mubr.bf16.gmra.mxu0 %v1656_v6 }
  0x6c   :  { %928 = vmatmul.mubr.bf16.gmra.mxu1 %v1657_v7  ;;  %774 = vmatprep.mubr.bf16.mxu0 %v1658_v8 }
  0x6d   :  { %935 = vmatprep.mubr.bf16.mxu1 %v1660_v9 }
  0x73   :  { %775 = vmatmul.mubr.bf16.gmra.mxu0 %v1662_v10 }
  0x74   :  { %936 = vmatmul.mubr.bf16.gmra.mxu1 %v1663_v11  ;;  %782 = vmatprep.mubr.bf16.mxu0 %v1664_v12 }
  0x75   :  { %943 = vmatprep.mubr.bf16.mxu1 %v1666_v13 }
  0x7b   :  { %783 = vmatmul.mubr.bf16.gmra.mxu0 %v1668_v14 }
  0x7c   :  { %944 = vmatmul.mubr.bf16.gmra.mxu1 %v1669_v15  ;;  %790 = vmatprep.mubr.bf16.mxu0 %v1670_v16 }
  0x7d   :  { %951 = vmatprep.mubr.bf16.mxu1 %v1672_v17 }
  0x83   :  { %791 = vmatmul.mubr.bf16.gmra.mxu0 %v1674_v18 }
  0x84   :  { %952 = vmatmul.mubr.bf16.gmra.mxu1 %v1675_v19  ;;  %798 = vmatprep.mubr.bf16.mxu0 %v1676_v20 }
  0x85   :  { %959 = vmatprep.mubr.bf16.mxu1 %v1678_v21 }
  0x8b   :  { %799 = vmatmul.mubr.bf16.gmra.mxu0 %v1680_v22 }
  0x8c   :  { %960 = vmatmul.mubr.bf16.gmra.mxu1 %v1681_v23  ;;  %806 = vmatprep.mubr.bf16.mxu0 %v1682_v24 }
  0x8d   :  { %967 = vmatprep.mubr.bf16.mxu1 %v1684_v25 }
  0x93   :  { %807 = vmatmul.mubr.bf16.gmra.mxu0 %v1686_v26 }
  0x94   :  { %968 = vmatmul.mubr.bf16.gmra.mxu1 %v1687_v27  ;;  %814 = vmatprep.mubr.bf16.mxu0 %v1688_v28 }
  0x95   :  { %975 = vmatprep.mubr.bf16.mxu1 %v1690_v29 }
  0x9b   :  { %815 = vmatmul.mubr.bf16.gmra.mxu0 %v1692_v30 }
  0x9c   :  { %976 = vmatmul.mubr.bf16.gmra.mxu1 %v1693_v31 }
  0xe3   :  { %v1358_v32 = vpop.f32.mrf.mxu0 }
  0xe4   :  { %v1470_v33 = vpop.f32.mrf.mxu1 }
  0xe5   :  { %v1359_v35 = vpop.f32.mrf.mxu0 }
  0xe6   :  { %v1360_v36 = vadd.f32 %v1359_v35, %v1358_v32  ;;  %v1471_v37 = vpop.f32.mrf.mxu1 }
  0xe7   :  { %v1361_v38 = vpop.f32.mrf.mxu0  ;;  %v1472_v40 = vadd.f32 %v1471_v37, %v1470_v33 }
  0xe8   :  { %v697_v39 = vadd.f32 %v1360_v36, %v2005_v34  ;;  %v1473_v41 = vpop.f32.mrf.mxu1 }
  0xe9   :  { %v1362_v42 = vpop.f32.mrf.mxu0 }
  0xea   :  { %v858_v43 = vadd.f32 %v1472_v40, %v697_v39  ;;  %v1363_v44 = vadd.f32 %v1362_v42, %v1361_v38  ;;  %v1474_v45 = vpop.f32.mrf.mxu1 }
  0xeb   :  { %v1364_v46 = vpop.f32.mrf.mxu0  ;;  %v1475_v49 = vadd.f32 %v1474_v45, %v1473_v41 }
  0xec   :  { %v984_v47 = vmax.f32 %v858_v43, 0.0  ;;  %v700_v48 = vadd.f32 %v1363_v44, %v2005_v34  ;;  %v1476_v50 = vpop.f32.mrf.mxu1 }
  0xed   :  { %v1365_v51 = vpop.f32.mrf.mxu0 }
  0xee   :  { %v1310_v52 = vpack.c.bf16 %v984_v47, %v984_v47  ;;  %v861_v53 = vadd.f32 %v1475_v49, %v700_v48  ;;  %v1366_v54 = vadd.f32 %v1365_v51, %v1364_v46  ;;  %v1477_v55 = vpop.f32.mrf.mxu1 }
  0xef   :  { %v1367_v56 = vpop.f32.mrf.mxu0  ;;  %v1478_v59 = vadd.f32 %v1477_v55, %v1476_v50 }
  0xf0   :  { %1145 = vst.msk [vmem:[%s2170_s3] sm:$0xf] %vm1144_vm0, %v1310_v52  ;;  %v985_v57 = vmax.f32 %v861_v53, 0.0  ;;  %v705_v58 = vadd.f32 %v1366_v54, %v2005_v34  ;;  %v1479_v60 = vpop.f32.mrf.mxu1 }
  0xf1   :  { %v1368_v61 = vpop.f32.mrf.mxu0 }
  0xf2   :  { %v1311_v62 = vpack.c.bf16 %v985_v57, %v985_v57  ;;  %v866_v63 = vadd.f32 %v1478_v59, %v705_v58  ;;  %v1369_v0 = vadd.f32 %v1368_v61, %v1367_v56  ;;  %v1480_v1 = vpop.f32.mrf.mxu1 }
  0xf3   :  { %v1370_v2 = vpop.f32.mrf.mxu0  ;;  %v1481_v5 = vadd.f32 %v1480_v1, %v1479_v60 }
  0xf4   :  { %1146 = vst.msk [vmem:[%s2170_s3 + $0x4] sm:$0xf] %vm1144_vm0, %v1311_v62  ;;  %v986_v3 = vmax.f32 %v866_v63, 0.0  ;;  %v708_v4 = vadd.f32 %v1369_v0, %v2005_v34  ;;  %v1482_v6 = vpop.f32.mrf.mxu1 }
  0xf5   :  { %v1371_v7 = vpop.f32.mrf.mxu0 }
  0xf6   :  { %v1312_v8 = vpack.c.bf16 %v986_v3, %v986_v3  ;;  %v869_v9 = vadd.f32 %v1481_v5, %v708_v4  ;;  %v1372_v10 = vadd.f32 %v1371_v7, %v1370_v2  ;;  %v1483_v11 = vpop.f32.mrf.mxu1 }
  0xf7   :  { %v1373_v12 = vpop.f32.mrf.mxu0  ;;  %v1484_v15 = vadd.f32 %v1483_v11, %v1482_v6 }
  0xf8   :  { %1147 = vst.msk [vmem:[%s2170_s3 + $0x8] sm:$0xf] %vm1144_vm0, %v1312_v8  ;;  %v987_v13 = vmax.f32 %v869_v9, 0.0  ;;  %v713_v14 = vadd.f32 %v1372_v10, %v2005_v34  ;;  %v1485_v16 = vpop.f32.mrf.mxu1 }
  0xf9   :  { %v1374_v17 = vpop.f32.mrf.mxu0 }
  0xfa   :  { %v1313_v18 = vpack.c.bf16 %v987_v13, %v987_v13  ;;  %v874_v19 = vadd.f32 %v1484_v15, %v713_v14  ;;  %v1375_v20 = vadd.f32 %v1374_v17, %v1373_v12  ;;  %v1486_v21 = vpop.f32.mrf.mxu1 }
  0xfb   :  { %v1376_v22 = vpop.f32.mrf.mxu0  ;;  %v1487_v25 = vadd.f32 %v1486_v21, %v1485_v16 }
  0xfc   :  { %1148 = vst.msk [vmem:[%s2170_s3 + $0xc] sm:$0xf] %vm1144_vm0, %v1313_v18  ;;  %v988_v23 = vmax.f32 %v874_v19, 0.0  ;;  %v716_v24 = vadd.f32 %v1375_v20, %v2005_v34  ;;  %v1488_v26 = vpop.f32.mrf.mxu1 }
  0xfd   :  { %v1377_v27 = vpop.f32.mrf.mxu0 }
  0xfe   :  { %v1314_v28 = vpack.c.bf16 %v988_v23, %v988_v23  ;;  %v877_v29 = vadd.f32 %v1487_v25, %v716_v24  ;;  %v1378_v30 = vadd.f32 %v1377_v27, %v1376_v22  ;;  %v1489_v31 = vpop.f32.mrf.mxu1 }
  0xff   :  { %v1379_v32 = vpop.f32.mrf.mxu0  ;;  %v1490_v36 = vadd.f32 %v1489_v31, %v1488_v26 }
 0x100   :  { %1149 = vst.msk [vmem:[%s2170_s3 + $0x10] sm:$0xf] %vm1144_vm0, %v1314_v28  ;;  %v989_v33 = vmax.f32 %v877_v29, 0.0  ;;  %v721_v35 = vadd.f32 %v1378_v30, %v2005_v34  ;;  %v1491_v37 = vpop.f32.mrf.mxu1 }
 0x101   :  { %v1380_v38 = vpop.f32.mrf.mxu0 }
 0x102   :  { %v1315_v39 = vpack.c.bf16 %v989_v33, %v989_v33  ;;  %v882_v40 = vadd.f32 %v1490_v36, %v721_v35  ;;  %v1381_v41 = vadd.f32 %v1380_v38, %v1379_v32  ;;  %v1492_v42 = vpop.f32.mrf.mxu1 }
 0x103   :  { %v1382_v43 = vpop.f32.mrf.mxu0  ;;  %v1493_v46 = vadd.f32 %v1492_v42, %v1491_v37 }
 0x104   :  { %1150 = vst.msk [vmem:[%s2170_s3 + $0x14] sm:$0xf] %vm1144_vm0, %v1315_v39  ;;  %v990_v44 = vmax.f32 %v882_v40, 0.0  ;;  %v724_v45 = vadd.f32 %v1381_v41, %v2005_v34  ;;  %v1494_v47 = vpop.f32.mrf.mxu1 }
 0x105   :  { %v1383_v48 = vpop.f32.mrf.mxu0 }
 0x106   :  { %v1316_v49 = vpack.c.bf16 %v990_v44, %v990_v44  ;;  %v885_v50 = vadd.f32 %v1493_v46, %v724_v45  ;;  %v1384_v51 = vadd.f32 %v1383_v48, %v1382_v43  ;;  %v1495_v52 = vpop.f32.mrf.mxu1 }
 0x107   :  { %v1385_v53 = vpop.f32.mrf.mxu0  ;;  %v1496_v56 = vadd.f32 %v1495_v52, %v1494_v47 }
 0x108   :  { %1151 = vst.msk [vmem:[%s2170_s3 + $0x18] sm:$0xf] %vm1144_vm0, %v1316_v49  ;;  %v991_v54 = vmax.f32 %v885_v50, 0.0  ;;  %v729_v55 = vadd.f32 %v1384_v51, %v2005_v34  ;;  %v1497_v57 = vpop.f32.mrf.mxu1 }
 0x109   :  { %v1386_v58 = vpop.f32.mrf.mxu0 }
 0x10a   :  { %v1317_v59 = vpack.c.bf16 %v991_v54, %v991_v54  ;;  %v890_v60 = vadd.f32 %v1496_v56, %v729_v55  ;;  %v1387_v61 = vadd.f32 %v1386_v58, %v1385_v53  ;;  %v1498_v62 = vpop.f32.mrf.mxu1 }
 0x10b   :  { %v1388_v63 = vpop.f32.mrf.mxu0  ;;  %v1499_v2 = vadd.f32 %v1498_v62, %v1497_v57 }
 0x10c   :  { %1152 = vst.msk [vmem:[%s2170_s3 + $0x1c] sm:$0xf] %vm1144_vm0, %v1317_v59  ;;  %v992_v0 = vmax.f32 %v890_v60, 0.0  ;;  %v732_v1 = vadd.f32 %v1387_v61, %v2005_v34  ;;  %v1500_v3 = vpop.f32.mrf.mxu1 }
 0x10d   :  { %v1389_v4 = vpop.f32.mrf.mxu0 }
 0x10e   :  { %v1318_v5 = vpack.c.bf16 %v992_v0, %v992_v0  ;;  %v893_v6 = vadd.f32 %v1499_v2, %v732_v1  ;;  %v1390_v7 = vadd.f32 %v1389_v4, %v1388_v63  ;;  %v1501_v8 = vpop.f32.mrf.mxu1 }
 0x10f   :  { %v1391_v9 = vpop.f32.mrf.mxu0  ;;  %v1502_v12 = vadd.f32 %v1501_v8, %v1500_v3 }
 0x110   :  { %1153 = vst.msk [vmem:[%s2170_s3 + $0x20] sm:$0xf] %vm1144_vm0, %v1318_v5  ;;  %v993_v10 = vmax.f32 %v893_v6, 0.0  ;;  %v737_v11 = vadd.f32 %v1390_v7, %v2005_v34  ;;  %v1503_v13 = vpop.f32.mrf.mxu1 }
 0x111   :  { %v1392_v14 = vpop.f32.mrf.mxu0 }
 0x112   :  { %v1319_v15 = vpack.c.bf16 %v993_v10, %v993_v10  ;;  %v898_v16 = vadd.f32 %v1502_v12, %v737_v11  ;;  %v1393_v17 = vadd.f32 %v1392_v14, %v1391_v9  ;;  %v1504_v18 = vpop.f32.mrf.mxu1 }
 0x113   :  { %v1394_v19 = vpop.f32.mrf.mxu0  ;;  %v1505_v22 = vadd.f32 %v1504_v18, %v1503_v13 }
 0x114   :  { %1154 = vst.msk [vmem:[%s2170_s3 + $0x24] sm:$0xf] %vm1144_vm0, %v1319_v15  ;;  %v994_v20 = vmax.f32 %v898_v16, 0.0  ;;  %v740_v21 = vadd.f32 %v1393_v17, %v2005_v34  ;;  %v1506_v23 = vpop.f32.mrf.mxu1 }
 0x115   :  { %v1395_v24 = vpop.f32.mrf.mxu0 }
 0x116   :  { %v1320_v25 = vpack.c.bf16 %v994_v20, %v994_v20  ;;  %v901_v26 = vadd.f32 %v1505_v22, %v740_v21  ;;  %v1396_v27 = vadd.f32 %v1395_v24, %v1394_v19  ;;  %v1507_v28 = vpop.f32.mrf.mxu1 }
 0x117   :  { %v1397_v29 = vpop.f32.mrf.mxu0  ;;  %v1508_v32 = vadd.f32 %v1507_v28, %v1506_v23 }
 0x118   :  { %1155 = vst.msk [vmem:[%s2170_s3 + $0x28] sm:$0xf] %vm1144_vm0, %v1320_v25  ;;  %v995_v30 = vmax.f32 %v901_v26, 0.0  ;;  %v745_v31 = vadd.f32 %v1396_v27, %v2005_v34  ;;  %v1509_v33 = vpop.f32.mrf.mxu1 }
 0x119   :  { %v1398_v35 = vpop.f32.mrf.mxu0 }
 0x11a   :  { %v1321_v36 = vpack.c.bf16 %v995_v30, %v995_v30  ;;  %v906_v37 = vadd.f32 %v1508_v32, %v745_v31  ;;  %v1399_v38 = vadd.f32 %v1398_v35, %v1397_v29  ;;  %v1510_v39 = vpop.f32.mrf.mxu1 }
 0x11b   :  { %v1400_v40 = vpop.f32.mrf.mxu0  ;;  %v1511_v43 = vadd.f32 %v1510_v39, %v1509_v33 }
 0x11c   :  { %1156 = vst.msk [vmem:[%s2170_s3 + $0x2c] sm:$0xf] %vm1144_vm0, %v1321_v36  ;;  %v996_v41 = vmax.f32 %v906_v37, 0.0  ;;  %v748_v42 = vadd.f32 %v1399_v38, %v2005_v34  ;;  %v1512_v44 = vpop.f32.mrf.mxu1 }
 0x11d   :  { %v1401_v45 = vpop.f32.mrf.mxu0 }
 0x11e   :  { %v1322_v46 = vpack.c.bf16 %v996_v41, %v996_v41  ;;  %v909_v47 = vadd.f32 %v1511_v43, %v748_v42  ;;  %v1402_v48 = vadd.f32 %v1401_v45, %v1400_v40  ;;  %v1513_v49 = vpop.f32.mrf.mxu1 }
 0x11f   :  { %v1403_v50 = vpop.f32.mrf.mxu0  ;;  %v1514_v53 = vadd.f32 %v1513_v49, %v1512_v44 }
 0x120   :  { %1157 = vst.msk [vmem:[%s2170_s3 + $0x30] sm:$0xf] %vm1144_vm0, %v1322_v46  ;;  %v997_v51 = vmax.f32 %v909_v47, 0.0  ;;  %v753_v52 = vadd.f32 %v1402_v48, %v2005_v34  ;;  %v1515_v54 = vpop.f32.mrf.mxu1 }
 0x121   :  { %v1404_v55 = vpop.f32.mrf.mxu0 }
 0x122   :  { %v1323_v56 = vpack.c.bf16 %v997_v51, %v997_v51  ;;  %v914_v57 = vadd.f32 %v1514_v53, %v753_v52  ;;  %v1405_v58 = vadd.f32 %v1404_v55, %v1403_v50  ;;  %v1516_v59 = vpop.f32.mrf.mxu1 }
 0x123   :  { %v1406_v60 = vpop.f32.mrf.mxu0  ;;  %v1517_v63 = vadd.f32 %v1516_v59, %v1515_v54 }
 0x124   :  { %1158 = vst.msk [vmem:[%s2170_s3 + $0x34] sm:$0xf] %vm1144_vm0, %v1323_v56  ;;  %v998_v61 = vmax.f32 %v914_v57, 0.0  ;;  %v756_v62 = vadd.f32 %v1405_v58, %v2005_v34  ;;  %v1518_v0 = vpop.f32.mrf.mxu1 }
 0x125   :  { %v1407_v1 = vpop.f32.mrf.mxu0 }
 0x126   :  { %v1324_v2 = vpack.c.bf16 %v998_v61, %v998_v61  ;;  %v917_v3 = vadd.f32 %v1517_v63, %v756_v62  ;;  %v1408_v4 = vadd.f32 %v1407_v1, %v1406_v60  ;;  %v1519_v5 = vpop.f32.mrf.mxu1 }
 0x127   :  { %v1409_v6 = vpop.f32.mrf.mxu0  ;;  %v1520_v9 = vadd.f32 %v1519_v5, %v1518_v0 }
 0x128   :  { %1159 = vst.msk [vmem:[%s2170_s3 + $0x38] sm:$0xf] %vm1144_vm0, %v1324_v2  ;;  %v999_v7 = vmax.f32 %v917_v3, 0.0  ;;  %v761_v8 = vadd.f32 %v1408_v4, %v2005_v34  ;;  %v1521_v10 = vpop.f32.mrf.mxu1 }
 0x129   :  { %v1410_v11 = vpop.f32.mrf.mxu0 }
 0x12a   :  { %v1325_v12 = vpack.c.bf16 %v999_v7, %v999_v7  ;;  %v922_v13 = vadd.f32 %v1520_v9, %v761_v8  ;;  %v1411_v14 = vadd.f32 %v1410_v11, %v1409_v6  ;;  %v1522_v15 = vpop.f32.mrf.mxu1 }
 0x12b   :  { %v1412_v16 = vpop.f32.mrf.mxu0  ;;  %v1523_v19 = vadd.f32 %v1522_v15, %v1521_v10 }
 0x12c   :  { %1160 = vst.msk [vmem:[%s2170_s3 + $0x3c] sm:$0xf] %vm1144_vm0, %v1325_v12  ;;  %v1000_v17 = vmax.f32 %v922_v13, 0.0  ;;  %v764_v18 = vadd.f32 %v1411_v14, %v2005_v34  ;;  %v1524_v20 = vpop.f32.mrf.mxu1 }
 0x12d   :  { %v1413_v21 = vpop.f32.mrf.mxu0 }
 0x12e   :  { %v1326_v22 = vpack.c.bf16 %v1000_v17, %v1000_v17  ;;  %v925_v23 = vadd.f32 %v1523_v19, %v764_v18  ;;  %v1414_v24 = vadd.f32 %v1413_v21, %v1412_v16  ;;  %v1525_v25 = vpop.f32.mrf.mxu1 }
 0x12f   :  { %v1415_v26 = vpop.f32.mrf.mxu0  ;;  %v1526_v29 = vadd.f32 %v1525_v25, %v1524_v20 }
 0x130   :  { %1161 = vst.msk [vmem:[%s2170_s3 + $0x40] sm:$0xf] %vm1144_vm0, %v1326_v22  ;;  %v1001_v27 = vmax.f32 %v925_v23, 0.0  ;;  %v769_v28 = vadd.f32 %v1414_v24, %v2005_v34  ;;  %v1527_v30 = vpop.f32.mrf.mxu1 }
 0x131   :  { %v1416_v31 = vpop.f32.mrf.mxu0 }
 0x132   :  { %v1327_v32 = vpack.c.bf16 %v1001_v27, %v1001_v27  ;;  %v930_v33 = vadd.f32 %v1526_v29, %v769_v28  ;;  %v1417_v35 = vadd.f32 %v1416_v31, %v1415_v26  ;;  %v1528_v36 = vpop.f32.mrf.mxu1 }
 0x133   :  { %v1418_v37 = vpop.f32.mrf.mxu0  ;;  %v1529_v40 = vadd.f32 %v1528_v36, %v1527_v30 }
 0x134   :  { %1162 = vst.msk [vmem:[%s2170_s3 + $0x44] sm:$0xf] %vm1144_vm0, %v1327_v32  ;;  %v1002_v38 = vmax.f32 %v930_v33, 0.0  ;;  %v772_v39 = vadd.f32 %v1417_v35, %v2005_v34  ;;  %v1530_v41 = vpop.f32.mrf.mxu1 }
 0x135   :  { %v1419_v42 = vpop.f32.mrf.mxu0 }
 0x136   :  { %v1328_v43 = vpack.c.bf16 %v1002_v38, %v1002_v38  ;;  %v933_v44 = vadd.f32 %v1529_v40, %v772_v39  ;;  %v1420_v45 = vadd.f32 %v1419_v42, %v1418_v37  ;;  %v1531_v46 = vpop.f32.mrf.mxu1 }
 0x137   :  { %v1421_v47 = vpop.f32.mrf.mxu0  ;;  %v1532_v50 = vadd.f32 %v1531_v46, %v1530_v41 }
 0x138   :  { %1163 = vst.msk [vmem:[%s2170_s3 + $0x48] sm:$0xf] %vm1144_vm0, %v1328_v43  ;;  %v1003_v48 = vmax.f32 %v933_v44, 0.0  ;;  %v777_v49 = vadd.f32 %v1420_v45, %v2005_v34  ;;  %v1533_v51 = vpop.f32.mrf.mxu1 }
 0x139   :  { %v1422_v52 = vpop.f32.mrf.mxu0 }
 0x13a   :  { %v1329_v53 = vpack.c.bf16 %v1003_v48, %v1003_v48  ;;  %v938_v54 = vadd.f32 %v1532_v50, %v777_v49  ;;  %v1423_v55 = vadd.f32 %v1422_v52, %v1421_v47  ;;  %v1534_v56 = vpop.f32.mrf.mxu1 }
 0x13b   :  { %v1424_v57 = vpop.f32.mrf.mxu0  ;;  %v1535_v60 = vadd.f32 %v1534_v56, %v1533_v51 }
 0x13c   :  { %1164 = vst.msk [vmem:[%s2170_s3 + $0x4c] sm:$0xf] %vm1144_vm0, %v1329_v53  ;;  %v1004_v58 = vmax.f32 %v938_v54, 0.0  ;;  %v780_v59 = vadd.f32 %v1423_v55, %v2005_v34  ;;  %v1536_v61 = vpop.f32.mrf.mxu1 }
 0x13d   :  { %v1425_v62 = vpop.f32.mrf.mxu0 }
 0x13e   :  { %v1330_v63 = vpack.c.bf16 %v1004_v58, %v1004_v58  ;;  %v941_v0 = vadd.f32 %v1535_v60, %v780_v59  ;;  %v1426_v1 = vadd.f32 %v1425_v62, %v1424_v57  ;;  %v1537_v2 = vpop.f32.mrf.mxu1 }
 0x13f   :  { %v1427_v3 = vpop.f32.mrf.mxu0  ;;  %v1538_v6 = vadd.f32 %v1537_v2, %v1536_v61 }
 0x140   :  { %1165 = vst.msk [vmem:[%s2170_s3 + $0x50] sm:$0xf] %vm1144_vm0, %v1330_v63  ;;  %v1005_v4 = vmax.f32 %v941_v0, 0.0  ;;  %v785_v5 = vadd.f32 %v1426_v1, %v2005_v34  ;;  %v1539_v7 = vpop.f32.mrf.mxu1 }
 0x141   :  { %v1428_v8 = vpop.f32.mrf.mxu0 }
 0x142   :  { %v1331_v9 = vpack.c.bf16 %v1005_v4, %v1005_v4  ;;  %v946_v10 = vadd.f32 %v1538_v6, %v785_v5  ;;  %v1429_v11 = vadd.f32 %v1428_v8, %v1427_v3  ;;  %v1540_v12 = vpop.f32.mrf.mxu1 }
 0x143   :  { %v1430_v13 = vpop.f32.mrf.mxu0  ;;  %v1541_v16 = vadd.f32 %v1540_v12, %v1539_v7 }
 0x144   :  { %1166 = vst.msk [vmem:[%s2170_s3 + $0x54] sm:$0xf] %vm1144_vm0, %v1331_v9  ;;  %v1006_v14 = vmax.f32 %v946_v10, 0.0  ;;  %v788_v15 = vadd.f32 %v1429_v11, %v2005_v34  ;;  %v1542_v17 = vpop.f32.mrf.mxu1 }
 0x145   :  { %v1431_v18 = vpop.f32.mrf.mxu0 }
 0x146   :  { %v1332_v19 = vpack.c.bf16 %v1006_v14, %v1006_v14  ;;  %v949_v20 = vadd.f32 %v1541_v16, %v788_v15  ;;  %v1432_v21 = vadd.f32 %v1431_v18, %v1430_v13  ;;  %v1543_v22 = vpop.f32.mrf.mxu1 }
 0x147   :  { %v1433_v23 = vpop.f32.mrf.mxu0  ;;  %v1544_v26 = vadd.f32 %v1543_v22, %v1542_v17 }
 0x148   :  { %1167 = vst.msk [vmem:[%s2170_s3 + $0x58] sm:$0xf] %vm1144_vm0, %v1332_v19  ;;  %v1007_v24 = vmax.f32 %v949_v20, 0.0  ;;  %v793_v25 = vadd.f32 %v1432_v21, %v2005_v34  ;;  %v1545_v27 = vpop.f32.mrf.mxu1 }
 0x149   :  { %v1434_v28 = vpop.f32.mrf.mxu0 }
 0x14a   :  { %v1333_v29 = vpack.c.bf16 %v1007_v24, %v1007_v24  ;;  %v954_v30 = vadd.f32 %v1544_v26, %v793_v25  ;;  %v1435_v31 = vadd.f32 %v1434_v28, %v1433_v23  ;;  %v1546_v32 = vpop.f32.mrf.mxu1 }
 0x14b   :  { %v1436_v33 = vpop.f32.mrf.mxu0  ;;  %v1547_v37 = vadd.f32 %v1546_v32, %v1545_v27 }
 0x14c   :  { %1168 = vst.msk [vmem:[%s2170_s3 + $0x5c] sm:$0xf] %vm1144_vm0, %v1333_v29  ;;  %v1008_v35 = vmax.f32 %v954_v30, 0.0  ;;  %v796_v36 = vadd.f32 %v1435_v31, %v2005_v34  ;;  %v1548_v38 = vpop.f32.mrf.mxu1 }
 0x14d   :  { %v1437_v39 = vpop.f32.mrf.mxu0 }
 0x14e   :  { %v1334_v40 = vpack.c.bf16 %v1008_v35, %v1008_v35  ;;  %v957_v41 = vadd.f32 %v1547_v37, %v796_v36  ;;  %v1438_v42 = vadd.f32 %v1437_v39, %v1436_v33  ;;  %v1549_v43 = vpop.f32.mrf.mxu1 }
 0x14f   :  { %v1439_v44 = vpop.f32.mrf.mxu0  ;;  %v1550_v47 = vadd.f32 %v1549_v43, %v1548_v38 }
 0x150   :  { %1169 = vst.msk [vmem:[%s2170_s3 + $0x60] sm:$0xf] %vm1144_vm0, %v1334_v40  ;;  %v1009_v45 = vmax.f32 %v957_v41, 0.0  ;;  %v801_v46 = vadd.f32 %v1438_v42, %v2005_v34  ;;  %v1551_v48 = vpop.f32.mrf.mxu1 }
 0x151   :  { %v1440_v49 = vpop.f32.mrf.mxu0 }
 0x152   :  { %v1335_v50 = vpack.c.bf16 %v1009_v45, %v1009_v45  ;;  %v962_v51 = vadd.f32 %v1550_v47, %v801_v46  ;;  %v1441_v52 = vadd.f32 %v1440_v49, %v1439_v44  ;;  %v1552_v53 = vpop.f32.mrf.mxu1 }
 0x153   :  { %v1442_v54 = vpop.f32.mrf.mxu0  ;;  %v1553_v57 = vadd.f32 %v1552_v53, %v1551_v48 }
 0x154   :  { %1170 = vst.msk [vmem:[%s2170_s3 + $0x64] sm:$0xf] %vm1144_vm0, %v1335_v50  ;;  %v1010_v55 = vmax.f32 %v962_v51, 0.0  ;;  %v804_v56 = vadd.f32 %v1441_v52, %v2005_v34  ;;  %v1554_v58 = vpop.f32.mrf.mxu1 }
 0x155   :  { %v1443_v59 = vpop.f32.mrf.mxu0 }
 0x156   :  { %v1336_v60 = vpack.c.bf16 %v1010_v55, %v1010_v55  ;;  %v965_v61 = vadd.f32 %v1553_v57, %v804_v56  ;;  %v1444_v62 = vadd.f32 %v1443_v59, %v1442_v54  ;;  %v1555_v63 = vpop.f32.mrf.mxu1 }
 0x157   :  { %v1445_v0 = vpop.f32.mrf.mxu0  ;;  %v1556_v3 = vadd.f32 %v1555_v63, %v1554_v58 }
 0x158   :  { %1171 = vst.msk [vmem:[%s2170_s3 + $0x68] sm:$0xf] %vm1144_vm0, %v1336_v60  ;;  %v1011_v1 = vmax.f32 %v965_v61, 0.0  ;;  %v809_v2 = vadd.f32 %v1444_v62, %v2005_v34  ;;  %v1557_v4 = vpop.f32.mrf.mxu1 }
 0x159   :  { %v1446_v5 = vpop.f32.mrf.mxu0 }
 0x15a   :  { %v1337_v6 = vpack.c.bf16 %v1011_v1, %v1011_v1  ;;  %v970_v7 = vadd.f32 %v1556_v3, %v809_v2  ;;  %v1447_v8 = vadd.f32 %v1446_v5, %v1445_v0  ;;  %v1558_v9 = vpop.f32.mrf.mxu1 }
 0x15b   :  { %v1448_v10 = vpop.f32.mrf.mxu0  ;;  %v1559_v13 = vadd.f32 %v1558_v9, %v1557_v4 }
 0x15c   :  { %1172 = vst.msk [vmem:[%s2170_s3 + $0x6c] sm:$0xf] %vm1144_vm0, %v1337_v6  ;;  %v1012_v11 = vmax.f32 %v970_v7, 0.0  ;;  %v812_v12 = vadd.f32 %v1447_v8, %v2005_v34  ;;  %v1560_v14 = vpop.f32.mrf.mxu1 }
 0x15d   :  { %v1449_v15 = vpop.f32.mrf.mxu0 }
 0x15e   :  { %v1338_v16 = vpack.c.bf16 %v1012_v11, %v1012_v11  ;;  %v973_v17 = vadd.f32 %v1559_v13, %v812_v12  ;;  %v1450_v18 = vadd.f32 %v1449_v15, %v1448_v10  ;;  %v1561_v19 = vpop.f32.mrf.mxu1 }
 0x15f   :  { %v1451_v20 = vpop.f32.mrf.mxu0  ;;  %v1562_v23 = vadd.f32 %v1561_v19, %v1560_v14 }
 0x160   :  { %1173 = vst.msk [vmem:[%s2170_s3 + $0x70] sm:$0xf] %vm1144_vm0, %v1338_v16  ;;  %v1013_v21 = vmax.f32 %v973_v17, 0.0  ;;  %v817_v22 = vadd.f32 %v1450_v18, %v2005_v34  ;;  %v1563_v24 = vpop.f32.mrf.mxu1 }
 0x161   :  { %v1452_v25 = vpop.f32.mrf.mxu0 }
 0x162   :  { %v1339_v26 = vpack.c.bf16 %v1013_v21, %v1013_v21  ;;  %v978_v27 = vadd.f32 %v1562_v23, %v817_v22  ;;  %v1453_v28 = vadd.f32 %v1452_v25, %v1451_v20  ;;  %v1564_v29 = vpop.f32.mrf.mxu1 }
 0x163   :  { %v1565_v32 = vadd.f32 %v1564_v29, %v1563_v24 }
 0x164   :  { %1174 = vst.msk [vmem:[%s2170_s3 + $0x74] sm:$0xf] %vm1144_vm0, %v1339_v26  ;;  %v1014_v30 = vmax.f32 %v978_v27, 0.0  ;;  %v820_v31 = vadd.f32 %v1453_v28, %v2005_v34 }
 0x166   :  { %v1340_v33 = vpack.c.bf16 %v1014_v30, %v1014_v30  ;;  %v981_v35 = vadd.f32 %v1565_v32, %v820_v31 }
 0x168   :  { %1175 = vst.msk [vmem:[%s2170_s3 + $0x78] sm:$0xf] %vm1144_vm0, %v1340_v33  ;;  %v1015_v36 = vmax.f32 %v981_v35, 0.0 }
 0x16a   :  { %v1341_v37 = vpack.c.bf16 %v1015_v36, %v1015_v36 }
 0x16c   :  { %1176 = vst.msk [vmem:[%s2170_s3 + $0x7c] sm:$0xf] %vm1144_vm0, %v1341_v37 }

// kernel: vae_forward.9
= control target key start
LH: loop header
LB: loop body
LE: loop exit
PB: predicated region body
PF: predicated region fallthrough
CT: control target
= control target key end

     0   :  { %vm1026_vm0 = vcmask 519168   ;;  %s1765_s1 = inlined_call_operand.vmem [shape: bf16[1024,64], index: 1, kind: input, shape index: {}]   ;;  %s1766_s0 = inlined_call_operand.vmem [shape: bf16[64,1024], index: 0, kind: input, shape index: {}]   ;;  %s1767_s2 = inlined_call_operand.vmem [shape: f32[1,64], index: 2, kind: input, shape index: {}]   ;;  %s1768_s3 = inlined_call_operand.vmem [shape: bf16[64,64], index: 3, kind: output, shape index: {}]  }
   0x1   :  { %v1312_v0 = vld [vmem:[%s1765_s1 + $0x78] sm:$0xff]   ;;  %v1316_v4 = vld [vmem:[%s1765_s1 + $0x70] sm:$0xff]   ;;  %v1320_v8 = vld [vmem:[%s1765_s1 + $0x68] sm:$0xff]  }
   0x2   :  { %v1313_v1 = vld [vmem:[%s1765_s1 + $0xf8] sm:$0xff]   ;;  %1152 = vmatprep.subr.bf16.mxu0 %v1312_v0  ;;  %v1317_v5 = vld [vmem:[%s1765_s1 + $0xf0] sm:$0xff]   ;;  %v1321_v9 = vld [vmem:[%s1765_s1 + $0xe8] sm:$0xff]  }
   0x3   :  { %v1314_v2 = vld [vmem:[%s1765_s1 + $0x38] sm:$0xff]   ;;  %1192 = vmatprep.subr.bf16.mxu1 %v1313_v1  ;;  %v1318_v6 = vld [vmem:[%s1765_s1 + $0x30] sm:$0xff]   ;;  %v1322_v10 = vld [vmem:[%s1765_s1 + $0x28] sm:$0xff]  }
   0x4   :  { %v1315_v3 = vld [vmem:[%s1765_s1 + $0xb8] sm:$0xff]   ;;  %1153 = vmatpush3.bf16.msra.mxu0 %v1314_v2  ;;  %v1319_v7 = vld [vmem:[%s1765_s1 + $0xb0] sm:$0xff]   ;;  %v1323_v11 = vld [vmem:[%s1765_s1 + $0xa8] sm:$0xff]  }
   0x5   :  { %1193 = vmatpush3.bf16.msra.mxu1 %v1315_v3  ;;  %1154 = vmatprep.subr.bf16.mxu0 %v1316_v4  ;;  %v1324_v12 = vld [vmem:[%s1765_s1 + $0x60] sm:$0xff]   ;;  %v1328_v16 = vld [vmem:[%s1765_s1 + $0x58] sm:$0xff]   ;;  %v1332_v20 = vld [vmem:[%s1765_s1 + $0x50] sm:$0xff]  }
   0x6   :  { %1194 = vmatprep.subr.bf16.mxu1 %v1317_v5  ;;  %v1325_v13 = vld [vmem:[%s1765_s1 + $0xe0] sm:$0xff]   ;;  %v1329_v17 = vld [vmem:[%s1765_s1 + $0xd8] sm:$0xff]   ;;  %v1333_v21 = vld [vmem:[%s1765_s1 + $0xd0] sm:$0xff]  }
   0x7   :  { %v1326_v14 = vld [vmem:[%s1765_s1 + $0x20] sm:$0xff]   ;;  %v1330_v18 = vld [vmem:[%s1765_s1 + $0x18] sm:$0xff]   ;;  %v1334_v22 = vld [vmem:[%s1765_s1 + $0x10] sm:$0xff]  }
   0x8   :  { %1155 = vmatpush3.bf16.msra.mxu0 %v1318_v6  ;;  %v1327_v15 = vld [vmem:[%s1765_s1 + $0xa0] sm:$0xff]   ;;  %v1331_v19 = vld [vmem:[%s1765_s1 + $0x98] sm:$0xff]   ;;  %v1335_v23 = vld [vmem:[%s1765_s1 + $0x90] sm:$0xff]  }
   0x9   :  { %1195 = vmatpush3.bf16.msra.mxu1 %v1319_v7  ;;  %1156 = vmatprep.subr.bf16.mxu0 %v1320_v8  ;;  %v1336_v24 = vld [vmem:[%s1765_s1 + $0x48] sm:$0xff]   ;;  %v1340_v28 = vld [vmem:[%s1765_s1 + $0x40] sm:$0xff]   ;;  %v1344_v40 = vld [vmem:[%s1765_s1 + $0x178] sm:$0xff]  }
   0xa   :  { %1196 = vmatprep.subr.bf16.mxu1 %v1321_v9  ;;  %v1337_v25 = vld [vmem:[%s1765_s1 + $0xc8] sm:$0xff]   ;;  %v1341_v29 = vld [vmem:[%s1765_s1 + $0xc0] sm:$0xff]   ;;  %v1345_v41 = vld [vmem:[%s1765_s1 + $0x1f8] sm:$0xff]  }
   0xb   :  { %v1338_v26 = vld [vmem:[%s1765_s1 + $0x8] sm:$0xff]   ;;  %v1342_v30 = vld [vmem:[%s1765_s1] sm:$0xff]   ;;  %v1346_v42 = vld [vmem:[%s1765_s1 + $0x138] sm:$0xff]  }
   0xc   :  { %1157 = vmatpush3.bf16.msra.mxu0 %v1322_v10  ;;  %v1339_v27 = vld [vmem:[%s1765_s1 + $0x88] sm:$0xff]   ;;  %v1343_v31 = vld [vmem:[%s1765_s1 + $0x80] sm:$0xff]   ;;  %v1347_v43 = vld [vmem:[%s1765_s1 + $0x1b8] sm:$0xff]  }
   0xd   :  { %1197 = vmatpush3.bf16.msra.mxu1 %v1323_v11  ;;  %1158 = vmatprep.subr.bf16.mxu0 %v1324_v12  ;;  %v15_v32 = vld [vmem:[%s1766_s0] sm:$0xff]  ;;  %v16_v34 = vld [vmem:[%s1766_s0 + $0x8] sm:$0xff]  ;;  %v1348_v44 = vld [vmem:[%s1765_s1 + $0x170] sm:$0xff]  }
   0xe   :  { %1198 = vmatprep.subr.bf16.mxu1 %v1325_v13  ;;  %v19_v33 = vld [vmem:[%s1766_s0 + $0x20] sm:$0xff]  ;;  %v20_v37 = vld [vmem:[%s1766_s0 + $0x28] sm:$0xff]  ;;  %v1349_v45 = vld [vmem:[%s1765_s1 + $0x1f0] sm:$0xff]  }
   0xf   :  { %v1040_v35 = vcombine.low %v15_v32, %v19_v33  ;;  %v1041_v36 = vcombine.high %v15_v32, %v19_v33  ;;  %v1042_v38 = vcombine.low %v16_v34, %v20_v37  ;;  %v1043_v39 = vcombine.high %v16_v34, %v20_v37  ;;  %v1350_v46 = vld [vmem:[%s1765_s1 + $0x130] sm:$0xff]   ;;  %v23_v48 = vld [vmem:[%s1766_s0 + $0x40] sm:$0xff]  ;;  %v24_v51 = vld [vmem:[%s1766_s0 + $0x48] sm:$0xff] }
  0x10   :  { %1159 = vmatpush3.bf16.msra.mxu0 %v1326_v14  ;;  %v1351_v47 = vld [vmem:[%s1765_s1 + $0x1b0] sm:$0xff]   ;;  %v27_v49 = vld [vmem:[%s1766_s0 + $0x60] sm:$0xff]  ;;  %v28_v52 = vld [vmem:[%s1766_s0 + $0x68] sm:$0xff] }
  0x11   :  { %1199 = vmatpush3.bf16.msra.mxu1 %v1327_v15  ;;  %1160 = vmatprep.subr.bf16.mxu0 %v1328_v16  ;;  %v1049_v50 = vcombine.high %v23_v48, %v27_v49  ;;  %v1048_v53 = vcombine.low %v23_v48, %v27_v49  ;;  %v1051_v54 = vcombine.high %v24_v51, %v28_v52  ;;  %v1352_v56 = vld [vmem:[%s1765_s1 + $0x168] sm:$0xff]   ;;  %v1356_v60 = vld [vmem:[%s1765_s1 + $0x160] sm:$0xff]   ;;  %v1360_v8 = vld [vmem:[%s1765_s1 + $0x158] sm:$0xff]  }
  0x12   :  { %1200 = vmatprep.subr.bf16.mxu1 %v1329_v17  ;;  %758 = vmatprep.mubr.bf16.mxu0 %v1041_v36  ;;  %v1050_v55 = vcombine.low %v24_v51, %v28_v52  ;;  %v1353_v57 = vld [vmem:[%s1765_s1 + $0x1e8] sm:$0xff]   ;;  %v1357_v61 = vld [vmem:[%s1765_s1 + $0x1e0] sm:$0xff]   ;;  %v1361_v9 = vld [vmem:[%s1765_s1 + $0x1d8] sm:$0xff]  }
  0x13   :  { %823 = vmatprep.mubr.bf16.mxu1 %v1043_v39  ;;  %v1354_v58 = vld [vmem:[%s1765_s1 + $0x128] sm:$0xff]   ;;  %v1358_v62 = vld [vmem:[%s1765_s1 + $0x120] sm:$0xff]   ;;  %v1362_v10 = vld [vmem:[%s1765_s1 + $0x118] sm:$0xff]  }
  0x14   :  { %1161 = vmatpush3.bf16.msra.mxu0 %v1330_v18  ;;  %v1355_v59 = vld [vmem:[%s1765_s1 + $0x1a8] sm:$0xff]   ;;  %v1359_v63 = vld [vmem:[%s1765_s1 + $0x1a0] sm:$0xff]   ;;  %v1363_v11 = vld [vmem:[%s1765_s1 + $0x198] sm:$0xff]  }
  0x15   :  { %1201 = vmatpush3.bf16.msra.mxu1 %v1331_v19  ;;  %1162 = vmatprep.subr.bf16.mxu0 %v1332_v20  ;;  %v31_v0 = vld [vmem:[%s1766_s0 + $0x80] sm:$0xff]  ;;  %v32_v2 = vld [vmem:[%s1766_s0 + $0x88] sm:$0xff]  ;;  %v1364_v12 = vld [vmem:[%s1765_s1 + $0x150] sm:$0xff]  }
  0x16   :  { %1202 = vmatprep.subr.bf16.mxu1 %v1333_v21  ;;  %v35_v1 = vld [vmem:[%s1766_s0 + $0xa0] sm:$0xff]  ;;  %v36_v3 = vld [vmem:[%s1766_s0 + $0xa8] sm:$0xff]  ;;  %v1365_v13 = vld [vmem:[%s1765_s1 + $0x1d0] sm:$0xff]  }
  0x17   :  { %v1057_v4 = vcombine.high %v31_v0, %v35_v1  ;;  %v1059_v5 = vcombine.high %v32_v2, %v36_v3  ;;  %v1056_v6 = vcombine.low %v31_v0, %v35_v1  ;;  %v1058_v7 = vcombine.low %v32_v2, %v36_v3  ;;  %v1366_v14 = vld [vmem:[%s1765_s1 + $0x110] sm:$0xff]   ;;  %v39_v16 = vld [vmem:[%s1766_s0 + $0xc0] sm:$0xff]  ;;  %v40_v18 = vld [vmem:[%s1766_s0 + $0xc8] sm:$0xff] }
  0x18   :  { %1163 = vmatpush3.bf16.msra.mxu0 %v1334_v22  ;;  %v1367_v15 = vld [vmem:[%s1765_s1 + $0x190] sm:$0xff]   ;;  %v43_v17 = vld [vmem:[%s1766_s0 + $0xe0] sm:$0xff]  ;;  %v44_v20 = vld [vmem:[%s1766_s0 + $0xe8] sm:$0xff] }
  0x19   :  { %1203 = vmatpush3.bf16.msra.mxu1 %v1335_v23  ;;  %1164 = vmatprep.subr.bf16.mxu0 %v1336_v24  ;;  %v1065_v19 = vcombine.high %v39_v16, %v43_v17  ;;  %v1064_v21 = vcombine.low %v39_v16, %v43_v17  ;;  %v1067_v22 = vcombine.high %v40_v18, %v44_v20  ;;  %v1368_v24 = vld [vmem:[%s1765_s1 + $0x148] sm:$0xff]   ;;  %v17_v32 = vld [vmem:[%s1766_s0 + $0x10] sm:$0xff]  ;;  %v18_v36 = vld [vmem:[%s1766_s0 + $0x18] sm:$0xff] }
  0x1a   :  { %1204 = vmatprep.subr.bf16.mxu1 %v1337_v25  ;;  %v1066_v23 = vcombine.low %v40_v18, %v44_v20  ;;  %v1369_v25 = vld [vmem:[%s1765_s1 + $0x1c8] sm:$0xff]   ;;  %v21_v33 = vld [vmem:[%s1766_s0 + $0x30] sm:$0xff]  ;;  %v22_v37 = vld [vmem:[%s1766_s0 + $0x38] sm:$0xff] }
  0x1b   :  { %v1044_v34 = vcombine.low %v17_v32, %v21_v33  ;;  %v1046_v39 = vcombine.low %v18_v36, %v22_v37  ;;  %v34_v48 = vld [vmem:[%s1766_s0 + $0x98] sm:$0xff] }
  0x1c   :  { %1165 = vmatpush3.bf16.msra.mxu0 %v1338_v26  ;;  %v1370_v26 = vld [vmem:[%s1765_s1 + $0x108] sm:$0xff]   ;;  %v38_v49 = vld [vmem:[%s1766_s0 + $0xb8] sm:$0xff] }
  0x1d   :  { %1205 = vmatpush3.bf16.msra.mxu1 %v1339_v27  ;;  %1166 = vmatprep.subr.bf16.mxu0 %v1340_v28  ;;  %v1371_v27 = vld [vmem:[%s1765_s1 + $0x188] sm:$0xff]   ;;  %v1372_v28 = vld [vmem:[%s1765_s1 + $0x140] sm:$0xff]  }
  0x1e   :  { %1206 = vmatprep.subr.bf16.mxu1 %v1341_v29  ;;  %v1373_v29 = vld [vmem:[%s1765_s1 + $0x1c0] sm:$0xff]  }
  0x20   :  { %1167 = vmatpush3.bf16.msra.mxu0 %v1342_v30  ;;  %v1374_v30 = vld [vmem:[%s1765_s1 + $0x100] sm:$0xff]  }
  0x21   :  { %1207 = vmatpush3.bf16.msra.mxu1 %v1343_v31  ;;  %1232 = vmatprep.subr.bf16.mxu0 %v1344_v40  ;;  %v1375_v31 = vld [vmem:[%s1765_s1 + $0x180] sm:$0xff]   ;;  %v1047_v40 = vcombine.high %v18_v36, %v22_v37 }
  0x22   :  { %1272 = vmatprep.subr.bf16.mxu1 %v1345_v41  ;;  %v29_v41 = vld [vmem:[%s1766_s0 + $0x70] sm:$0xff] }
  0x23   :  { %759 = vmatmul.mubr.bf16.vlgmr.msra.gmra.mxu0 %v1040_v35  ;;  %v1045_v35 = vcombine.high %v17_v32, %v21_v33 }
  0x24   :  { %824 = vmatmul.mubr.bf16.vlgmr.msra.gmra.mxu1 %v1042_v38  ;;  %1233 = vmatpush3.bf16.msra.mxu0 %v1346_v42  ;;  %v25_v38 = vld [vmem:[%s1766_s0 + $0x50] sm:$0xff]  ;;  %v26_v42 = vld [vmem:[%s1766_s0 + $0x58] sm:$0xff] }
  0x25   :  { %1273 = vmatpush3.bf16.msra.mxu1 %v1347_v43  ;;  %1234 = vmatprep.subr.bf16.mxu0 %v1348_v44  ;;  %v30_v43 = vld [vmem:[%s1766_s0 + $0x78] sm:$0xff]  ;;  %v1053_v44 = vcombine.high %v25_v38, %v29_v41 }
  0x26   :  { %1274 = vmatprep.subr.bf16.mxu1 %v1349_v45  ;;  %766 = vmatprep.mubr.bf16.mxu0 %v1049_v50  ;;  %v1055_v45 = vcombine.high %v26_v42, %v30_v43  ;;  %v1052_v50 = vcombine.low %v25_v38, %v29_v41  ;;  %v1054_v51 = vcombine.low %v26_v42, %v30_v43 }
  0x27   :  { %831 = vmatprep.mubr.bf16.mxu1 %v1051_v54  ;;  %v41_v54 = vld [vmem:[%s1766_s0 + $0xd0] sm:$0xff] }
  0x28   :  { %1235 = vmatpush3.bf16.msra.mxu0 %v1350_v46  ;;  %v33_v46 = vld [vmem:[%s1766_s0 + $0x90] sm:$0xff] }
  0x29   :  { %1275 = vmatpush3.bf16.msra.mxu1 %v1351_v47  ;;  %1236 = vmatprep.subr.bf16.mxu0 %v1352_v56  ;;  %v37_v47 = vld [vmem:[%s1766_s0 + $0xb0] sm:$0xff]  ;;  %v42_v56 = vld [vmem:[%s1766_s0 + $0xd8] sm:$0xff] }
  0x2a   :  { %1276 = vmatprep.subr.bf16.mxu1 %v1353_v57  ;;  %v1061_v52 = vcombine.high %v33_v46, %v37_v47  ;;  %v46_v57 = vld [vmem:[%s1766_s0 + $0xf8] sm:$0xff] }
  0x2b   :  { %767 = vmatmul.mubr.bf16.gmra.mxu0 %v1048_v53  ;;  %v1063_v53 = vcombine.high %v34_v48, %v38_v49 }
  0x2c   :  { %832 = vmatmul.mubr.bf16.gmra.mxu1 %v1050_v55  ;;  %1237 = vmatpush3.bf16.msra.mxu0 %v1354_v58  ;;  %v45_v55 = vld [vmem:[%s1766_s0 + $0xf0] sm:$0xff]  ;;  %v1060_v58 = vcombine.low %v33_v46, %v37_v47 }
  0x2d   :  { %1277 = vmatpush3.bf16.msra.mxu1 %v1355_v59  ;;  %1238 = vmatprep.subr.bf16.mxu0 %v1356_v60  ;;  %v1062_v59 = vcombine.low %v34_v48, %v38_v49  ;;  %v1069_v60 = vcombine.high %v41_v54, %v45_v55 }
  0x2e   :  { %1278 = vmatprep.subr.bf16.mxu1 %v1357_v61  ;;  %774 = vmatprep.mubr.bf16.mxu0 %v1057_v4  ;;  %v1071_v61 = vcombine.high %v42_v56, %v46_v57 }
  0x2f   :  { %839 = vmatprep.mubr.bf16.mxu1 %v1059_v5 }
  0x30   :  { %1239 = vmatpush3.bf16.msra.mxu0 %v1358_v62  ;;  %v1068_v62 = vcombine.low %v41_v54, %v45_v55 }
  0x31   :  { %1279 = vmatpush3.bf16.msra.mxu1 %v1359_v63  ;;  %1240 = vmatprep.subr.bf16.mxu0 %v1360_v8  ;;  %v1070_v63 = vcombine.low %v42_v56, %v46_v57 }
  0x32   :  { %1280 = vmatprep.subr.bf16.mxu1 %v1361_v9 }
  0x33   :  { %775 = vmatmul.mubr.bf16.gmra.mxu0 %v1056_v6 }
  0x34   :  { %840 = vmatmul.mubr.bf16.gmra.mxu1 %v1058_v7  ;;  %1241 = vmatpush3.bf16.msra.mxu0 %v1362_v10 }
  0x35   :  { %1281 = vmatpush3.bf16.msra.mxu1 %v1363_v11  ;;  %1242 = vmatprep.subr.bf16.mxu0 %v1364_v12 }
  0x36   :  { %1282 = vmatprep.subr.bf16.mxu1 %v1365_v13  ;;  %782 = vmatprep.mubr.bf16.mxu0 %v1065_v19 }
  0x37   :  { %847 = vmatprep.mubr.bf16.mxu1 %v1067_v22 }
  0x38   :  { %1243 = vmatpush3.bf16.msra.mxu0 %v1366_v14 }
  0x39   :  { %1283 = vmatpush3.bf16.msra.mxu1 %v1367_v15  ;;  %1244 = vmatprep.subr.bf16.mxu0 %v1368_v24 }
  0x3a   :  { %1284 = vmatprep.subr.bf16.mxu1 %v1369_v25 }
  0x3b   :  { %783 = vmatmul.mubr.bf16.gmra.mxu0 %v1064_v21 }
  0x3c   :  { %848 = vmatmul.mubr.bf16.gmra.mxu1 %v1066_v23  ;;  %1245 = vmatpush3.bf16.msra.mxu0 %v1370_v26 }
  0x3d   :  { %1285 = vmatpush3.bf16.msra.mxu1 %v1371_v27  ;;  %1246 = vmatprep.subr.bf16.mxu0 %v1372_v28 }
  0x3e   :  { %1286 = vmatprep.subr.bf16.mxu1 %v1373_v29  ;;  %888 = vmatprep.mubr.bf16.mxu0 %v1045_v35 }
  0x3f   :  { %953 = vmatprep.mubr.bf16.mxu1 %v1047_v40 }
  0x40   :  { %1247 = vmatpush3.bf16.msra.mxu0 %v1374_v30  ;;  %v1705_v30 = vld [vmem:[%s1767_s2] ss:$0 sm:$0xff] }
  0x41   :  { %1287 = vmatpush3.bf16.msra.mxu1 %v1375_v31 }
  0x43   :  { %889 = vmatmul.mubr.bf16.vlgmr.msra.gmra.mxu0 %v1044_v34 }
  0x44   :  { %954 = vmatmul.mubr.bf16.vlgmr.msra.gmra.mxu1 %v1046_v39  ;;  %896 = vmatprep.mubr.bf16.mxu0 %v1053_v44 }
  0x45   :  { %961 = vmatprep.mubr.bf16.mxu1 %v1055_v45 }
  0x4b   :  { %897 = vmatmul.mubr.bf16.gmra.mxu0 %v1052_v50 }
  0x4c   :  { %962 = vmatmul.mubr.bf16.gmra.mxu1 %v1054_v51  ;;  %904 = vmatprep.mubr.bf16.mxu0 %v1061_v52 }
  0x4d   :  { %969 = vmatprep.mubr.bf16.mxu1 %v1063_v53 }
  0x53   :  { %905 = vmatmul.mubr.bf16.gmra.mxu0 %v1060_v58 }
  0x54   :  { %970 = vmatmul.mubr.bf16.gmra.mxu1 %v1062_v59  ;;  %912 = vmatprep.mubr.bf16.mxu0 %v1069_v60 }
  0x55   :  { %977 = vmatprep.mubr.bf16.mxu1 %v1071_v61 }
  0x5b   :  { %913 = vmatmul.mubr.bf16.gmra.mxu0 %v1068_v62 }
  0x5c   :  { %978 = vmatmul.mubr.bf16.gmra.mxu1 %v1070_v63 }
  0xe3   :  { %v1168_v0 = vpop.f32.mrf.mxu0 }
  0xe4   :  { %v1208_v1 = vpop.f32.mrf.mxu1 }
  0xe5   :  { %v1169_v2 = vpop.f32.mrf.mxu0 }
  0xe6   :  { %v1209_v3 = vpop.f32.mrf.mxu1  ;;  %v1170_v28 = vadd.f32 %v1169_v2, %v1168_v0 }
  0xe7   :  { %v1171_v4 = vpop.f32.mrf.mxu0  ;;  %v1210_v37 = vadd.f32 %v1209_v3, %v1208_v1 }
  0xe8   :  { %v1211_v5 = vpop.f32.mrf.mxu1  ;;  %v761_v34 = vadd.f32 %v1170_v28, %v1705_v30 }
  0xe9   :  { %v1172_v6 = vpop.f32.mrf.mxu0 }
  0xea   :  { %v1212_v7 = vpop.f32.mrf.mxu1  ;;  %v1173_v35 = vadd.f32 %v1172_v6, %v1171_v4  ;;  %v826_v41 = vadd.f32 %v1210_v37, %v761_v34 }
  0xeb   :  { %v1174_v8 = vpop.f32.mrf.mxu0  ;;  %v1213_v46 = vadd.f32 %v1212_v7, %v1211_v5 }
  0xec   :  { %v1214_v9 = vpop.f32.mrf.mxu1  ;;  %v764_v42 = vadd.f32 %v1173_v35, %v1705_v30 }
  0xed   :  { %v1175_v10 = vpop.f32.mrf.mxu0 }
  0xee   :  { %v1215_v11 = vpop.f32.mrf.mxu1  ;;  %v1176_v39 = vadd.f32 %v1175_v10, %v1174_v8  ;;  %v829_v53 = vadd.f32 %v1213_v46, %v764_v42 }
  0xef   :  { %v1177_v12 = vpop.f32.mrf.mxu0  ;;  %v1216_v57 = vadd.f32 %v1215_v11, %v1214_v9 }
  0xf0   :  { %v1217_v13 = vpop.f32.mrf.mxu1  ;;  %v769_v50 = vadd.f32 %v1176_v39, %v1705_v30 }
  0xf1   :  { %v1178_v14 = vpop.f32.mrf.mxu0 }
  0xf2   :  { %v1218_v15 = vpop.f32.mrf.mxu1  ;;  %v1179_v51 = vadd.f32 %v1178_v14, %v1177_v12  ;;  %v834_v63 = vadd.f32 %v1216_v57, %v769_v50 }
  0xf3   :  { %v1180_v16 = vpop.f32.mrf.mxu0  ;;  %v1219_v7 = vadd.f32 %v1218_v15, %v1217_v13 }
  0xf4   :  { %v1684_v17 = vpop.f32.mrf.mxu1  ;;  %v772_v0 = vadd.f32 %v1179_v51, %v1705_v30 }
  0xf5   :  { %v1181_v18 = vpop.f32.mrf.mxu0 }
  0xf6   :  { %v1686_v19 = vpop.f32.mrf.mxu1  ;;  %v1182_v2 = vadd.f32 %v1181_v18, %v1180_v16  ;;  %v837_v14 = vadd.f32 %v1219_v7, %v772_v0 }
  0xf7   :  { %v1183_v20 = vpop.f32.mrf.mxu0  ;;  %v1222_v15 = vadd.f32 %v1686_v19, %v1684_v17 }
  0xf8   :  { %v1688_v21 = vpop.f32.mrf.mxu1  ;;  %v777_v16 = vadd.f32 %v1182_v2, %v1705_v30 }
  0xf9   :  { %v1184_v22 = vpop.f32.mrf.mxu0 }
  0xfa   :  { %v1690_v23 = vpop.f32.mrf.mxu1  ;;  %v1185_v28 = vadd.f32 %v1184_v22, %v1183_v20 }
  0xfb   :  { %v1692_v24 = vpop.f32.mrf.mxu0  ;;  %v1225_v19 = vadd.f32 %v1690_v23, %v1688_v21 }
  0xfc   :  { %v1694_v25 = vpop.f32.mrf.mxu1  ;;  %v780_v22 = vadd.f32 %v1185_v28, %v1705_v30 }
  0xfd   :  { %v1696_v26 = vpop.f32.mrf.mxu0 }
  0xfe   :  { %v1698_v27 = vpop.f32.mrf.mxu1 }
  0xff   :  { %v1700_v29 = vpop.f32.mrf.mxu0 }
 0x100   :  { %v1707_v31 = vpop.f32.mrf.mxu1 }
 0x101   :  { %v1709_v32 = vpop.f32.mrf.mxu0 }
 0x102   :  { %v1711_v33 = vpop.f32.mrf.mxu1 }
 0x103   :  { %v1248_v36 = vpop.f32.mrf.mxu0 }
 0x104   :  { %v1288_v38 = vpop.f32.mrf.mxu1 }
 0x105   :  { %v1249_v40 = vpop.f32.mrf.mxu0 }
 0x106   :  { %v1250_v43 = vadd.f32 %v1249_v40, %v1248_v36  ;;  %v1289_v44 = vpop.f32.mrf.mxu1 }
 0x107   :  { %v1251_v45 = vpop.f32.mrf.mxu0  ;;  %v1290_v48 = vadd.f32 %v1289_v44, %v1288_v38 }
 0x108   :  { %v891_v47 = vadd.f32 %v1250_v43, %v826_v41  ;;  %v1291_v49 = vpop.f32.mrf.mxu1  ;;  %v1188_v41 = vadd.f32 %v1696_v26, %v1692_v24  ;;  %v842_v43 = vadd.f32 %v1222_v15, %v777_v16  ;;  %v845_v24 = vadd.f32 %v1225_v19, %v780_v22 }
 0x109   :  { %v1252_v52 = vpop.f32.mrf.mxu0 }
 0x10a   :  { %v956_v54 = vadd.f32 %v1290_v48, %v891_v47  ;;  %v1253_v55 = vadd.f32 %v1252_v52, %v1251_v45  ;;  %v1292_v56 = vpop.f32.mrf.mxu1  ;;  %v785_v26 = vadd.f32 %v1188_v41, %v1705_v30 }
 0x10b   :  { %v1254_v58 = vpop.f32.mrf.mxu0  ;;  %v1293_v61 = vadd.f32 %v1292_v56, %v1291_v49  ;;  %v1228_v56 = vadd.f32 %v1698_v27, %v1694_v25  ;;  %v1231_v25 = vadd.f32 %v1711_v33, %v1707_v31 }
 0x10c   :  { %v986_v59 = vmax.f32 %v956_v54, 0.0  ;;  %v894_v60 = vadd.f32 %v1253_v55, %v829_v53  ;;  %v1294_v62 = vpop.f32.mrf.mxu1  ;;  %v1191_v53 = vadd.f32 %v1709_v32, %v1700_v29 }
 0x10d   :  { %v1255_v1 = vpop.f32.mrf.mxu0 }
 0x10e   :  { %v1144_v3 = vpack.c.bf16 %v986_v59, %v986_v59  ;;  %v959_v4 = vadd.f32 %v1293_v61, %v894_v60  ;;  %v1256_v5 = vadd.f32 %v1255_v1, %v1254_v58  ;;  %v1295_v6 = vpop.f32.mrf.mxu1  ;;  %v788_v29 = vadd.f32 %v1191_v53, %v1705_v30 }
 0x10f   :  { %v1257_v8 = vpop.f32.mrf.mxu0  ;;  %v1296_v11 = vadd.f32 %v1295_v6, %v1294_v62  ;;  %v850_v62 = vadd.f32 %v1228_v56, %v785_v26 }
 0x110   :  { %1027 = vst.msk [vmem:[%s1768_s3] sm:$0xf] %vm1026_vm0, %v1144_v3  ;;  %v987_v9 = vmax.f32 %v959_v4, 0.0  ;;  %v899_v10 = vadd.f32 %v1256_v5, %v834_v63  ;;  %v1297_v12 = vpop.f32.mrf.mxu1 }
 0x111   :  { %v1258_v34 = vpop.f32.mrf.mxu0 }
 0x112   :  { %v1145_v18 = vpack.c.bf16 %v987_v9, %v987_v9  ;;  %v964_v35 = vadd.f32 %v1296_v11, %v899_v10  ;;  %v1259_v36 = vadd.f32 %v1258_v34, %v1257_v8  ;;  %v1298_v37 = vpop.f32.mrf.mxu1  ;;  %v853_v8 = vadd.f32 %v1231_v25, %v788_v29 }
 0x113   :  { %v1260_v13 = vpop.f32.mrf.mxu0  ;;  %v1299_v40 = vadd.f32 %v1298_v37, %v1297_v12 }
 0x114   :  { %1028 = vst.msk [vmem:[%s1768_s3 + $0x4] sm:$0xf] %vm1026_vm0, %v1145_v18  ;;  %v988_v38 = vmax.f32 %v964_v35, 0.0  ;;  %v902_v39 = vadd.f32 %v1259_v36, %v837_v14  ;;  %v1300_v20 = vpop.f32.mrf.mxu1 }
 0x115   :  { %v1261_v42 = vpop.f32.mrf.mxu0 }
 0x116   :  { %v1146_v44 = vpack.c.bf16 %v988_v38, %v988_v38  ;;  %v967_v45 = vadd.f32 %v1299_v40, %v902_v39  ;;  %v1262_v46 = vadd.f32 %v1261_v42, %v1260_v13  ;;  %v1301_v17 = vpop.f32.mrf.mxu1 }
 0x117   :  { %v1263_v47 = vpop.f32.mrf.mxu0  ;;  %v1302_v50 = vadd.f32 %v1301_v17, %v1300_v20 }
 0x118   :  { %1029 = vst.msk [vmem:[%s1768_s3 + $0x8] sm:$0xf] %vm1026_vm0, %v1146_v44  ;;  %v989_v48 = vmax.f32 %v967_v45, 0.0  ;;  %v907_v49 = vadd.f32 %v1262_v46, %v842_v43  ;;  %v1303_v51 = vpop.f32.mrf.mxu1 }
 0x119   :  { %v1264_v52 = vpop.f32.mrf.mxu0 }
 0x11a   :  { %v1147_v54 = vpack.c.bf16 %v989_v48, %v989_v48  ;;  %v972_v55 = vadd.f32 %v1302_v50, %v907_v49  ;;  %v1265_v21 = vadd.f32 %v1264_v52, %v1263_v47  ;;  %v1304_v23 = vpop.f32.mrf.mxu1 }
 0x11b   :  { %v1266_v57 = vpop.f32.mrf.mxu0  ;;  %v1305_v60 = vadd.f32 %v1304_v23, %v1303_v51 }
 0x11c   :  { %1030 = vst.msk [vmem:[%s1768_s3 + $0xc] sm:$0xf] %vm1026_vm0, %v1147_v54  ;;  %v990_v58 = vmax.f32 %v972_v55, 0.0  ;;  %v910_v59 = vadd.f32 %v1265_v21, %v845_v24  ;;  %v1306_v61 = vpop.f32.mrf.mxu1 }
 0x11d   :  { %v1267_v63 = vpop.f32.mrf.mxu0 }
 0x11e   :  { %v1148_v32 = vpack.c.bf16 %v990_v58, %v990_v58  ;;  %v975_v0 = vadd.f32 %v1305_v60, %v910_v59  ;;  %v1268_v1 = vadd.f32 %v1267_v63, %v1266_v57  ;;  %v1307_v2 = vpop.f32.mrf.mxu1 }
 0x11f   :  { %v1269_v3 = vpop.f32.mrf.mxu0  ;;  %v1308_v5 = vadd.f32 %v1307_v2, %v1306_v61 }
 0x120   :  { %1031 = vst.msk [vmem:[%s1768_s3 + $0x10] sm:$0xf] %vm1026_vm0, %v1148_v32  ;;  %v991_v27 = vmax.f32 %v975_v0, 0.0  ;;  %v915_v4 = vadd.f32 %v1268_v1, %v850_v62  ;;  %v1309_v6 = vpop.f32.mrf.mxu1 }
 0x121   :  { %v1270_v7 = vpop.f32.mrf.mxu0 }
 0x122   :  { %v1149_v30 = vpack.c.bf16 %v991_v27, %v991_v27  ;;  %v980_v9 = vadd.f32 %v1308_v5, %v915_v4  ;;  %v1271_v10 = vadd.f32 %v1270_v7, %v1269_v3  ;;  %v1310_v11 = vpop.f32.mrf.mxu1 }
 0x123   :  { %v1311_v12 = vadd.f32 %v1310_v11, %v1309_v6 }
 0x124   :  { %1032 = vst.msk [vmem:[%s1768_s3 + $0x14] sm:$0xf] %vm1026_vm0, %v1149_v30  ;;  %v992_v31 = vmax.f32 %v980_v9, 0.0  ;;  %v918_v33 = vadd.f32 %v1271_v10, %v853_v8 }
 0x126   :  { %v1150_v14 = vpack.c.bf16 %v992_v31, %v992_v31  ;;  %v983_v28 = vadd.f32 %v1311_v12, %v918_v33 }
 0x128   :  { %1033 = vst.msk [vmem:[%s1768_s3 + $0x18] sm:$0xf] %vm1026_vm0, %v1150_v14  ;;  %v993_v34 = vmax.f32 %v983_v28, 0.0 }
 0x12a   :  { %v1151_v16 = vpack.c.bf16 %v993_v34, %v993_v34 }
 0x12c   :  { %1034 = vst.msk [vmem:[%s1768_s3 + $0x1c] sm:$0xf] %vm1026_vm0, %v1151_v16 }

// kernel: vae_forward.10
= control target key start
LH: loop header
LB: loop body
LE: loop exit
PB: predicated region body
PF: predicated region fallthrough
CT: control target
= control target key end

     0   :  { %vm2014_vm0 = vmmov 0   ;;  %vm799_vm1 = vcmask 523264   ;;  %vm1027_vm2 = vcmask 74752   ;;  %vm844_vm3 = vcmask 64512   ;;  %s2508_s1 = inlined_call_operand.vmem [shape: bf16[1024,64], index: 1, kind: input, shape index: {}]   ;;  %s2509_s0 = inlined_call_operand.vmem [shape: bf16[8,1024], index: 0, kind: input, shape index: {}]   ;;  %s2510_s3 = inlined_call_operand.vmem [shape: bf16[64,9], index: 3, kind: input, shape index: {}]   ;;  %s2511_s6 = inlined_call_operand.vmem [shape: bf16[64,10], index: 6, kind: input, shape index: {}]   ;;  %s2512_s5 = inlined_call_operand.vmem [shape: bf16[64,10], index: 5, kind: input, shape index: {}]   ;;  %s2513_s2 = inlined_call_operand.vmem [shape: f32[1,64], index: 2, kind: input, shape index: {}]   ;;  %s2514_s7 = inlined_call_operand.vmem [shape: f32[1,10], index: 7, kind: input, shape index: {}]   ;;  %s2515_s4 = inlined_call_operand.vmem [shape: f32[1,9], index: 4, kind: input, shape index: {}]   ;;  %s2516_s8 = inlined_call_operand.vmem [shape: f32[2,10], index: 8, kind: input, shape index: {}]   ;;  %s2517_s13 = inlined_call_operand.vmem [shape: f32[8,19], index: 13, kind: output, shape index: {0}]   ;;  %s2518_s9 = inlined_call_operand.vmem [shape: bf16[18,64], index: 9, kind: input, shape index: {}]   ;;  %s2519_s11 = inlined_call_operand.vmem [shape: bf16[64,1024], index: 11, kind: input, shape index: {}]   ;;  %s2520_s10 = inlined_call_operand.vmem [shape: f32[1,64], index: 10, kind: input, shape index: {}]   ;;  %s2521_s12 = inlined_call_operand.vmem [shape: f32[1,1024], index: 12, kind: input, shape index: {}]   ;;  %s2522_s14 = inlined_call_operand.vmem [shape: bf16[8,1024], index: 14, kind: output, shape index: {1}]  }
   0x1   :  { %v1907_v0 = vld [vmem:[%s2508_s1 + $0x78] sm:$0xff]   ;;  %v1911_v4 = vld [vmem:[%s2508_s1 + $0x70] sm:$0xff]   ;;  %v1915_v8 = vld [vmem:[%s2508_s1 + $0x68] sm:$0xff]   ;;  %vm1068_vm4 = vcmask 1041408   ;;  %vm1070_vm5 = vcmask 1043456   ;;  %vm1082_vm8 = vcmask 72704  }
   0x2   :  { %v1908_v1 = vld [vmem:[%s2508_s1 + $0xf8] sm:$0xff]   ;;  %1752 = vmatprep.subr.bf16.mxu0 %v1907_v0  ;;  %v1912_v5 = vld [vmem:[%s2508_s1 + $0xf0] sm:$0xff]   ;;  %v1916_v9 = vld [vmem:[%s2508_s1 + $0xe8] sm:$0xff]   ;;  %vm1084_vm9 = vcmask 154624   ;;  %vm1115_vm10 = vcmask 1040384   ;;  %vm1111_vm11 = vcmask 146432  }
   0x3   :  { %v1909_v2 = vld [vmem:[%s2508_s1 + $0x38] sm:$0xff]   ;;  %1774 = vmatprep.subr.bf16.mxu1 %v1908_v1  ;;  %v1913_v6 = vld [vmem:[%s2508_s1 + $0x30] sm:$0xff]   ;;  %v1917_v10 = vld [vmem:[%s2508_s1 + $0x28] sm:$0xff]  }
   0x4   :  { %v1910_v3 = vld [vmem:[%s2508_s1 + $0xb8] sm:$0xff]   ;;  %1753 = vmatpush3.bf16.msra.mxu0 %v1909_v2  ;;  %v1914_v7 = vld [vmem:[%s2508_s1 + $0xb0] sm:$0xff]   ;;  %v1918_v11 = vld [vmem:[%s2508_s1 + $0xa8] sm:$0xff]  }
   0x5   :  { %1775 = vmatpush3.bf16.msra.mxu1 %v1910_v3  ;;  %1754 = vmatprep.subr.bf16.mxu0 %v1911_v4  ;;  %v1919_v12 = vld [vmem:[%s2508_s1 + $0x60] sm:$0xff]   ;;  %v1923_v16 = vld [vmem:[%s2508_s1 + $0x58] sm:$0xff]   ;;  %v1927_v20 = vld [vmem:[%s2508_s1 + $0x50] sm:$0xff]  }
   0x6   :  { %1776 = vmatprep.subr.bf16.mxu1 %v1912_v5  ;;  %v1920_v13 = vld [vmem:[%s2508_s1 + $0xe0] sm:$0xff]   ;;  %v1924_v17 = vld [vmem:[%s2508_s1 + $0xd8] sm:$0xff]   ;;  %v1928_v21 = vld [vmem:[%s2508_s1 + $0xd0] sm:$0xff]  }
   0x7   :  { %v1921_v14 = vld [vmem:[%s2508_s1 + $0x20] sm:$0xff]   ;;  %v1925_v18 = vld [vmem:[%s2508_s1 + $0x18] sm:$0xff]   ;;  %v1929_v22 = vld [vmem:[%s2508_s1 + $0x10] sm:$0xff]  }
   0x8   :  { %1755 = vmatpush3.bf16.msra.mxu0 %v1913_v6  ;;  %v1922_v15 = vld [vmem:[%s2508_s1 + $0xa0] sm:$0xff]   ;;  %v1926_v19 = vld [vmem:[%s2508_s1 + $0x98] sm:$0xff]   ;;  %v1930_v23 = vld [vmem:[%s2508_s1 + $0x90] sm:$0xff]  }
   0x9   :  { %1777 = vmatpush3.bf16.msra.mxu1 %v1914_v7  ;;  %1756 = vmatprep.subr.bf16.mxu0 %v1915_v8  ;;  %v1931_v24 = vld [vmem:[%s2508_s1 + $0x48] sm:$0xff]   ;;  %v1935_v28 = vld [vmem:[%s2508_s1 + $0x40] sm:$0xff]   ;;  %v1943_v38 = vld [vmem:[%s2508_s1 + $0x178] sm:$0xff]  }
   0xa   :  { %1778 = vmatprep.subr.bf16.mxu1 %v1916_v9  ;;  %v1932_v25 = vld [vmem:[%s2508_s1 + $0xc8] sm:$0xff]   ;;  %v1936_v29 = vld [vmem:[%s2508_s1 + $0xc0] sm:$0xff]   ;;  %v1944_v39 = vld [vmem:[%s2508_s1 + $0x1f8] sm:$0xff]  }
   0xb   :  { %v1933_v26 = vld [vmem:[%s2508_s1 + $0x8] sm:$0xff]   ;;  %v1937_v30 = vld [vmem:[%s2508_s1] sm:$0xff]   ;;  %v1945_v40 = vld [vmem:[%s2508_s1 + $0x138] sm:$0xff]  }
   0xc   :  { %1757 = vmatpush3.bf16.msra.mxu0 %v1917_v10  ;;  %v1934_v27 = vld [vmem:[%s2508_s1 + $0x88] sm:$0xff]   ;;  %v1938_v31 = vld [vmem:[%s2508_s1 + $0x80] sm:$0xff]   ;;  %v1946_v41 = vld [vmem:[%s2508_s1 + $0x1b8] sm:$0xff]  }
   0xd   :  { %1779 = vmatpush3.bf16.msra.mxu1 %v1918_v11  ;;  %1758 = vmatprep.subr.bf16.mxu0 %v1919_v12  ;;  %v47_v32 = vld [vmem:[%s2509_s0] sm:$0xff]  ;;  %v48_v33 = vld [vmem:[%s2509_s0 + $0x8] sm:$0xff]  ;;  %v1947_v42 = vld [vmem:[%s2508_s1 + $0x170] sm:$0xff]   ;;  %v2013_v12 = vmov 0.0  }
   0xe   :  { %1780 = vmatprep.subr.bf16.mxu1 %v1920_v13  ;;  %v1615_v34 = vcombine.low %v47_v32, %v47_v32  ;;  %v1616_v35 = vcombine.high %v47_v32, %v47_v32  ;;  %v1617_v36 = vcombine.low %v48_v33, %v48_v33  ;;  %v1618_v37 = vcombine.high %v48_v33, %v48_v33  ;;  %v1948_v43 = vld [vmem:[%s2508_s1 + $0x1f0] sm:$0xff]   ;;  %v1951_v46 = vld [vmem:[%s2508_s1 + $0x168] sm:$0xff]   ;;  %v1955_v50 = vld [vmem:[%s2508_s1 + $0x160] sm:$0xff]  }
   0xf   :  { %v1949_v44 = vld [vmem:[%s2508_s1 + $0x130] sm:$0xff]   ;;  %v1952_v47 = vld [vmem:[%s2508_s1 + $0x1e8] sm:$0xff]   ;;  %v1956_v51 = vld [vmem:[%s2508_s1 + $0x1e0] sm:$0xff]  }
  0x10   :  { %1759 = vmatpush3.bf16.msra.mxu0 %v1921_v14  ;;  %630 = vmatprep.mubr.bf16.mxu0 %v1616_v35  ;;  %v1950_v45 = vld [vmem:[%s2508_s1 + $0x1b0] sm:$0xff]   ;;  %v1953_v48 = vld [vmem:[%s2508_s1 + $0x128] sm:$0xff]   ;;  %v1957_v52 = vld [vmem:[%s2508_s1 + $0x120] sm:$0xff]  }
  0x11   :  { %1781 = vmatpush3.bf16.msra.mxu1 %v1922_v15  ;;  %1760 = vmatprep.subr.bf16.mxu0 %v1923_v16  ;;  %v1954_v49 = vld [vmem:[%s2508_s1 + $0x1a8] sm:$0xff]   ;;  %v1958_v53 = vld [vmem:[%s2508_s1 + $0x1a0] sm:$0xff]   ;;  %v1959_v54 = vld [vmem:[%s2508_s1 + $0x158] sm:$0xff]  }
  0x12   :  { %1782 = vmatprep.subr.bf16.mxu1 %v1924_v17  ;;  %670 = vmatprep.mubr.bf16.mxu1 %v1618_v37  ;;  %v1960_v55 = vld [vmem:[%s2508_s1 + $0x1d8] sm:$0xff]   ;;  %v1963_v58 = vld [vmem:[%s2508_s1 + $0x150] sm:$0xff]   ;;  %v1967_v62 = vld [vmem:[%s2508_s1 + $0x148] sm:$0xff]  }
  0x13   :  { %v1961_v56 = vld [vmem:[%s2508_s1 + $0x118] sm:$0xff]   ;;  %v1964_v59 = vld [vmem:[%s2508_s1 + $0x1d0] sm:$0xff]   ;;  %v1968_v63 = vld [vmem:[%s2508_s1 + $0x1c8] sm:$0xff]  }
  0x14   :  { %1761 = vmatpush3.bf16.msra.mxu0 %v1925_v18  ;;  %v1962_v57 = vld [vmem:[%s2508_s1 + $0x198] sm:$0xff]   ;;  %v1965_v60 = vld [vmem:[%s2508_s1 + $0x110] sm:$0xff]   ;;  %v1969_v0 = vld [vmem:[%s2508_s1 + $0x108] sm:$0xff]  }
  0x15   :  { %1783 = vmatpush3.bf16.msra.mxu1 %v1926_v19  ;;  %1762 = vmatprep.subr.bf16.mxu0 %v1927_v20  ;;  %v1966_v61 = vld [vmem:[%s2508_s1 + $0x190] sm:$0xff]   ;;  %v1970_v1 = vld [vmem:[%s2508_s1 + $0x188] sm:$0xff]   ;;  %v1971_v2 = vld [vmem:[%s2508_s1 + $0x140] sm:$0xff]  }
  0x16   :  { %1784 = vmatprep.subr.bf16.mxu1 %v1928_v21  ;;  %v1972_v3 = vld [vmem:[%s2508_s1 + $0x1c0] sm:$0xff]   ;;  %v49_v6 = vld [vmem:[%s2509_s0 + $0x10] sm:$0xff]  ;;  %v50_v9 = vld [vmem:[%s2509_s0 + $0x18] sm:$0xff] }
  0x17   :  { %v1973_v4 = vld [vmem:[%s2508_s1 + $0x100] sm:$0xff]   ;;  %v1619_v7 = vcombine.low %v49_v6, %v49_v6  ;;  %v1620_v8 = vcombine.high %v49_v6, %v49_v6  ;;  %v1621_v10 = vcombine.low %v50_v9, %v50_v9  ;;  %v1622_v11 = vcombine.high %v50_v9, %v50_v9  ;;  %v1979_v13 = vld [vmem:[%s2510_s3 + $0x18] sm:$0xff]   ;;  %v1981_v15 = vld [vmem:[%s2510_s3 + $0x10] sm:$0xff]  }
  0x18   :  { %1763 = vmatpush3.bf16.msra.mxu0 %v1929_v22  ;;  %v1974_v5 = vld [vmem:[%s2508_s1 + $0x180] sm:$0xff]   ;;  %v1980_v14 = vld [vmem:[%s2511_s6 + $0x18] sm:$0xff]   ;;  %v1982_v16 = vld [vmem:[%s2511_s6 + $0x10] sm:$0xff]  }
  0x19   :  { %1785 = vmatpush3.bf16.msra.mxu1 %v1930_v23  ;;  %1764 = vmatprep.subr.bf16.mxu0 %v1931_v24  ;;  %v1983_v17 = vld [vmem:[%s2510_s3 + $0x8] sm:$0xff]   ;;  %v1985_v19 = vld [vmem:[%s2510_s3] sm:$0xff]  }
  0x1a   :  { %1786 = vmatprep.subr.bf16.mxu1 %v1932_v25  ;;  %v1984_v18 = vld [vmem:[%s2511_s6 + $0x8] sm:$0xff]   ;;  %v1986_v20 = vld [vmem:[%s2511_s6] sm:$0xff]  }
  0x1c   :  { %1765 = vmatpush3.bf16.msra.mxu0 %v1933_v26 }
  0x1d   :  { %1787 = vmatpush3.bf16.msra.mxu1 %v1934_v27  ;;  %1766 = vmatprep.subr.bf16.mxu0 %v1935_v28 }
  0x1e   :  { %1788 = vmatprep.subr.bf16.mxu1 %v1936_v29 }
  0x20   :  { %1767 = vmatpush3.bf16.msra.mxu0 %v1937_v30  ;;  %v1614_v30 = vld [vmem:[%s2513_s2] ss:$0 sm:$0xff] }
  0x21   :  { %1789 = vmatpush3.bf16.msra.mxu1 %v1938_v31  ;;  %1796 = vmatprep.subr.bf16.mxu0 %v1943_v38 }
  0x22   :  { %1818 = vmatprep.subr.bf16.mxu1 %v1944_v39 }
  0x23   :  { %631 = vmatmul.mubr.bf16.vlgmr.msra.gmra.mxu0 %v1615_v34 }
  0x24   :  { %671 = vmatmul.mubr.bf16.vlgmr.msra.gmra.mxu1 %v1617_v36  ;;  %1797 = vmatpush3.bf16.msra.mxu0 %v1945_v40 }
  0x25   :  { %1819 = vmatpush3.bf16.msra.mxu1 %v1946_v41  ;;  %1798 = vmatprep.subr.bf16.mxu0 %v1947_v42 }
  0x26   :  { %1820 = vmatprep.subr.bf16.mxu1 %v1948_v43  ;;  %710 = vmatprep.mubr.bf16.mxu0 %v1620_v8  ;;  %v1687_v8 = vld [vmem:[%s2515_s4] ss:$0 sm:$0xff]  ;;  %s2015_s4 = smov 9  }
  0x27   :  { %750 = vmatprep.mubr.bf16.mxu1 %v1622_v11 }
  0x28   :  { %1799 = vmatpush3.bf16.msra.mxu0 %v1949_v44 }
  0x29   :  { %1821 = vmatpush3.bf16.msra.mxu1 %v1950_v45  ;;  %1800 = vmatprep.subr.bf16.mxu0 %v1951_v46 }
  0x2a   :  { %1822 = vmatprep.subr.bf16.mxu1 %v1952_v47  ;;  %v1987_v47 = vld [vmem:[%s2512_s5 + $0x18] sm:$0xff]  }
  0x2c   :  { %1801 = vmatpush3.bf16.msra.mxu0 %v1953_v48 }
  0x2d   :  { %1823 = vmatpush3.bf16.msra.mxu1 %v1954_v49  ;;  %1802 = vmatprep.subr.bf16.mxu0 %v1955_v50  ;;  %v1988_v50 = vld [vmem:[%s2512_s5 + $0x10] sm:$0xff]  }
  0x2e   :  { %1824 = vmatprep.subr.bf16.mxu1 %v1956_v51  ;;  %v1989_v51 = vld [vmem:[%s2512_s5 + $0x8] sm:$0xff]  }
  0x30   :  { %1803 = vmatpush3.bf16.msra.mxu0 %v1957_v52  ;;  %v1990_v52 = vld [vmem:[%s2512_s5] sm:$0xff]   ;;  %s2016_s5 = smov 8  }
  0x31   :  { %1825 = vmatpush3.bf16.msra.mxu1 %v1958_v53  ;;  %1804 = vmatprep.subr.bf16.mxu0 %v1959_v54 }
  0x32   :  { %1826 = vmatprep.subr.bf16.mxu1 %v1960_v55 }
  0x34   :  { %1805 = vmatpush3.bf16.msra.mxu0 %v1961_v56 }
  0x35   :  { %1827 = vmatpush3.bf16.msra.mxu1 %v1962_v57  ;;  %1806 = vmatprep.subr.bf16.mxu0 %v1963_v58 }
  0x36   :  { %1828 = vmatprep.subr.bf16.mxu1 %v1964_v59 }
  0x38   :  { %1807 = vmatpush3.bf16.msra.mxu0 %v1965_v60 }
  0x39   :  { %1829 = vmatpush3.bf16.msra.mxu1 %v1966_v61  ;;  %1808 = vmatprep.subr.bf16.mxu0 %v1967_v62  ;;  %v1703_v62 = vld [vmem:[%s2514_s7] ss:$0 sm:$0xff] }
  0x3a   :  { %1830 = vmatprep.subr.bf16.mxu1 %v1968_v63 }
  0x3c   :  { %1809 = vmatpush3.bf16.msra.mxu0 %v1969_v0 }
  0x3d   :  { %1831 = vmatpush3.bf16.msra.mxu1 %v1970_v1  ;;  %1810 = vmatprep.subr.bf16.mxu0 %v1971_v2 }
  0x3e   :  { %1832 = vmatprep.subr.bf16.mxu1 %v1972_v3 }
  0x40   :  { %1811 = vmatpush3.bf16.msra.mxu0 %v1973_v4 }
  0x41   :  { %1833 = vmatpush3.bf16.msra.mxu1 %v1974_v5  ;;  %1858 = vmatprep.subr.bf16.mxu0 %v2013_v12 }
  0x42   :  { %1870 = vmatprep.subr.bf16.mxu1 %v2013_v12 }
  0x43   :  { %711 = vmatmul.mubr.bf16.vlgmr.msra.gmra.mxu0 %v1619_v7 }
  0x44   :  { %751 = vmatmul.mubr.bf16.vlgmr.msra.gmra.mxu1 %v1621_v10  ;;  %1859 = vmatpush3.bf16.msra.mxu0 %v1979_v13 }
  0x45   :  { %1860 = vmatprep.subr.bf16.mxu0 %v2013_v12  ;;  %1871 = vmatpush3.bf16.msra.mxu1 %v1980_v14 }
  0x46   :  { %1872 = vmatprep.subr.bf16.mxu1 %v2013_v12  ;;  %1866 = vmatprep.mubr.msk.bf16.mxu0 %vm2014_vm0, %v2013_v12 }
  0x47   :  { %1878 = vmatprep.mubr.msk.bf16.mxu1 %vm2014_vm0, %v2013_v12 }
  0x48   :  { %1861 = vmatpush3.bf16.msra.mxu0 %v1981_v15  ;;  %v1039_v15 = vld [vmem:[%s2516_s8] sm:$0x3] }
  0x49   :  { %1862 = vmatprep.subr.bf16.mxu0 %v2013_v12  ;;  %1873 = vmatpush3.bf16.msra.mxu1 %v1982_v16  ;;  %v1040_v16 = vadd.f32 1e-12, %v1039_v15 }
  0x4a   :  { %1874 = vmatprep.subr.bf16.mxu1 %v2013_v12 }
  0x4c   :  { %1863 = vmatpush3.bf16.msra.mxu0 %v1983_v17 }
  0x4d   :  { %1864 = vmatprep.subr.bf16.mxu0 %v2013_v12  ;;  %1875 = vmatpush3.bf16.msra.mxu1 %v1984_v18 }
  0x4e   :  { %1876 = vmatprep.subr.bf16.mxu1 %v2013_v12 }
  0x50   :  { %1865 = vmatpush3.bf16.msra.mxu0 %v1985_v19 }
  0x51   :  { %1882 = vmatprep.subr.bf16.mxu0 %v2013_v12  ;;  %1877 = vmatpush3.bf16.msra.mxu1 %v1986_v20 }
  0x52   :  { %1894 = vmatprep.subr.bf16.mxu1 %v2013_v12 }
  0xe3   :  { %v1768_v21 = vpop.f32.mrf.mxu0 }
  0xe4   :  { %v1790_v22 = vpop.f32.mrf.mxu1 }
  0xe5   :  { %v1769_v23 = vpop.f32.mrf.mxu0 }
  0xe6   :  { %v1791_v24 = vpop.f32.mrf.mxu1  ;;  %v1770_v29 = vadd.f32 %v1769_v23, %v1768_v21 }
  0xe7   :  { %v1771_v25 = vpop.f32.mrf.mxu0  ;;  %v1792_v32 = vadd.f32 %v1791_v24, %v1790_v22 }
  0xe8   :  { %v1793_v26 = vpop.f32.mrf.mxu1  ;;  %v633_v31 = vadd.f32 %v1770_v29, %v1614_v30 }
  0xe9   :  { %v1772_v27 = vpop.f32.mrf.mxu0 }
  0xea   :  { %v1794_v28 = vpop.f32.mrf.mxu1  ;;  %v673_v37 = vadd.f32 %v1792_v32, %v633_v31 }
 0x103   :  { %v1812_v33 = vpop.f32.mrf.mxu0 }
 0x104   :  { %v1834_v34 = vpop.f32.mrf.mxu1 }
 0x105   :  { %v1813_v35 = vpop.f32.mrf.mxu0 }
 0x106   :  { %v1835_v36 = vpop.f32.mrf.mxu1  ;;  %v1814_v38 = vadd.f32 %v1813_v35, %v1812_v33 }
 0x107   :  { %v1815_v39 = vpop.f32.mrf.mxu0  ;;  %v1836_v42 = vadd.f32 %v1835_v36, %v1834_v34 }
 0x108   :  { %v1837_v40 = vpop.f32.mrf.mxu1  ;;  %v713_v41 = vadd.f32 %v1814_v38, %v673_v37 }
 0x109   :  { %v1816_v43 = vpop.f32.mrf.mxu0 }
 0x10a   :  { %v1838_v44 = vpop.f32.mrf.mxu1  ;;  %v753_v45 = vadd.f32 %v1836_v42, %v713_v41 }
 0x10c   :  { %v758_v46 = vmax.f32 %v753_v45, 0.0 }
 0x10e   :  { %v759_v48 = vpack.c.bf16 %v758_v46, %v758_v46 }
 0x110   :  { %v887_v49 = vrot.slane %v759_v48, 1  ;;  %1867 = vmatmul.mubr.msk.bf16.vlgmr.msra.gmra.mxu0 %vm799_vm1, %v759_v48 }
 0x111   :  { %1883 = vmatpush3.bf16.msra.mxu0 %v1987_v47  ;;  %1890 = vmatprep.mubr.msk.bf16.mxu0 %vm2014_vm0, %v2013_v12 }
 0x112   :  { %1879 = vmatmul.mubr.msk.bf16.vlgmr.msra.gmra.mxu1 %vm799_vm1, %v887_v49  ;;  %1884 = vmatprep.subr.bf16.mxu0 %v2013_v12 }
 0x113   :  { %1898 = vmatprep.mubr.msk.bf16.mxu1 %vm2014_vm0, %v2013_v12 }
 0x115   :  { %1885 = vmatpush3.bf16.msra.mxu0 %v1988_v50 }
 0x116   :  { %1886 = vmatprep.subr.bf16.mxu0 %v2013_v12 }
 0x119   :  { %1887 = vmatpush3.bf16.msra.mxu0 %v1989_v51 }
 0x11a   :  { %1888 = vmatprep.subr.bf16.mxu0 %v2013_v12 }
 0x11d   :  { %1889 = vmatpush3.bf16.msra.mxu0 %v1990_v52 }
 0x120   :  { %1891 = vmatmul.mubr.msk.bf16.vlgmr.msra.gmra.mxu0 %vm799_vm1, %v759_v48 }
 0x1d0   :  { %v837_v53 = vpop.f32.mrf.mxu0 }
 0x1d1   :  { %v838_v9 = vadd.f32 %v1687_v8, %v837_v53 }
 0x1d2   :  { %v1868_v54 = vpop.f32.mrf.mxu0  ;;  %v949_v55 = vpop.f32.mrf.mxu1 }
 0x1d3   :  { %v843_v13 = vmul.f32 %v838_v9, %v838_v9  ;;  %v854_v36 = vand.u32 2147483647, %v838_v9  ;;  %v851_v50 = vmax.f32 %v838_v9, 0.0  ;;  %vm852_vm7 = vcmp.ne.f32.partialorder %v838_v9, %v838_v9 }
 0x1d4   :  { %v840_v56 = vpop.f32.mrf.mxu0  ;;  %v1880_v57 = vpop.f32.mrf.mxu1 }
 0x1d5   :  { %v845_v14 = vsel %vm844_vm3, %v843_v13, 0.0  ;;  %v855_v37 = vsub.f32 0.0, %v854_v36  ;;  %v1178_v13 = vld [vmem:[%s2519_s11 + $0x88] sm:$0xff]  ;;  %v1161_v36 = vld [vmem:[%s2519_s11] sm:$0xff] }
 0x1d6   :  { %v1869_v58 = vpop.f32.mrf.mxu0  ;;  %v952_v59 = vpop.f32.mrf.mxu1 }
 0x1d7   :  { %v856_v38 = vmul.f32 1.442695, %v855_v37  ;;  %v1165_v37 = vld [vmem:[%s2519_s11 + $0x20] sm:$0xff] }
 0x1d8   :  { %v1881_v60 = vpop.f32.mrf.mxu1 }
 0x1e0   :  { %v1013_v61 = vpop.f32.mrf.mxu0 }
 0x1e1   :  { %v1014_v63 = vadd.f32 %v1013_v61, %v949_v55 }
 0x1e2   :  { %v1892_v0 = vpop.f32.mrf.mxu0 }
 0x1e3   :  { %v1026_v1 = vadd.f32 %v1703_v62, %v1014_v63  ;;  %v1991_v0 = vld [vmem:[%s2518_s9 + $0x8] ss:$0 sps:$4 sm:$0x11]  }
 0x1e4   :  { %v1016_v2 = vpop.f32.mrf.mxu0 }
 0x1e5   :  { %v1028_v3 = vsel %vm1027_vm2, %v1026_v1, -inf  ;;  %v1992_v2 = vld [vmem:[%s2518_s9] sm:$0xff]  }
 0x1e6   :  { %1029 = vmax.xlane.f32.xlu0 %v1028_v3  ;;  %v1893_v4 = vpop.f32.mrf.mxu0 }
 0x1e7   :  { %v1185_v4 = vld [vmem:[%s2519_s11 + $0xc0] sm:$0xff] }
 0x26f   :  { %v1030_v5 = vpop.xlane.xlu0 %1029 }
 0x270   :  { %v1031_v6 = vsub.f32 %v1026_v1, %v1030_v5  ;;  %v1117_v1 = vsel %vm1115_vm10, %v1991_v0, 0  ;;  %v1189_v5 = vld [vmem:[%s2519_s11 + $0xe0] sm:$0xff] }
 0x271   :  { %1895 = vmatpush3.bf16.msra.mxu1 %v1117_v1  ;;  %v1733_v8 = vcombine.high %v1185_v4, %v1189_v5 }
 0x272   :  { %v1032_v7 = vmul.f32 1.442695, %v1031_v6  ;;  %1896 = vmatprep.subr.bf16.mxu1 %v2013_v12  ;;  %v1186_v6 = vld [vmem:[%s2519_s11 + $0xc8] sm:$0xff] }
 0x273   :  { %v1190_v12 = vld [vmem:[%s2519_s11 + $0xe8] sm:$0xff] }
 0x274   :  { %1993 = vpow2.f32 %v1032_v7  ;;  %v1732_v7 = vcombine.low %v1185_v4, %v1189_v5  ;;  %v1175_v4 = vld [vmem:[%s2519_s11 + $0x70] sm:$0xff]  ;;  %v1172_v5 = vld [vmem:[%s2519_s11 + $0x58] sm:$0xff] }
 0x275   :  { %1995 = vlog2.f32 %v1040_v16  ;;  %1897 = vmatpush3.bf16.msra.mxu1 %v1992_v2  ;;  %v1171_v2 = vld [vmem:[%s2519_s11 + $0x50] sm:$0xff] }
 0x276   :  { %1406 = vmatprep.subr.bf16.mxu1 %v1733_v8 }
 0x281   :  { %v1994_v10 = vpop.eup %1993 }
 0x282   :  { %v1034_v11 = vsel %vm1027_vm2, %v1994_v10, 0.0  ;;  %v1996_v17 = vpop.eup %1995 }
 0x283   :  { %1035 = vadd.xlane.f32.xlu0 %v1034_v11  ;;  %v1042_v18 = vmul.f32 0.6931472, %v1996_v17  ;;  %v1735_v11 = vcombine.high %v1186_v6, %v1190_v12 }
 0x285   :  { %v1043_v20 = vsub.f32 0.0, %v1042_v18  ;;  %1447 = vmatprep.subr.bf16.mxu0 %v1735_v11  ;;  %v1167_v11 = vld [vmem:[%s2519_s11 + $0x30] sm:$0xff] }
 0x287   :  { %846 = vadd.xlane.f32.xlu0 %v845_v14  ;;  %v1044_v21 = vadd.f32 1e-12, %v1043_v20  ;;  %v1182_v14 = vld [vmem:[%s2519_s11 + $0xa8] sm:$0xff] }
 0x288   :  { %v1727_v16 = vcombine.high %v1178_v13, %v1182_v14  ;;  %v1726_v18 = vcombine.low %v1178_v13, %v1182_v14  ;;  %v1174_v20 = vld [vmem:[%s2519_s11 + $0x68] sm:$0xff]  ;;  %v1164_v13 = vld [vmem:[%s2519_s11 + $0x18] sm:$0xff] }
 0x289   :  { %v1168_v14 = vld [vmem:[%s2519_s11 + $0x38] sm:$0xff] }
 0x30c   :  { %v1036_v19 = vpop.xlane.xlu0 %1035 }
 0x30d   :  { %1997 = vrcp.f32 %v1036_v19  ;;  %v1170_v19 = vld [vmem:[%s2519_s11 + $0x48] sm:$0xff] }
 0x30e   :  { %1999 = vlog2.f32 %v1044_v21  ;;  %v1719_v21 = vcombine.high %v1170_v19, %v1174_v20 }
 0x310   :  { %v847_v41 = vpop.xlane.xlu0 %846 }
 0x311   :  { %v848_v42 = vadd.f32 1e-12, %v847_v41  ;;  %v1708_v41 = vcombine.low %v1161_v36, %v1165_v37 }
 0x31a   :  { %v1998_v22 = vpop.eup %1997 }
 0x31b   :  { %v1038_v23 = vmul.f32 %v1998_v22, %v1994_v10  ;;  %v2000_v28 = vpop.eup %1999  ;;  %v1734_v10 = vcombine.low %v1186_v6, %v1190_v12  ;;  %v1176_v6 = vld [vmem:[%s2519_s11 + $0x78] sm:$0xff]  ;;  %v1721_v12 = vcombine.high %v1171_v2, %v1175_v4 }
 0x31c   :  { %v1046_v29 = vmul.f32 0.6931472, %v2000_v28 }
 0x31d   :  { %v1073_v24 = vrot.slane %v1038_v23, 6  ;;  %v1048_v25 = vadd.f32 1e-12, %v1038_v23  ;;  %1448 = vmatpush1.bf16.msra.mxu0 %v1734_v10  ;;  %v1163_v10 = vld [vmem:[%s2519_s11 + $0x10] sm:$0xff] }
 0x31e   :  { %v1047_v30 = vsub.f32 0.0, %v1046_v29  ;;  %1449 = vmatprep.subr.bf16.mxu0 %v1727_v16  ;;  %v1722_v16 = vcombine.low %v1172_v5, %v1176_v6 }
 0x31f   :  { %v1075_v26 = vsel %vm1068_vm4, %v1038_v23, %v1073_v24  ;;  %2001 = vlog2.f32 %v1048_v25  ;;  %v1718_v24 = vcombine.low %v1170_v19, %v1174_v20  ;;  %v1177_v25 = vld [vmem:[%s2519_s11 + $0x80] sm:$0xff]  ;;  %v1712_v19 = vcombine.low %v1163_v10, %v1167_v11 }
 0x320   :  { %v1076_v27 = vsel %vm1070_vm5, %v1075_v26, 0.0  ;;  %2003 = vpow2.f32 %v856_v38  ;;  %v1181_v26 = vld [vmem:[%s2519_s11 + $0xa0] sm:$0xff]  ;;  %v1162_v38 = vld [vmem:[%s2519_s11 + $0x8] sm:$0xff]  ;;  %v1714_v20 = vcombine.low %v1164_v13, %v1168_v14 }
 0x321   :  { %1078 = vrot.lane.b32.xlu0 %v1076_v27, %s2015_s4  ;;  %1450 = vmatpush1.bf16.msra.mxu0 %v1726_v18  ;;  %v1715_v18 = vcombine.high %v1164_v13, %v1168_v14 }
 0x322   :  { %1451 = vmatprep.subr.bf16.mxu0 %v1719_v21  ;;  %v1195_v21 = vlaneseq }
 0x325   :  { %1452 = vmatpush1.bf16.msra.mxu0 %v1718_v24 }
 0x32c   :  { %v2002_v31 = vpop.eup %2001 }
 0x32d   :  { %v1050_v32 = vmul.f32 0.6931472, %v2002_v31  ;;  %v2004_v39 = vpop.eup %2003  ;;  %v1169_v31 = vld [vmem:[%s2519_s11 + $0x40] sm:$0xff] }
 0x32e   :  { %v858_v40 = vadd.f32 1.0, %v2004_v39  ;;  %v861_v43 = vmul.f32 -0.5, %v2004_v39  ;;  %v864_v46 = vand.u32 2147483647, %v2004_v39 }
 0x32f   :  { %v1051_v33 = vadd.f32 %v1050_v32, %v1047_v30  ;;  %v1725_v30 = vcombine.high %v1177_v25, %v1181_v26  ;;  %v1173_v32 = vld [vmem:[%s2519_s11 + $0x60] sm:$0xff] }
 0x330   :  { %2005 = vlog2.f32 %v858_v40  ;;  %v862_v45 = vadd.f32 1.0, %v861_v43  ;;  %vm865_vm6 = vcmp.lt.f32.partialorder %v864_v46, 0.0004427343  ;;  %v1166_v40 = vld [vmem:[%s2519_s11 + $0x28] sm:$0xff]  ;;  %v1188_v46 = vld [vmem:[%s2519_s11 + $0xd8] sm:$0xff] }
 0x331   :  { %v1053_v34 = vmul.f32 1.4925373, %v1051_v33  ;;  %2007 = vrsqrt.f32 %v848_v42  ;;  %v1724_v33 = vcombine.low %v1177_v25, %v1181_v26  ;;  %v1710_v42 = vcombine.low %v1162_v38, %v1166_v40  ;;  %v1193_v25 = vld [vmem:[%s2521_s12] sm:$0xff] }
 0x332   :  { %v863_v48 = vmul.f32 %v2004_v39, %v862_v45  ;;  %v1709_v39 = vcombine.high %v1161_v36, %v1165_v37  ;;  %v1711_v43 = vcombine.high %v1162_v38, %v1166_v40  ;;  %v1191_v45 = vld [vmem:[%s2519_s11 + $0xf0] sm:$0xff] }
 0x333   :  { %v1054_v35 = vsel %vm1027_vm2, %v1053_v34, -inf }
 0x334   :  { %1055 = vmax.xlane.f32.xlu1 %v1054_v35  ;;  %v1716_v35 = vcombine.low %v1169_v31, %v1173_v32  ;;  %1453 = vmatprep.subr.bf16.mxu0 %v1711_v43 }
 0x335   :  { %1454 = vmatpush1.bf16.msra.mxu0 %v1710_v42 }
 0x33d   :  { %v2006_v44 = vpop.eup %2005 }
 0x33e   :  { %v860_v47 = vmul.f32 0.6931472, %v2006_v44  ;;  %v2008_v52 = vpop.eup %2007  ;;  %v1187_v44 = vld [vmem:[%s2519_s11 + $0xd0] sm:$0xff] }
 0x33f   :  { %v850_v54 = vmul.f32 %v2008_v52, %v838_v9  ;;  %v2017_v52 = vmov 0  }
 0x340   :  { %v866_v49 = vsel %vm865_vm6, %v863_v48, %v860_v47  ;;  %v1737_v47 = vcombine.high %v1187_v44, %v1191_v45  ;;  %v1192_v48 = vld [vmem:[%s2519_s11 + $0xf8] sm:$0xff]  ;;  %1471 = vmatprep.mubr.bf16.mxu0 %v2017_v52 }
 0x341   :  { %v867_v51 = vadd.f32 %v866_v49, %v851_v50  ;;  %v1736_v49 = vcombine.low %v1187_v44, %v1191_v45  ;;  %v1738_v50 = vcombine.low %v1188_v46, %v1192_v48 }
 0x343   :  { %v868_v53 = vsel %vm852_vm7, %v838_v9, %v867_v51  ;;  %v1739_v51 = vcombine.high %v1188_v46, %v1192_v48 }
 0x344   :  { %v869_v55 = vadd.f32 20.0, %v868_v53  ;;  %v1704_v53 = vld [vmem:[%s2520_s10] ss:$0 sm:$0xff] }
 0x345   :  { %1529 = vmatprep.subr.bf16.mxu0 %v1739_v51 }
 0x346   :  { %v1081_v56 = vsel %vm844_vm3, %v850_v54, %v869_v55 }
 0x393   :  { %v1079_v57 = vpop.permute.xlu0 %1078 }
 0x394   :  { %v1083_v58 = vsel %vm1082_vm8, %v1081_v56, %v1079_v57  ;;  %v1179_v56 = vld [vmem:[%s2519_s11 + $0x90] sm:$0xff] }
 0x395   :  { %1085 = vst.msk [vmem:[%s2517_s13] sm:$0xff] %vm1084_vm9, %v1083_v58  ;;  %v1183_v58 = vld [vmem:[%s2519_s11 + $0xb0] sm:$0xff] }
 0x396   :  { %v1729_v0 = vcombine.high %v1179_v56, %v1183_v58 }
 0x3bd   :  { %v1056_v59 = vpop.xlane.xlu1 %1055 }
 0x3be   :  { %v1057_v60 = vsub.f32 %v1053_v34, %v1056_v59  ;;  %v1717_v34 = vcombine.high %v1169_v31, %v1173_v32  ;;  %v1180_v59 = vld [vmem:[%s2519_s11 + $0x98] sm:$0xff] }
 0x3c0   :  { %v1058_v61 = vmul.f32 1.442695, %v1057_v60  ;;  %v1184_v60 = vld [vmem:[%s2519_s11 + $0xb8] sm:$0xff] }
 0x3c1   :  { %v1731_v1 = vcombine.high %v1180_v59, %v1184_v60  ;;  %v1730_v8 = vcombine.low %v1180_v59, %v1184_v60 }
 0x3c2   :  { %2009 = vpow2.f32 %v1058_v61 }
 0x3cf   :  { %v2010_v62 = vpop.eup %2009 }
 0x3d0   :  { %v1060_v63 = vsel %vm1027_vm2, %v2010_v62, 0.0 }
 0x3d1   :  { %1061 = vadd.xlane.f32.xlu1 %v1060_v63 }
 0x45a   :  { %v1062_v3 = vpop.xlane.xlu1 %1061 }
 0x45b   :  { %2011 = vrcp.f32 %v1062_v3 }
 0x468   :  { %v2012_v9 = vpop.eup %2011 }
 0x469   :  { %v1064_v15 = vmul.f32 %v2012_v9, %v2010_v62  ;;  %v1723_v9 = vcombine.high %v1172_v5, %v1176_v6 }
 0x46b   :  { %v1066_v17 = vrot.slane %v1064_v15, 6 }
 0x46d   :  { %v1069_v22 = vsel %vm1068_vm4, %v1064_v15, %v1066_v17  ;;  %v1720_v15 = vcombine.low %v1171_v2, %v1175_v4  ;;  %v1713_v17 = vcombine.high %v1163_v10, %v1167_v11 }
 0x46e   :  { %v1071_v23 = vsel %vm1070_vm5, %v1069_v22, 0.0  ;;  %v1196_v22 = vshrl.u32 %v1195_v21, 7 }
 0x46f   :  { %1087 = vrot.lane.b32.xlu1 %v1071_v23, %s2016_s5 }
 0x470   :  { %v1197_v23 = vsub.s32 0, %v1196_v22  ;;  %v1205_v24 = vsub.s32 2, %v1196_v22  ;;  %v1201_v26 = vsub.s32 1, %v1196_v22  ;;  %v1221_v51 = vsub.s32 6, %v1196_v22 }
 0x4e1   :  { %v1088_v27 = vpop.permute.xlu1 %1087 }
 0x4e2   :  { %v1090_v28 = vsel %vm844_vm3, %v850_v54, %v1088_v27  ;;  %v1209_v27 = vsub.s32 3, %v1196_v22 }
 0x4e3   :  { %v1091_v29 = vpack.c.bf16 %v1090_v28, %v1090_v28  ;;  %v1198_v28 = vrot.slane %v1193_v25, %v1197_v23 }
 0x4e4   :  { %v1210_v31 = vrot.slane %v1193_v25, %v1209_v27 }
 0x4e5   :  { %1899 = vmatmul.mubr.msk.bf16.vlgmr.msra.gmra.mxu1 %vm1111_vm11, %v1091_v29  ;;  %v1206_v29 = vrot.slane %v1193_v25, %v1205_v24 }
 0x4e6   :  { %1407 = vmatpush1.bf16.msra.mxu1 %v1732_v7  ;;  %1430 = vmatprep.mubr.bf16.mxu1 %v2017_v52  ;;  %v1728_v7 = vcombine.low %v1179_v56, %v1183_v58 }
 0x4e7   :  { %1408 = vmatprep.subr.bf16.mxu1 %v1725_v30  ;;  %v1202_v30 = vrot.slane %v1193_v25, %v1201_v26 }
 0x4ea   :  { %1409 = vmatpush1.bf16.msra.mxu1 %v1724_v33 }
 0x4eb   :  { %1410 = vmatprep.subr.bf16.mxu1 %v1717_v34 }
 0x4ee   :  { %1411 = vmatpush1.bf16.msra.mxu1 %v1716_v35 }
 0x4ef   :  { %1412 = vmatprep.subr.bf16.mxu1 %v1709_v39 }
 0x4f2   :  { %1413 = vmatpush1.bf16.msra.mxu1 %v1708_v41 }
 0x4f3   :  { %1488 = vmatprep.subr.bf16.mxu1 %v1737_v47 }
 0x5a5   :  { %v1153_v54 = vpop.f32.mrf.mxu1 }
 0x5a6   :  { %v1154_v55 = vadd.f32 %v1704_v53, %v1153_v54  ;;  %v1225_v53 = vsub.s32 7, %v1196_v22 }
 0x5a7   :  { %v1900_v57 = vpop.f32.mrf.mxu1 }
 0x5a8   :  { %v1159_v61 = vmax.f32 %v1154_v55, 0.0  ;;  %v1222_v55 = vrot.slane %v1193_v25, %v1221_v51  ;;  %v1226_v57 = vrot.slane %v1193_v25, %v1225_v53 }
 0x5a9   :  { %v1156_v62 = vpop.f32.mrf.mxu1 }
 0x5aa   :  { %v1160_v63 = vpack.c.bf16 %v1159_v61, %v1159_v61 }
 0x5ab   :  { %v1901_v3 = vpop.f32.mrf.mxu1 }
 0x5ac   :  { %1740 = vmatmul.mubr.msk.bf16.vlgmr.msra.gmra.mxu1 %vm799_vm1, %v1160_v63  ;;  %1741 = vmatmul.mubr.msk.bf16.vlgmr.msra.gmra.mxu0 %vm799_vm1, %v1160_v63 }
 0x5ad   :  { %1489 = vmatpush1.bf16.msra.mxu1 %v1736_v49  ;;  %1530 = vmatpush1.bf16.msra.mxu0 %v1738_v50  ;;  %v1213_v50 = vsub.s32 4, %v1196_v22 }
 0x5ae   :  { %1490 = vmatprep.subr.bf16.mxu1 %v1729_v0  ;;  %1531 = vmatprep.subr.bf16.mxu0 %v1731_v1 }
 0x5af   :  { %1512 = vmatprep.mubr.bf16.mxu1 %v2017_v52  ;;  %1553 = vmatprep.mubr.bf16.mxu0 %v2017_v52  ;;  %v1217_v52 = vsub.s32 5, %v1196_v22  ;;  %v1214_v54 = vrot.slane %v1193_v25, %v1213_v50 }
 0x5b1   :  { %1491 = vmatpush1.bf16.msra.mxu1 %v1728_v7  ;;  %1532 = vmatpush1.bf16.msra.mxu0 %v1730_v8  ;;  %v1218_v56 = vrot.slane %v1193_v25, %v1217_v52 }
 0x5b2   :  { %1492 = vmatprep.subr.bf16.mxu1 %v1721_v12  ;;  %1533 = vmatprep.subr.bf16.mxu0 %v1723_v9 }
 0x5b5   :  { %1493 = vmatpush1.bf16.msra.mxu1 %v1720_v15  ;;  %1534 = vmatpush1.bf16.msra.mxu0 %v1722_v16 }
 0x5b6   :  { %1494 = vmatprep.subr.bf16.mxu1 %v1713_v17  ;;  %1535 = vmatprep.subr.bf16.mxu0 %v1715_v18 }
 0x5b9   :  { %1495 = vmatpush1.bf16.msra.mxu1 %v1712_v19  ;;  %1536 = vmatpush1.bf16.msra.mxu0 %v1714_v20 }
 0x5bc   :  { %1742 = vmatmul.mubr.msk.bf16.vlgmr.msra.gmra.mxu1 %vm799_vm1, %v1160_v63  ;;  %1743 = vmatmul.mubr.msk.bf16.vlgmr.msra.gmra.mxu0 %vm799_vm1, %v1160_v63 }
 0x66c   :  { %v1432_v32 = vpop.f32.mrf.mxu1  ;;  %v1473_v33 = vpop.f32.mrf.mxu0 }
 0x66d   :  { %v1433_v34 = vadd.f32 %v1432_v32, %v1198_v28  ;;  %v1474_v35 = vadd.f32 %v1473_v33, %v1206_v29 }
 0x66e   :  { %v1434_v36 = vpop.f32.mrf.mxu1  ;;  %v1475_v37 = vpop.f32.mrf.mxu0 }
 0x66f   :  { %v1435_v38 = vadd.f32 %v1434_v36, %v1202_v30  ;;  %v1476_v39 = vadd.f32 %v1475_v37, %v1210_v31  ;;  %v1562_v42 = vmax.f32 %v1433_v34, 0.0  ;;  %v1564_v43 = vmax.f32 %v1474_v35, 0.0 }
 0x670   :  { %v1436_v40 = vpop.f32.mrf.mxu1  ;;  %v1477_v41 = vpop.f32.mrf.mxu0 }
 0x671   :  { %v1563_v44 = vmax.f32 %v1435_v38, 0.0  ;;  %v1565_v45 = vmax.f32 %v1476_v39, 0.0 }
 0x672   :  { %v1437_v46 = vpop.f32.mrf.mxu1  ;;  %v1478_v47 = vpop.f32.mrf.mxu0 }
 0x673   :  { %v1748_v48 = vpack.c.bf16 %v1563_v44, %v1562_v42  ;;  %v1749_v49 = vpack.c.bf16 %v1565_v45, %v1564_v43 }
 0x675   :  { %1602 = vst [vmem:[%s2522_s14] sm:$0xff] %v1748_v48  ;;  %1603 = vst [vmem:[%s2522_s14 + $0x8] sm:$0xff] %v1749_v49 }
 0x67c   :  { %v1514_v58 = vpop.f32.mrf.mxu1  ;;  %v1555_v59 = vpop.f32.mrf.mxu0 }
 0x67d   :  { %v1515_v60 = vadd.f32 %v1514_v58, %v1214_v54  ;;  %v1556_v61 = vadd.f32 %v1555_v59, %v1222_v55 }
 0x67e   :  { %v1516_v62 = vpop.f32.mrf.mxu1  ;;  %v1557_v63 = vpop.f32.mrf.mxu0 }
 0x67f   :  { %v1517_v0 = vadd.f32 %v1516_v62, %v1218_v56  ;;  %v1558_v1 = vadd.f32 %v1557_v63, %v1226_v57  ;;  %v1566_v4 = vmax.f32 %v1515_v60, 0.0  ;;  %v1568_v5 = vmax.f32 %v1556_v61, 0.0 }
 0x680   :  { %v1518_v2 = vpop.f32.mrf.mxu1  ;;  %v1559_v3 = vpop.f32.mrf.mxu0 }
 0x681   :  { %v1567_v6 = vmax.f32 %v1517_v0, 0.0  ;;  %v1569_v7 = vmax.f32 %v1558_v1, 0.0 }
 0x682   :  { %v1519_v8 = vpop.f32.mrf.mxu1  ;;  %v1560_v12 = vpop.f32.mrf.mxu0 }
 0x683   :  { %v1750_v9 = vpack.c.bf16 %v1567_v6, %v1566_v4  ;;  %v1751_v10 = vpack.c.bf16 %v1569_v7, %v1568_v5 }
 0x685   :  { %1604 = vst [vmem:[%s2522_s14 + $0x10] sm:$0xff] %v1750_v9  ;;  %1605 = vst [vmem:[%s2522_s14 + $0x18] sm:$0xff] %v1751_v10 }

// kernel: vae_forward.11
= control target key start
LH: loop header
LB: loop body
LE: loop exit
PB: predicated region body
PF: predicated region fallthrough
CT: control target
= control target key end

     0   :  { %vm434_vm0 = vcmask 523264   ;;  %s1173_s1 = inlined_call_operand.vmem [shape: bf16[576,128], index: 1, kind: input, shape index: {}]   ;;  %s1174_s0 = inlined_call_operand.vmem [shape: bf16[64,576], index: 0, kind: input, shape index: {}]   ;;  %s1175_s2 = inlined_call_operand.vmem [shape: f32[1,128], index: 2, kind: input, shape index: {}]   ;;  %s1176_s3 = inlined_call_operand.vmem [shape: bf16[64,128], index: 3, kind: output, shape index: {}]  }
   0x1   :  { %v906_v0 = vld [vmem:[%s1173_s1 + $0x78] sm:$0xff]   ;;  %v910_v4 = vld [vmem:[%s1173_s1 + $0x70] sm:$0xff]   ;;  %v914_v8 = vld [vmem:[%s1173_s1 + $0x68] sm:$0xff]  }
   0x2   :  { %v907_v1 = vld [vmem:[%s1173_s1 + $0xf8] sm:$0xff]   ;;  %794 = vmatprep.subr.bf16.mxu0 %v906_v0  ;;  %v911_v5 = vld [vmem:[%s1173_s1 + $0xf0] sm:$0xff]   ;;  %v915_v9 = vld [vmem:[%s1173_s1 + $0xe8] sm:$0xff]  }
   0x3   :  { %v908_v2 = vld [vmem:[%s1173_s1 + $0x38] sm:$0xff]   ;;  %834 = vmatprep.subr.bf16.mxu1 %v907_v1  ;;  %v912_v6 = vld [vmem:[%s1173_s1 + $0x30] sm:$0xff]   ;;  %v916_v10 = vld [vmem:[%s1173_s1 + $0x28] sm:$0xff]  }
   0x4   :  { %v909_v3 = vld [vmem:[%s1173_s1 + $0xb8] sm:$0xff]   ;;  %795 = vmatpush3.bf16.msra.mxu0 %v908_v2  ;;  %v913_v7 = vld [vmem:[%s1173_s1 + $0xb0] sm:$0xff]   ;;  %v917_v11 = vld [vmem:[%s1173_s1 + $0xa8] sm:$0xff]  }
   0x5   :  { %835 = vmatpush3.bf16.msra.mxu1 %v909_v3  ;;  %796 = vmatprep.subr.bf16.mxu0 %v910_v4  ;;  %v918_v12 = vld [vmem:[%s1173_s1 + $0x60] sm:$0xff]   ;;  %v922_v16 = vld [vmem:[%s1173_s1 + $0x58] sm:$0xff]   ;;  %v926_v20 = vld [vmem:[%s1173_s1 + $0x50] sm:$0xff]  }
   0x6   :  { %836 = vmatprep.subr.bf16.mxu1 %v911_v5  ;;  %v919_v13 = vld [vmem:[%s1173_s1 + $0xe0] sm:$0xff]   ;;  %v923_v17 = vld [vmem:[%s1173_s1 + $0xd8] sm:$0xff]   ;;  %v927_v21 = vld [vmem:[%s1173_s1 + $0xd0] sm:$0xff]  }
   0x7   :  { %v920_v14 = vld [vmem:[%s1173_s1 + $0x20] sm:$0xff]   ;;  %v924_v18 = vld [vmem:[%s1173_s1 + $0x18] sm:$0xff]   ;;  %v928_v22 = vld [vmem:[%s1173_s1 + $0x10] sm:$0xff]  }
   0x8   :  { %797 = vmatpush3.bf16.msra.mxu0 %v912_v6  ;;  %v921_v15 = vld [vmem:[%s1173_s1 + $0xa0] sm:$0xff]   ;;  %v925_v19 = vld [vmem:[%s1173_s1 + $0x98] sm:$0xff]   ;;  %v929_v23 = vld [vmem:[%s1173_s1 + $0x90] sm:$0xff]  }
   0x9   :  { %837 = vmatpush3.bf16.msra.mxu1 %v913_v7  ;;  %798 = vmatprep.subr.bf16.mxu0 %v914_v8  ;;  %v930_v24 = vld [vmem:[%s1173_s1 + $0x48] sm:$0xff]   ;;  %v934_v28 = vld [vmem:[%s1173_s1 + $0x40] sm:$0xff]   ;;  %v944_v36 = vld [vmem:[%s1173_s1 + $0x118] sm:$0xff]  }
   0xa   :  { %838 = vmatprep.subr.bf16.mxu1 %v915_v9  ;;  %v931_v25 = vld [vmem:[%s1173_s1 + $0xc8] sm:$0xff]   ;;  %v935_v29 = vld [vmem:[%s1173_s1 + $0xc0] sm:$0xff]   ;;  %v951_v39 = vld [vmem:[%s1173_s1 + $0x110] sm:$0xff]  }
   0xb   :  { %v932_v26 = vld [vmem:[%s1173_s1 + $0x8] sm:$0xff]   ;;  %v936_v30 = vld [vmem:[%s1173_s1] sm:$0xff]   ;;  %v954_v43 = vld [vmem:[%s1174_s0 + $0x5c] ss:$20 sps:$4 sm:$0xff]  }
   0xc   :  { %799 = vmatpush3.bf16.msra.mxu0 %v916_v10  ;;  %v933_v27 = vld [vmem:[%s1173_s1 + $0x88] sm:$0xff]   ;;  %v937_v31 = vld [vmem:[%s1173_s1 + $0x80] sm:$0xff]   ;;  %v959_v48 = vld [vmem:[%s1174_s0 + $0x7c] ss:$20 sps:$4 sm:$0xff]  }
   0xd   :  { %839 = vmatpush3.bf16.msra.mxu1 %v917_v11  ;;  %800 = vmatprep.subr.bf16.mxu0 %v918_v12  ;;  %v938_v32 = vld [vmem:[%s1174_s0] ss:$20 sps:$4 sm:$0xff]   ;;  %v940_v33 = vld [vmem:[%s1174_s0 + $0x4] ss:$20 sps:$4 sm:$0xff]   ;;  %v941_v34 = vld [vmem:[%s1174_s0 + $0x8] ss:$20 sps:$4 sm:$0xff]  }
   0xe   :  { %840 = vmatprep.subr.bf16.mxu1 %v919_v13  ;;  %v943_v35 = vld [vmem:[%s1174_s0 + $0xc] ss:$20 sps:$4 sm:$0xff]   ;;  %479 = vmatprep.mubr.bf16.mxu0 %v940_v33  ;;  %v947_v38 = vld [vmem:[%s1174_s0 + $0x34] ss:$20 sps:$4 sm:$0xff]   ;;  %v950_v41 = vld [vmem:[%s1174_s0 + $0x30] ss:$20 sps:$4 sm:$0xff]  }
   0xf   :  { %544 = vmatprep.mubr.bf16.mxu1 %v943_v35  ;;  %v945_v37 = vld [vmem:[%s1174_s0 + $0x2c] ss:$20 sps:$4 sm:$0xff]   ;;  %v949_v40 = vld [vmem:[%s1174_s0 + $0x28] ss:$20 sps:$4 sm:$0xff]   ;;  %v956_v46 = vld [vmem:[%s1174_s0 + $0x50] ss:$20 sps:$4 sm:$0xff]  }
  0x10   :  { %801 = vmatpush3.bf16.msra.mxu0 %v920_v14  ;;  %v952_v42 = vld [vmem:[%s1174_s0 + $0x54] ss:$20 sps:$4 sm:$0xff]   ;;  %v965_v45 = vld [vmem:[%s1173_s1 + $0x100] sm:$0xff]   ;;  %v957_v47 = vld [vmem:[%s1174_s0 + $0x58] ss:$20 sps:$4 sm:$0xff]  }
  0x11   :  { %841 = vmatpush3.bf16.msra.mxu1 %v921_v15  ;;  %802 = vmatprep.subr.bf16.mxu0 %v922_v16  ;;  %v958_v44 = vld [vmem:[%s1173_s1 + $0x108] sm:$0xff]   ;;  %v961_v49 = vld [vmem:[%s1174_s0 + $0x84] ss:$20 sps:$4 sm:$0xff]   ;;  %v964_v51 = vld [vmem:[%s1174_s0 + $0x80] ss:$20 sps:$4 sm:$0xff]  }
  0x12   :  { %842 = vmatprep.subr.bf16.mxu1 %v923_v17  ;;  %v963_v50 = vld [vmem:[%s1174_s0 + $0x78] ss:$20 sps:$4 sm:$0xff]   ;;  %v966_v52 = vld [vmem:[%s1174_s0 + $0x10] ss:$20 sps:$4 sm:$0xff]   ;;  %v967_v53 = vld [vmem:[%s1174_s0 + $0x60] ss:$20 sps:$4 sm:$0xff]  }
  0x13   :  { %v968_v54 = vld [vmem:[%s1174_s0 + $0x38] ss:$20 sps:$4 sm:$0xff]   ;;  %v969_v55 = vld [vmem:[%s1174_s0 + $0x88] ss:$20 sps:$4 sm:$0xff]  }
  0x14   :  { %803 = vmatpush3.bf16.msra.mxu0 %v924_v18 }
  0x15   :  { %843 = vmatpush3.bf16.msra.mxu1 %v925_v19  ;;  %804 = vmatprep.subr.bf16.mxu0 %v926_v20 }
  0x16   :  { %844 = vmatprep.subr.bf16.mxu1 %v927_v21  ;;  %v694_v21 = vld [vmem:[%s1175_s2] ss:$0 sm:$0xff] }
  0x18   :  { %805 = vmatpush3.bf16.msra.mxu0 %v928_v22 }
  0x19   :  { %845 = vmatpush3.bf16.msra.mxu1 %v929_v23  ;;  %806 = vmatprep.subr.bf16.mxu0 %v930_v24 }
  0x1a   :  { %846 = vmatprep.subr.bf16.mxu1 %v931_v25 }
  0x1c   :  { %807 = vmatpush3.bf16.msra.mxu0 %v932_v26 }
  0x1d   :  { %847 = vmatpush3.bf16.msra.mxu1 %v933_v27  ;;  %808 = vmatprep.subr.bf16.mxu0 %v934_v28 }
  0x1e   :  { %848 = vmatprep.subr.bf16.mxu1 %v935_v29 }
  0x20   :  { %809 = vmatpush3.bf16.msra.mxu0 %v936_v30 }
  0x21   :  { %849 = vmatpush3.bf16.msra.mxu1 %v937_v31  ;;  %882 = vmatprep.subr.bf16.mxu0 %v944_v36 }
  0x22   :  { %898 = vmatprep.subr.bf16.mxu1 %v944_v36 }
  0x23   :  { %480 = vmatmul.mubr.bf16.vlgmr.msra.gmra.mxu0 %v938_v32 }
  0x24   :  { %545 = vmatmul.mubr.bf16.vlgmr.msra.gmra.mxu1 %v941_v34  ;;  %883 = vmatpush3.bf16.msra.mxu0 %v944_v36 }
  0x25   :  { %902 = vmatpush3.bf16.msra.mxu1 %v944_v36  ;;  %487 = vmatprep.mubr.bf16.mxu0 %v945_v37 }
  0x26   :  { %552 = vmatprep.mubr.bf16.mxu1 %v947_v38  ;;  %884 = vmatprep.subr.bf16.mxu0 %v951_v39 }
  0x27   :  { %899 = vmatprep.subr.bf16.mxu1 %v951_v39 }
  0x28   :  { %885 = vmatpush3.bf16.msra.mxu0 %v951_v39 }
  0x29   :  { %903 = vmatpush3.bf16.msra.mxu1 %v951_v39  ;;  %886 = vmatprep.subr.bf16.mxu0 %v958_v44 }
  0x2a   :  { %900 = vmatprep.subr.bf16.mxu1 %v958_v44 }
  0x2b   :  { %488 = vmatmul.mubr.bf16.gmra.mxu0 %v949_v40 }
  0x2c   :  { %553 = vmatmul.mubr.bf16.gmra.mxu1 %v950_v41  ;;  %495 = vmatprep.mubr.bf16.mxu0 %v952_v42 }
  0x2d   :  { %560 = vmatprep.mubr.bf16.mxu1 %v954_v43  ;;  %887 = vmatpush3.bf16.msra.mxu0 %v958_v44 }
  0x2e   :  { %904 = vmatpush3.bf16.msra.mxu1 %v958_v44  ;;  %888 = vmatprep.subr.bf16.mxu0 %v965_v45 }
  0x2f   :  { %901 = vmatprep.subr.bf16.mxu1 %v965_v45 }
  0x31   :  { %889 = vmatpush3.bf16.msra.mxu0 %v965_v45 }
  0x32   :  { %905 = vmatpush3.bf16.msra.mxu1 %v965_v45 }
  0x33   :  { %496 = vmatmul.mubr.bf16.gmra.mxu0 %v956_v46 }
  0x34   :  { %561 = vmatmul.mubr.bf16.gmra.mxu1 %v957_v47  ;;  %503 = vmatprep.mubr.bf16.mxu0 %v959_v48 }
  0x35   :  { %568 = vmatprep.mubr.bf16.mxu1 %v961_v49 }
  0x3b   :  { %504 = vmatmul.mubr.bf16.gmra.mxu0 %v963_v50 }
  0x3c   :  { %569 = vmatmul.mubr.bf16.gmra.mxu1 %v964_v51  ;;  %890 = vmatprep.mubr.msk.bf16.mxu0 %vm434_vm0, %v966_v52 }
  0x3d   :  { %894 = vmatprep.mubr.msk.bf16.mxu1 %vm434_vm0, %v967_v53 }
  0x43   :  { %891 = vmatmul.mubr.msk.bf16.vlgmr.msra.gmra.mxu0 %vm434_vm0, %v968_v54 }
  0x44   :  { %895 = vmatmul.mubr.msk.bf16.vlgmr.msra.gmra.mxu1 %vm434_vm0, %v969_v55 }
  0xe3   :  { %v810_v56 = vpop.f32.mrf.mxu0 }
  0xe4   :  { %v850_v57 = vpop.f32.mrf.mxu1 }
  0xe5   :  { %v811_v58 = vpop.f32.mrf.mxu0 }
  0xe6   :  { %v851_v59 = vpop.f32.mrf.mxu1  ;;  %v812_v19 = vadd.f32 %v811_v58, %v810_v56 }
  0xe7   :  { %v813_v60 = vpop.f32.mrf.mxu0  ;;  %v852_v39 = vadd.f32 %v851_v59, %v850_v57 }
  0xe8   :  { %v853_v61 = vpop.f32.mrf.mxu1  ;;  %v482_v31 = vadd.f32 %v812_v19, %v694_v21 }
  0xe9   :  { %v814_v62 = vpop.f32.mrf.mxu0 }
  0xea   :  { %v854_v63 = vpop.f32.mrf.mxu1  ;;  %v815_v25 = vadd.f32 %v814_v62, %v813_v60  ;;  %v547_v51 = vadd.f32 %v852_v39, %v482_v31 }
  0xeb   :  { %v816_v0 = vpop.f32.mrf.mxu0  ;;  %v855_v53 = vadd.f32 %v854_v63, %v853_v61 }
  0xec   :  { %v856_v1 = vpop.f32.mrf.mxu1  ;;  %v485_v40 = vadd.f32 %v815_v25, %v694_v21 }
  0xed   :  { %v817_v2 = vpop.f32.mrf.mxu0 }
  0xee   :  { %v857_v3 = vpop.f32.mrf.mxu1  ;;  %v818_v17 = vadd.f32 %v817_v2, %v816_v0 }
  0xef   :  { %v819_v4 = vpop.f32.mrf.mxu0  ;;  %v858_v35 = vadd.f32 %v857_v3, %v856_v1  ;;  %v550_v3 = vadd.f32 %v855_v53, %v485_v40 }
  0xf0   :  { %v859_v5 = vpop.f32.mrf.mxu1  ;;  %v490_v28 = vadd.f32 %v818_v17, %v694_v21 }
  0xf1   :  { %v820_v6 = vpop.f32.mrf.mxu0 }
  0xf2   :  { %v860_v7 = vpop.f32.mrf.mxu1  ;;  %v821_v22 = vadd.f32 %v820_v6, %v819_v4  ;;  %v555_v47 = vadd.f32 %v858_v35, %v490_v28 }
  0xf3   :  { %v822_v8 = vpop.f32.mrf.mxu0  ;;  %v861_v44 = vadd.f32 %v860_v7, %v859_v5 }
  0xf4   :  { %v862_v9 = vpop.f32.mrf.mxu1  ;;  %v493_v36 = vadd.f32 %v821_v22, %v694_v21 }
  0xf5   :  { %v823_v10 = vpop.f32.mrf.mxu0 }
  0xf6   :  { %v863_v11 = vpop.f32.mrf.mxu1  ;;  %v824_v26 = vadd.f32 %v823_v10, %v822_v8  ;;  %v558_v56 = vadd.f32 %v861_v44, %v493_v36 }
  0xf7   :  { %v825_v12 = vpop.f32.mrf.mxu0  ;;  %v864_v49 = vadd.f32 %v863_v11, %v862_v9 }
  0xf8   :  { %v865_v13 = vpop.f32.mrf.mxu1  ;;  %v498_v41 = vadd.f32 %v824_v26, %v694_v21 }
  0xf9   :  { %v826_v14 = vpop.f32.mrf.mxu0 }
  0xfa   :  { %v866_v15 = vpop.f32.mrf.mxu1  ;;  %v827_v32 = vadd.f32 %v826_v14, %v825_v12  ;;  %v563_v59 = vadd.f32 %v864_v49, %v498_v41 }
  0xfb   :  { %v828_v16 = vpop.f32.mrf.mxu0  ;;  %v867_v60 = vadd.f32 %v866_v15, %v865_v13 }
  0xfc   :  { %v868_v18 = vpop.f32.mrf.mxu1  ;;  %v501_v50 = vadd.f32 %v827_v32, %v694_v21 }
  0xfd   :  { %v829_v20 = vpop.f32.mrf.mxu0 }
  0xfe   :  { %v830_v23 = vadd.f32 %v829_v20, %v828_v16  ;;  %v869_v24 = vpop.f32.mrf.mxu1  ;;  %v566_v7 = vadd.f32 %v867_v60, %v501_v50 }
  0xff   :  { %v831_v27 = vpop.f32.mrf.mxu0  ;;  %v870_v33 = vadd.f32 %v869_v24, %v868_v18 }
 0x100   :  { %v506_v29 = vadd.f32 %v830_v23, %v694_v21  ;;  %v871_v30 = vpop.f32.mrf.mxu1 }
 0x101   :  { %v832_v34 = vpop.f32.mrf.mxu0 }
 0x102   :  { %v833_v37 = vadd.f32 %v832_v34, %v831_v27  ;;  %v872_v38 = vpop.f32.mrf.mxu1  ;;  %v571_v43 = vadd.f32 %v870_v33, %v506_v29 }
 0x103   :  { %v892_v42 = vpop.f32.mrf.mxu0  ;;  %v873_v46 = vadd.f32 %v872_v38, %v871_v30 }
 0x104   :  { %v509_v45 = vadd.f32 %v833_v37, %v694_v21  ;;  %v896_v48 = vpop.f32.mrf.mxu1  ;;  %v620_v54 = vadd.f32 %v892_v42, %v555_v47 }
 0x105   :  { %v611_v52 = vpop.f32.mrf.mxu0  ;;  %v636_v57 = vadd.f32 %v896_v48, %v571_v43 }
 0x106   :  { %v627_v55 = vpop.f32.mrf.mxu1  ;;  %v574_v58 = vadd.f32 %v873_v46, %v509_v45  ;;  %v612_v0 = vadd.f32 %v611_v52, %v547_v51  ;;  %v644_v8 = vmax.f32 %v620_v54, 0.0 }
 0x107   :  { %v893_v62 = vpop.f32.mrf.mxu0  ;;  %v628_v4 = vadd.f32 %v627_v55, %v563_v59  ;;  %v648_v63 = vmax.f32 %v636_v57, 0.0 }
 0x108   :  { %v623_v1 = vadd.f32 %v893_v62, %v558_v56  ;;  %v897_v2 = vpop.f32.mrf.mxu1  ;;  %v642_v14 = vmax.f32 %v612_v0, 0.0 }
 0x109   :  { %v639_v5 = vadd.f32 %v897_v2, %v574_v58  ;;  %v614_v6 = vpop.f32.mrf.mxu0  ;;  %v646_v16 = vmax.f32 %v628_v4, 0.0 }
 0x10a   :  { %v645_v9 = vmax.f32 %v623_v1, 0.0  ;;  %v615_v10 = vadd.f32 %v614_v6, %v550_v3  ;;  %v630_v61 = vpop.f32.mrf.mxu1 }
 0x10b   :  { %v649_v11 = vmax.f32 %v639_v5, 0.0  ;;  %v631_v12 = vadd.f32 %v630_v61, %v566_v7 }
 0x10c   :  { %v779_v13 = vpack.c.bf16 %v645_v9, %v644_v8  ;;  %v643_v15 = vmax.f32 %v615_v10, 0.0 }
 0x10d   :  { %v789_v17 = vpack.c.bf16 %v649_v11, %v648_v63  ;;  %v647_v18 = vmax.f32 %v631_v12, 0.0 }
 0x10e   :  { %791 = vst [vmem:[%s1176_s3 + $0x8] sm:$0xff] %v779_v13   ;;  %v774_v19 = vpack.c.bf16 %v643_v15, %v642_v14 }
 0x10f   :  { %793 = vst [vmem:[%s1176_s3 + $0x18] sm:$0xff] %v789_v17   ;;  %v784_v20 = vpack.c.bf16 %v647_v18, %v646_v16 }
 0x110   :  { %775 = vst [vmem:[%s1176_s3] sm:$0xff] %v774_v19  }
 0x111   :  { %792 = vst [vmem:[%s1176_s3 + $0x10] sm:$0xff] %v784_v20  }

// kernel: vae_forward.12
= control target key start
LH: loop header
LB: loop body
LE: loop exit
PB: predicated region body
PF: predicated region fallthrough
CT: control target
= control target key end

     0   :  { %vm470_vm0 = vcmask 261120   ;;  %s1898_s1 = inlined_call_operand.vmem [shape: bf16[288,128], index: 1, kind: input, shape index: {}]   ;;  %s1899_s0 = inlined_call_operand.vmem [shape: bf16[256,288], index: 0, kind: input, shape index: {}]   ;;  %s1900_s2 = inlined_call_operand.vmem [shape: f32[1,128], index: 2, kind: input, shape index: {}]   ;;  %s1901_s3 = inlined_call_operand.vmem [shape: bf16[256,128], index: 3, kind: output, shape index: {}]  }
   0x1   :  { %v1461_v0 = vld [vmem:[%s1898_s1 + $0x78] sm:$0xff]   ;;  %v1463_v2 = vld [vmem:[%s1898_s1 + $0x70] sm:$0xff]   ;;  %v1465_v4 = vld [vmem:[%s1898_s1 + $0x68] sm:$0xff]  }
   0x2   :  { %v1462_v1 = vld [vmem:[%s1898_s1 + $0x38] sm:$0xff]   ;;  %1279 = vmatprep.subr.bf16.mxu0 %v1461_v0  ;;  %1445 = vmatprep.subr.bf16.mxu1 %v1461_v0  ;;  %v1464_v3 = vld [vmem:[%s1898_s1 + $0x30] sm:$0xff]   ;;  %v1466_v5 = vld [vmem:[%s1898_s1 + $0x28] sm:$0xff]  }
   0x3   :  { %1280 = vmatpush3.bf16.msra.mxu0 %v1462_v1  ;;  %1453 = vmatpush3.bf16.msra.mxu1 %v1462_v1  ;;  %v1467_v6 = vld [vmem:[%s1898_s1 + $0x60] sm:$0xff]   ;;  %v1469_v8 = vld [vmem:[%s1898_s1 + $0x58] sm:$0xff]   ;;  %v1471_v10 = vld [vmem:[%s1898_s1 + $0x50] sm:$0xff]  }
   0x4   :  { %1281 = vmatprep.subr.bf16.mxu0 %v1463_v2  ;;  %1446 = vmatprep.subr.bf16.mxu1 %v1463_v2  ;;  %v1468_v7 = vld [vmem:[%s1898_s1 + $0x20] sm:$0xff]   ;;  %v1470_v9 = vld [vmem:[%s1898_s1 + $0x18] sm:$0xff]   ;;  %v1472_v13 = vld [vmem:[%s1898_s1 + $0x10] sm:$0xff]  }
   0x5   :  { %v1479_v11 = vld [vmem:[%s1899_s0 + $0x4] ss:$12 sps:$4 sm:$0xff]   ;;  %v1473_v14 = vld [vmem:[%s1898_s1 + $0x48] sm:$0xff]   ;;  %v1490_v26 = vld [vmem:[%s1899_s0 + $0x34] ss:$12 sps:$4 sm:$0xff]  }
   0x6   :  { %v1482_v12 = vld [vmem:[%s1899_s0 + $0x124] ss:$12 sps:$4 sm:$0xff]   ;;  %551 = vmatprep.mubr.bf16.mxu0 %v1479_v11  ;;  %v1474_v15 = vld [vmem:[%s1898_s1 + $0x8] sm:$0xff]   ;;  %v1492_v27 = vld [vmem:[%s1899_s0 + $0x154] ss:$12 sps:$4 sm:$0xff]  }
   0x7   :  { %1282 = vmatpush3.bf16.msra.mxu0 %v1464_v3  ;;  %1454 = vmatpush3.bf16.msra.mxu1 %v1464_v3  ;;  %v1475_v16 = vld [vmem:[%s1898_s1 + $0x40] sm:$0xff]   ;;  %v1483_v18 = vld [vmem:[%s1898_s1 + $0x88] sm:$0xff]   ;;  %v1494_v28 = vld [vmem:[%s1899_s0 + $0x30] ss:$12 sps:$4 sm:$0xff]  }
   0x8   :  { %1283 = vmatprep.subr.bf16.mxu0 %v1465_v4  ;;  %1447 = vmatprep.subr.bf16.mxu1 %v1465_v4  ;;  %v1476_v17 = vld [vmem:[%s1898_s1] sm:$0xff]   ;;  %v1484_v21 = vld [vmem:[%s1899_s0 + $0x1c] ss:$12 sps:$4 sm:$0xff]   ;;  %v1497_v30 = vld [vmem:[%s1899_s0 + $0x4c] ss:$12 sps:$4 sm:$0xff]  }
   0x9   :  { %647 = vmatprep.mubr.bf16.mxu1 %v1482_v12  ;;  %v1477_v19 = vld [vmem:[%s1899_s0] ss:$12 sps:$4 sm:$0xff]   ;;  %v1486_v22 = vld [vmem:[%s1899_s0 + $0x13c] ss:$12 sps:$4 sm:$0xff]   ;;  %v1488_v24 = vld [vmem:[%s1899_s0 + $0x18] ss:$12 sps:$4 sm:$0xff]  }
   0xa   :  { %v1480_v20 = vld [vmem:[%s1899_s0 + $0x120] ss:$12 sps:$4 sm:$0xff]   ;;  %v1489_v25 = vld [vmem:[%s1899_s0 + $0x138] ss:$12 sps:$4 sm:$0xff]   ;;  %v1495_v29 = vld [vmem:[%s1899_s0 + $0x150] ss:$12 sps:$4 sm:$0xff]  }
   0xb   :  { %1284 = vmatpush3.bf16.msra.mxu0 %v1466_v5  ;;  %1455 = vmatpush3.bf16.msra.mxu1 %v1466_v5  ;;  %v1496_v23 = vld [vmem:[%s1898_s1 + $0x80] sm:$0xff]   ;;  %v1499_v31 = vld [vmem:[%s1899_s0 + $0x16c] ss:$12 sps:$4 sm:$0xff]   ;;  %v1501_v32 = vld [vmem:[%s1899_s0 + $0x48] ss:$12 sps:$4 sm:$0xff]  }
   0xc   :  { %1285 = vmatprep.subr.bf16.mxu0 %v1467_v6  ;;  %1448 = vmatprep.subr.bf16.mxu1 %v1467_v6  ;;  %v1502_v33 = vld [vmem:[%s1899_s0 + $0x168] ss:$12 sps:$4 sm:$0xff]   ;;  %v1503_v34 = vld [vmem:[%s1899_s0 + $0x64] ss:$12 sps:$4 sm:$0xff]   ;;  %v1506_v36 = vld [vmem:[%s1899_s0 + $0x60] ss:$12 sps:$4 sm:$0xff]  }
   0xd   :  { %v1505_v35 = vld [vmem:[%s1899_s0 + $0x8] ss:$12 sps:$4 sm:$0xff]   ;;  %v1507_v37 = vld [vmem:[%s1899_s0 + $0x20] ss:$12 sps:$4 sm:$0xff]   ;;  %v1510_v39 = vld [vmem:[%s1899_s0 + $0x38] ss:$12 sps:$4 sm:$0xff]  }
   0xe   :  { %v1508_v38 = vld [vmem:[%s1899_s0 + $0x7c] ss:$12 sps:$4 sm:$0xff]   ;;  %v1511_v40 = vld [vmem:[%s1899_s0 + $0x78] ss:$12 sps:$4 sm:$0xff]   ;;  %v1513_v42 = vld [vmem:[%s1899_s0 + $0x94] ss:$12 sps:$4 sm:$0xff]  }
   0xf   :  { %1286 = vmatpush3.bf16.msra.mxu0 %v1468_v7  ;;  %1456 = vmatpush3.bf16.msra.mxu1 %v1468_v7  ;;  %v1512_v41 = vld [vmem:[%s1899_s0 + $0x50] ss:$12 sps:$4 sm:$0xff]   ;;  %v1515_v43 = vld [vmem:[%s1899_s0 + $0x68] ss:$12 sps:$4 sm:$0xff]   ;;  %v1517_v45 = vld [vmem:[%s1899_s0 + $0x80] ss:$12 sps:$4 sm:$0xff]  }
  0x10   :  { %1287 = vmatprep.subr.bf16.mxu0 %v1469_v8  ;;  %1449 = vmatprep.subr.bf16.mxu1 %v1469_v8  ;;  %v1516_v44 = vld [vmem:[%s1899_s0 + $0x90] ss:$12 sps:$4 sm:$0xff]   ;;  %v1518_v46 = vld [vmem:[%s1899_s0 + $0xac] ss:$12 sps:$4 sm:$0xff]   ;;  %v1521_v48 = vld [vmem:[%s1899_s0 + $0xa8] ss:$12 sps:$4 sm:$0xff]  }
  0x11   :  { %v1520_v47 = vld [vmem:[%s1899_s0 + $0x98] ss:$12 sps:$4 sm:$0xff]   ;;  %v1522_v49 = vld [vmem:[%s1899_s0 + $0xb0] ss:$12 sps:$4 sm:$0xff]   ;;  %v1525_v51 = vld [vmem:[%s1899_s0 + $0xc8] ss:$12 sps:$4 sm:$0xff]  }
  0x12   :  { %v1523_v50 = vld [vmem:[%s1899_s0 + $0xc4] ss:$12 sps:$4 sm:$0xff]   ;;  %v1526_v52 = vld [vmem:[%s1899_s0 + $0xc0] ss:$12 sps:$4 sm:$0xff]   ;;  %v1528_v54 = vld [vmem:[%s1899_s0 + $0xdc] ss:$12 sps:$4 sm:$0xff]  }
  0x13   :  { %1288 = vmatpush3.bf16.msra.mxu0 %v1470_v9  ;;  %1457 = vmatpush3.bf16.msra.mxu1 %v1470_v9  ;;  %v1527_v53 = vld [vmem:[%s1899_s0 + $0xe0] ss:$12 sps:$4 sm:$0xff]   ;;  %v1530_v55 = vld [vmem:[%s1899_s0 + $0xf8] ss:$12 sps:$4 sm:$0xff]   ;;  %v1532_v57 = vld [vmem:[%s1899_s0 + $0x110] ss:$12 sps:$4 sm:$0xff]  }
  0x14   :  { %1289 = vmatprep.subr.bf16.mxu0 %v1471_v10  ;;  %1450 = vmatprep.subr.bf16.mxu1 %v1471_v10  ;;  %v1531_v56 = vld [vmem:[%s1899_s0 + $0xd8] ss:$12 sps:$4 sm:$0xff]   ;;  %v1533_v58 = vld [vmem:[%s1899_s0 + $0xf4] ss:$12 sps:$4 sm:$0xff]   ;;  %v1536_v60 = vld [vmem:[%s1899_s0 + $0xf0] ss:$12 sps:$4 sm:$0xff]  }
  0x15   :  { %v1535_v59 = vld [vmem:[%s1899_s0 + $0x128] ss:$12 sps:$4 sm:$0xff]   ;;  %v1537_v61 = vld [vmem:[%s1899_s0 + $0x140] ss:$12 sps:$4 sm:$0xff]   ;;  %v1540_v63 = vld [vmem:[%s1899_s0 + $0x158] ss:$12 sps:$4 sm:$0xff]  }
  0x16   :  { %v1538_v62 = vld [vmem:[%s1899_s0 + $0x10c] ss:$12 sps:$4 sm:$0xff]   ;;  %v1541_v0 = vld [vmem:[%s1899_s0 + $0x108] ss:$12 sps:$4 sm:$0xff]   ;;  %v1542_v1 = vld [vmem:[%s1899_s0 + $0x170] ss:$12 sps:$4 sm:$0xff]  }
  0x17   :  { %1290 = vmatpush3.bf16.msra.mxu0 %v1472_v13  ;;  %1458 = vmatpush3.bf16.msra.mxu1 %v1472_v13 }
  0x18   :  { %1291 = vmatprep.subr.bf16.mxu0 %v1473_v14  ;;  %1451 = vmatprep.subr.bf16.mxu1 %v1473_v14 }
  0x1b   :  { %1292 = vmatpush3.bf16.msra.mxu0 %v1474_v15  ;;  %1459 = vmatpush3.bf16.msra.mxu1 %v1474_v15 }
  0x1c   :  { %1293 = vmatprep.subr.bf16.mxu0 %v1475_v16  ;;  %1452 = vmatprep.subr.bf16.mxu1 %v1475_v16 }
  0x1f   :  { %1294 = vmatpush3.bf16.msra.mxu0 %v1476_v17  ;;  %1460 = vmatpush3.bf16.msra.mxu1 %v1476_v17 }
  0x20   :  { %1409 = vmatprep.subr.bf16.mxu1 %v1483_v18 }
  0x22   :  { %552 = vmatmul.mubr.bf16.vlgmr.msra.gmra.mxu0 %v1477_v19  ;;  %648 = vmatmul.mubr.bf16.vlgmr.msra.gmra.mxu1 %v1480_v20 }
  0x23   :  { %1410 = vmatpush3.bf16.msra.mxu1 %v1483_v18  ;;  %559 = vmatprep.mubr.bf16.mxu0 %v1484_v21 }
  0x24   :  { %655 = vmatprep.mubr.bf16.mxu1 %v1486_v22  ;;  %1411 = vmatprep.subr.bf16.mxu1 %v1496_v23 }
  0x27   :  { %1412 = vmatpush3.bf16.msra.mxu1 %v1496_v23 }
  0x2a   :  { %560 = vmatmul.mubr.bf16.gmra.mxu0 %v1488_v24  ;;  %656 = vmatmul.mubr.bf16.gmra.mxu1 %v1489_v25 }
  0x2b   :  { %567 = vmatprep.mubr.bf16.mxu0 %v1490_v26  ;;  %663 = vmatprep.mubr.bf16.mxu1 %v1492_v27 }
  0x32   :  { %568 = vmatmul.mubr.bf16.gmra.mxu0 %v1494_v28  ;;  %664 = vmatmul.mubr.bf16.gmra.mxu1 %v1495_v29 }
  0x33   :  { %575 = vmatprep.mubr.bf16.mxu0 %v1497_v30  ;;  %671 = vmatprep.mubr.bf16.mxu1 %v1499_v31 }
  0x3a   :  { %576 = vmatmul.mubr.bf16.gmra.mxu0 %v1501_v32  ;;  %672 = vmatmul.mubr.bf16.gmra.mxu1 %v1502_v33 }
  0x3b   :  { %583 = vmatprep.mubr.bf16.mxu0 %v1503_v34  ;;  %1413 = vmatprep.mubr.msk.bf16.mxu1 %vm470_vm0, %v1505_v35 }
  0x42   :  { %584 = vmatmul.mubr.bf16.gmra.mxu0 %v1506_v36  ;;  %1414 = vmatmul.mubr.msk.bf16.vlgmr.msra.gmra.mxu1 %vm470_vm0, %v1507_v37 }
  0x43   :  { %591 = vmatprep.mubr.bf16.mxu0 %v1508_v38  ;;  %1417 = vmatprep.mubr.msk.bf16.mxu1 %vm470_vm0, %v1510_v39 }
  0x4a   :  { %592 = vmatmul.mubr.bf16.gmra.mxu0 %v1511_v40  ;;  %1418 = vmatmul.mubr.msk.bf16.gmra.mxu1 %vm470_vm0, %v1512_v41 }
  0x4b   :  { %599 = vmatprep.mubr.bf16.mxu0 %v1513_v42  ;;  %1421 = vmatprep.mubr.msk.bf16.mxu1 %vm470_vm0, %v1515_v43 }
  0x52   :  { %600 = vmatmul.mubr.bf16.gmra.mxu0 %v1516_v44  ;;  %1422 = vmatmul.mubr.msk.bf16.gmra.mxu1 %vm470_vm0, %v1517_v45  ;;  %v1800_v44 = vld [vmem:[%s1900_s2] ss:$0 sm:$0xff] }
  0x53   :  { %607 = vmatprep.mubr.bf16.mxu0 %v1518_v46  ;;  %1425 = vmatprep.mubr.msk.bf16.mxu1 %vm470_vm0, %v1520_v47 }
  0x5a   :  { %608 = vmatmul.mubr.bf16.gmra.mxu0 %v1521_v48  ;;  %1426 = vmatmul.mubr.msk.bf16.gmra.mxu1 %vm470_vm0, %v1522_v49 }
  0x5b   :  { %615 = vmatprep.mubr.bf16.mxu0 %v1523_v50  ;;  %1429 = vmatprep.mubr.msk.bf16.mxu1 %vm470_vm0, %v1525_v51 }
  0x62   :  { %616 = vmatmul.mubr.bf16.gmra.mxu0 %v1526_v52  ;;  %1430 = vmatmul.mubr.msk.bf16.gmra.mxu1 %vm470_vm0, %v1527_v53 }
  0x63   :  { %623 = vmatprep.mubr.bf16.mxu0 %v1528_v54  ;;  %1433 = vmatprep.mubr.msk.bf16.mxu1 %vm470_vm0, %v1530_v55 }
  0x6a   :  { %624 = vmatmul.mubr.bf16.gmra.mxu0 %v1531_v56  ;;  %1434 = vmatmul.mubr.msk.bf16.gmra.mxu1 %vm470_vm0, %v1532_v57 }
  0x6b   :  { %631 = vmatprep.mubr.bf16.mxu0 %v1533_v58  ;;  %1437 = vmatprep.mubr.msk.bf16.mxu1 %vm470_vm0, %v1535_v59 }
  0x72   :  { %632 = vmatmul.mubr.bf16.gmra.mxu0 %v1536_v60  ;;  %1438 = vmatmul.mubr.msk.bf16.gmra.mxu1 %vm470_vm0, %v1537_v61 }
  0x73   :  { %639 = vmatprep.mubr.bf16.mxu0 %v1538_v62  ;;  %1441 = vmatprep.mubr.msk.bf16.mxu1 %vm470_vm0, %v1540_v63 }
  0x7a   :  { %640 = vmatmul.mubr.bf16.gmra.mxu0 %v1541_v0  ;;  %1442 = vmatmul.mubr.msk.bf16.gmra.mxu1 %vm470_vm0, %v1542_v1 }
  0xe2   :  { %v1295_v2 = vpop.f32.mrf.mxu0  ;;  %v1367_v3 = vpop.f32.mrf.mxu1 }
  0xe4   :  { %v1296_v4 = vpop.f32.mrf.mxu0  ;;  %v1368_v5 = vpop.f32.mrf.mxu1 }
  0xe5   :  { %v1777_v6 = vadd.f32 %v1368_v5, %v1367_v3  ;;  %v1297_v41 = vadd.f32 %v1296_v4, %v1295_v2 }
  0xe6   :  { %v1298_v7 = vpop.f32.mrf.mxu0  ;;  %v1370_v8 = vpop.f32.mrf.mxu1 }
  0xe7   :  { %v554_v51 = vadd.f32 %v1297_v41, %v1800_v44 }
  0xe8   :  { %v1299_v9 = vpop.f32.mrf.mxu0  ;;  %v1371_v10 = vpop.f32.mrf.mxu1 }
  0xe9   :  { %v1779_v11 = vadd.f32 %v1371_v10, %v1370_v8  ;;  %v1300_v46 = vadd.f32 %v1299_v9, %v1298_v7 }
  0xea   :  { %v1301_v12 = vpop.f32.mrf.mxu0  ;;  %v1373_v13 = vpop.f32.mrf.mxu1 }
  0xeb   :  { %v557_v58 = vadd.f32 %v1300_v46, %v1800_v44 }
  0xec   :  { %v1302_v14 = vpop.f32.mrf.mxu0  ;;  %v1374_v15 = vpop.f32.mrf.mxu1 }
  0xed   :  { %v1781_v16 = vadd.f32 %v1374_v15, %v1373_v13  ;;  %v1303_v38 = vadd.f32 %v1302_v14, %v1301_v12 }
  0xee   :  { %v1304_v17 = vpop.f32.mrf.mxu0  ;;  %v1376_v18 = vpop.f32.mrf.mxu1 }
  0xef   :  { %v562_v47 = vadd.f32 %v1303_v38, %v1800_v44 }
  0xf0   :  { %v1305_v19 = vpop.f32.mrf.mxu0  ;;  %v1377_v20 = vpop.f32.mrf.mxu1 }
  0xf1   :  { %v1783_v21 = vadd.f32 %v1377_v20, %v1376_v18  ;;  %v1306_v42 = vadd.f32 %v1305_v19, %v1304_v17 }
  0xf2   :  { %v1307_v22 = vpop.f32.mrf.mxu0  ;;  %v1379_v23 = vpop.f32.mrf.mxu1 }
  0xf3   :  { %v565_v52 = vadd.f32 %v1306_v42, %v1800_v44 }
  0xf4   :  { %v1308_v24 = vpop.f32.mrf.mxu0  ;;  %v1380_v25 = vpop.f32.mrf.mxu1 }
  0xf5   :  { %v1785_v26 = vadd.f32 %v1380_v25, %v1379_v23  ;;  %v1309_v59 = vadd.f32 %v1308_v24, %v1307_v22 }
  0xf6   :  { %v1310_v27 = vpop.f32.mrf.mxu0  ;;  %v1382_v28 = vpop.f32.mrf.mxu1 }
  0xf7   :  { %v570_v15 = vadd.f32 %v1309_v59, %v1800_v44 }
  0xf8   :  { %v1311_v29 = vpop.f32.mrf.mxu0  ;;  %v1383_v30 = vpop.f32.mrf.mxu1 }
  0xf9   :  { %v1787_v31 = vadd.f32 %v1383_v30, %v1382_v28  ;;  %v1312_v2 = vadd.f32 %v1311_v29, %v1310_v27 }
  0xfa   :  { %v1313_v32 = vpop.f32.mrf.mxu0  ;;  %v1789_v33 = vpop.f32.mrf.mxu1 }
  0xfb   :  { %v573_v24 = vadd.f32 %v1312_v2, %v1800_v44 }
  0xfc   :  { %v1314_v34 = vpop.f32.mrf.mxu0  ;;  %v1791_v35 = vpop.f32.mrf.mxu1 }
  0xfd   :  { %v1315_v55 = vadd.f32 %v1314_v34, %v1313_v32 }
  0xfe   :  { %v1316_v36 = vpop.f32.mrf.mxu0  ;;  %v1793_v37 = vpop.f32.mrf.mxu1 }
  0xff   :  { %v578_v9 = vadd.f32 %v1315_v55, %v1800_v44 }
 0x100   :  { %v1317_v39 = vpop.f32.mrf.mxu0  ;;  %v1795_v40 = vpop.f32.mrf.mxu1 }
 0x101   :  { %v1318_v62 = vadd.f32 %v1317_v39, %v1316_v36 }
 0x102   :  { %v1319_v43 = vpop.f32.mrf.mxu0  ;;  %v1415_v45 = vpop.f32.mrf.mxu1 }
 0x103   :  { %v723_v50 = vadd.f32 %v1415_v45, %v562_v47  ;;  %v581_v17 = vadd.f32 %v1318_v62, %v1800_v44 }
 0x104   :  { %v1320_v48 = vpop.f32.mrf.mxu0  ;;  %v714_v49 = vpop.f32.mrf.mxu1 }
 0x105   :  { %v715_v56 = vadd.f32 %v714_v49, %v554_v51  ;;  %v843_v63 = vmax.f32 %v723_v50, 0.0  ;;  %v1321_v25 = vadd.f32 %v1320_v48, %v1319_v43 }
 0x106   :  { %v1322_v53 = vpop.f32.mrf.mxu0  ;;  %v1416_v54 = vpop.f32.mrf.mxu1 }
 0x107   :  { %v726_v57 = vadd.f32 %v1416_v54, %v565_v52  ;;  %v841_v5 = vmax.f32 %v715_v56, 0.0  ;;  %v586_v50 = vadd.f32 %v1321_v25, %v1800_v44 }
 0x108   :  { %v1323_v60 = vpop.f32.mrf.mxu0  ;;  %v717_v61 = vpop.f32.mrf.mxu1 }
 0x109   :  { %v844_v0 = vmax.f32 %v726_v57, 0.0  ;;  %v718_v1 = vadd.f32 %v717_v61, %v557_v58  ;;  %v1324_v36 = vadd.f32 %v1323_v60, %v1322_v53 }
 0x10a   :  { %v1325_v3 = vpop.f32.mrf.mxu0  ;;  %v1419_v4 = vpop.f32.mrf.mxu1 }
 0x10b   :  { %v1192_v7 = vpack.c.bf16 %v844_v0, %v843_v63  ;;  %v842_v8 = vmax.f32 %v718_v1, 0.0  ;;  %v739_v14 = vadd.f32 %v1419_v4, %v578_v9  ;;  %v589_v56 = vadd.f32 %v1324_v36, %v1800_v44 }
 0x10c   :  { %v1326_v10 = vpop.f32.mrf.mxu0  ;;  %v730_v12 = vpop.f32.mrf.mxu1 }
 0x10d   :  { %1264 = vst [vmem:[%s1901_s3 + $0x8] sm:$0xff] %v1192_v7   ;;  %v1187_v13 = vpack.c.bf16 %v842_v8, %v841_v5  ;;  %v1327_v20 = vadd.f32 %v1326_v10, %v1325_v3  ;;  %v731_v22 = vadd.f32 %v730_v12, %v570_v15  ;;  %v847_v29 = vmax.f32 %v739_v14, 0.0 }
 0x10e   :  { %v1328_v18 = vpop.f32.mrf.mxu0  ;;  %v1420_v19 = vpop.f32.mrf.mxu1 }
 0x10f   :  { %1188 = vst [vmem:[%s1901_s3] sm:$0xff] %v1187_v13   ;;  %v742_v23 = vadd.f32 %v1420_v19, %v581_v17  ;;  %v845_v41 = vmax.f32 %v731_v22, 0.0  ;;  %v594_v46 = vadd.f32 %v1327_v20, %v1800_v44 }
 0x110   :  { %v1329_v27 = vpop.f32.mrf.mxu0  ;;  %v733_v28 = vpop.f32.mrf.mxu1 }
 0x111   :  { %v848_v30 = vmax.f32 %v742_v23, 0.0  ;;  %v1330_v32 = vadd.f32 %v1329_v27, %v1328_v18  ;;  %v734_v34 = vadd.f32 %v733_v28, %v573_v24 }
 0x112   :  { %v1331_v38 = vpop.f32.mrf.mxu0  ;;  %v1423_v39 = vpop.f32.mrf.mxu1 }
 0x113   :  { %v1202_v42 = vpack.c.bf16 %v848_v30, %v847_v29  ;;  %v846_v45 = vmax.f32 %v734_v34, 0.0  ;;  %v755_v48 = vadd.f32 %v1423_v39, %v594_v46  ;;  %v597_v51 = vadd.f32 %v1330_v32, %v1800_v44 }
 0x114   :  { %v1332_v47 = vpop.f32.mrf.mxu0  ;;  %v746_v49 = vpop.f32.mrf.mxu1 }
 0x115   :  { %1266 = vst [vmem:[%s1901_s3 + $0x18] sm:$0xff] %v1202_v42   ;;  %v1197_v43 = vpack.c.bf16 %v846_v45, %v845_v41  ;;  %v747_v54 = vadd.f32 %v746_v49, %v586_v50  ;;  %v851_v59 = vmax.f32 %v755_v48, 0.0  ;;  %v1333_v60 = vadd.f32 %v1332_v47, %v1331_v38 }
 0x116   :  { %v1334_v52 = vpop.f32.mrf.mxu0  ;;  %v1424_v53 = vpop.f32.mrf.mxu1 }
 0x117   :  { %1265 = vst [vmem:[%s1901_s3 + $0x10] sm:$0xff] %v1197_v43   ;;  %v758_v55 = vadd.f32 %v1424_v53, %v597_v51  ;;  %v849_v1 = vmax.f32 %v747_v54, 0.0  ;;  %v602_v10 = vadd.f32 %v1333_v60, %v1800_v44 }
 0x118   :  { %v1335_v57 = vpop.f32.mrf.mxu0  ;;  %v749_v58 = vpop.f32.mrf.mxu1 }
 0x119   :  { %v852_v61 = vmax.f32 %v758_v55, 0.0  ;;  %v750_v62 = vadd.f32 %v749_v58, %v589_v56  ;;  %v1336_v3 = vadd.f32 %v1335_v57, %v1334_v52 }
 0x11a   :  { %v1337_v63 = vpop.f32.mrf.mxu0  ;;  %v1427_v0 = vpop.f32.mrf.mxu1 }
 0x11b   :  { %v1212_v2 = vpack.c.bf16 %v852_v61, %v851_v59  ;;  %v850_v4 = vmax.f32 %v750_v62, 0.0  ;;  %v605_v17 = vadd.f32 %v1336_v3, %v1800_v44 }
 0x11c   :  { %v1338_v5 = vpop.f32.mrf.mxu0  ;;  %v762_v7 = vpop.f32.mrf.mxu1 }
 0x11d   :  { %1268 = vst [vmem:[%s1901_s3 + $0x28] sm:$0xff] %v1212_v2   ;;  %v1207_v8 = vpack.c.bf16 %v850_v4, %v849_v1  ;;  %v1339_v9 = vadd.f32 %v1338_v5, %v1337_v63  ;;  %v763_v15 = vadd.f32 %v762_v7, %v602_v10 }
 0x11e   :  { %v1340_v12 = vpop.f32.mrf.mxu0  ;;  %v1428_v13 = vpop.f32.mrf.mxu1 }
 0x11f   :  { %1267 = vst [vmem:[%s1901_s3 + $0x20] sm:$0xff] %v1207_v8   ;;  %v610_v14 = vadd.f32 %v1339_v9, %v1800_v44  ;;  %v853_v27 = vmax.f32 %v763_v15, 0.0  ;;  %v658_v8 = vadd.f32 %v1781_v16, %v1800_v44  ;;  %v661_v15 = vadd.f32 %v1783_v21, %v1800_v44 }
 0x120   :  { %v1341_v18 = vpop.f32.mrf.mxu0  ;;  %v765_v19 = vpop.f32.mrf.mxu1  ;;  %v653_v21 = vadd.f32 %v1779_v11, %v1800_v44 }
 0x121   :  { %v1342_v20 = vadd.f32 %v1341_v18, %v1340_v12  ;;  %v766_v22 = vadd.f32 %v765_v19, %v605_v17  ;;  %v771_v25 = vadd.f32 %v1427_v0, %v610_v14  ;;  %v1387_v17 = vadd.f32 %v1791_v35, %v1789_v33 }
 0x122   :  { %v1343_v23 = vpop.f32.mrf.mxu0  ;;  %v1431_v24 = vpop.f32.mrf.mxu1  ;;  %v650_v18 = vadd.f32 %v1777_v6, %v1800_v44 }
 0x123   :  { %v613_v28 = vadd.f32 %v1342_v20, %v1800_v44  ;;  %v854_v29 = vmax.f32 %v766_v22, 0.0  ;;  %v855_v42 = vmax.f32 %v771_v25, 0.0  ;;  %v1390_v25 = vadd.f32 %v1795_v40, %v1793_v37 }
 0x124   :  { %v1344_v30 = vpop.f32.mrf.mxu0  ;;  %v778_v32 = vpop.f32.mrf.mxu1  ;;  %v674_v40 = vadd.f32 %v1387_v17, %v1800_v44 }
 0x125   :  { %v774_v34 = vadd.f32 %v1428_v13, %v613_v28  ;;  %v1217_v36 = vpack.c.bf16 %v854_v29, %v853_v27  ;;  %v1345_v38 = vadd.f32 %v1344_v30, %v1343_v23 }
 0x126   :  { %v1346_v39 = vpop.f32.mrf.mxu0  ;;  %v1432_v41 = vpop.f32.mrf.mxu1 }
 0x127   :  { %v856_v45 = vmax.f32 %v774_v34, 0.0  ;;  %1269 = vst [vmem:[%s1901_s3 + $0x30] sm:$0xff] %v1217_v36   ;;  %v618_v46 = vadd.f32 %v1345_v38, %v1800_v44 }
 0x128   :  { %v1347_v47 = vpop.f32.mrf.mxu0  ;;  %v781_v49 = vpop.f32.mrf.mxu1 }
 0x129   :  { %v1222_v43 = vpack.c.bf16 %v856_v45, %v855_v42  ;;  %v1348_v48 = vadd.f32 %v1347_v47, %v1346_v39  ;;  %v779_v52 = vadd.f32 %v778_v32, %v618_v46 }
 0x12a   :  { %v1349_v50 = vpop.f32.mrf.mxu0  ;;  %v1840_v51 = vpop.f32.mrf.mxu1 }
 0x12b   :  { %1270 = vst [vmem:[%s1901_s3 + $0x38] sm:$0xff] %v1222_v43   ;;  %v621_v53 = vadd.f32 %v1348_v48, %v1800_v44  ;;  %v857_v60 = vmax.f32 %v779_v52, 0.0  ;;  %v677_v43 = vadd.f32 %v1390_v25, %v1800_v44 }
 0x12c   :  { %v1350_v54 = vpop.f32.mrf.mxu0  ;;  %v794_v55 = vpop.f32.mrf.mxu1 }
 0x12d   :  { %v782_v56 = vadd.f32 %v781_v49, %v621_v53  ;;  %v1351_v57 = vadd.f32 %v1350_v54, %v1349_v50  ;;  %v666_v50 = vadd.f32 %v1785_v26, %v1800_v44 }
 0x12e   :  { %v1352_v58 = vpop.f32.mrf.mxu0  ;;  %v1846_v59 = vpop.f32.mrf.mxu1 }
 0x12f   :  { %v858_v61 = vmax.f32 %v782_v56, 0.0  ;;  %v626_v62 = vadd.f32 %v1351_v57, %v1800_v44 }
 0x130   :  { %v1353_v63 = vpop.f32.mrf.mxu0  ;;  %v797_v0 = vpop.f32.mrf.mxu1 }
 0x131   :  { %v1227_v1 = vpack.c.bf16 %v858_v61, %v857_v60  ;;  %v1354_v2 = vadd.f32 %v1353_v63, %v1352_v58  ;;  %v787_v5 = vadd.f32 %v1431_v24, %v626_v62  ;;  %v669_v61 = vadd.f32 %v1787_v31, %v1800_v44 }
 0x132   :  { %v1355_v3 = vpop.f32.mrf.mxu0  ;;  %v1439_v4 = vpop.f32.mrf.mxu1 }
 0x133   :  { %1271 = vst [vmem:[%s1901_s3 + $0x40] sm:$0xff] %v1227_v1   ;;  %v629_v7 = vadd.f32 %v1354_v2, %v1800_v44  ;;  %v819_v13 = vadd.f32 %v1439_v4, %v658_v8  ;;  %v859_v22 = vmax.f32 %v787_v5, 0.0 }
 0x134   :  { %v1356_v9 = vpop.f32.mrf.mxu0  ;;  %v810_v10 = vpop.f32.mrf.mxu1 }
 0x135   :  { %v790_v12 = vadd.f32 %v1432_v41, %v629_v7  ;;  %v1357_v14 = vadd.f32 %v1356_v9, %v1355_v3  ;;  %v811_v27 = vadd.f32 %v810_v10, %v650_v18  ;;  %v867_v35 = vmax.f32 %v819_v13, 0.0 }
 0x136   :  { %v1358_v19 = vpop.f32.mrf.mxu0  ;;  %v1440_v20 = vpop.f32.mrf.mxu1 }
 0x137   :  { %v860_v23 = vmax.f32 %v790_v12, 0.0  ;;  %v634_v16 = vadd.f32 %v1357_v14, %v1800_v44  ;;  %v822_v24 = vadd.f32 %v1440_v20, %v661_v15  ;;  %v865_v41 = vmax.f32 %v811_v27, 0.0 }
 0x138   :  { %v1359_v28 = vpop.f32.mrf.mxu0  ;;  %v813_v29 = vpop.f32.mrf.mxu1 }
 0x139   :  { %v1232_v33 = vpack.c.bf16 %v860_v23, %v859_v22  ;;  %v868_v30 = vmax.f32 %v822_v24, 0.0  ;;  %v1360_v6 = vadd.f32 %v1359_v28, %v1358_v19  ;;  %v814_v32 = vadd.f32 %v813_v29, %v653_v21 }
 0x13a   :  { %v1361_v34 = vpop.f32.mrf.mxu0  ;;  %v1443_v36 = vpop.f32.mrf.mxu1  ;;  %v795_v38 = vadd.f32 %v794_v55, %v634_v16 }
 0x13b   :  { %1272 = vst [vmem:[%s1901_s3 + $0x48] sm:$0xff] %v1232_v33   ;;  %v1252_v39 = vpack.c.bf16 %v868_v30, %v867_v35  ;;  %v637_v37 = vadd.f32 %v1360_v6, %v1800_v44  ;;  %v866_v11 = vmax.f32 %v814_v32, 0.0  ;;  %v835_v47 = vadd.f32 %v1443_v36, %v674_v40 }
 0x13c   :  { %v1362_v42 = vpop.f32.mrf.mxu0  ;;  %v826_v45 = vpop.f32.mrf.mxu1  ;;  %v861_v54 = vmax.f32 %v795_v38, 0.0 }
 0x13d   :  { %1276 = vst [vmem:[%s1901_s3 + $0x68] sm:$0xff] %v1252_v39   ;;  %v798_v46 = vadd.f32 %v797_v0, %v637_v37  ;;  %v1363_v49 = vadd.f32 %v1362_v42, %v1361_v34  ;;  %v1247_v48 = vpack.c.bf16 %v866_v11, %v865_v41  ;;  %v827_v58 = vadd.f32 %v826_v45, %v666_v50 }
 0x13e   :  { %v1364_v52 = vpop.f32.mrf.mxu0  ;;  %v1444_v53 = vpop.f32.mrf.mxu1  ;;  %v871_v0 = vmax.f32 %v835_v47, 0.0 }
 0x13f   :  { %v862_v55 = vmax.f32 %v798_v46, 0.0  ;;  %v642_v56 = vadd.f32 %v1363_v49, %v1800_v44  ;;  %v838_v57 = vadd.f32 %v1444_v53, %v677_v43  ;;  %1275 = vst [vmem:[%s1901_s3 + $0x60] sm:$0xff] %v1247_v48   ;;  %v869_v7 = vmax.f32 %v827_v58, 0.0 }
 0x140   :  { %v1365_v60 = vpop.f32.mrf.mxu0  ;;  %v829_v62 = vpop.f32.mrf.mxu1 }
 0x141   :  { %v1237_v63 = vpack.c.bf16 %v862_v55, %v861_v54  ;;  %v872_v26 = vmax.f32 %v838_v57, 0.0  ;;  %v1366_v1 = vadd.f32 %v1365_v60, %v1364_v52  ;;  %v830_v2 = vadd.f32 %v829_v62, %v669_v61 }
 0x142   :  { %v803_v3 = vadd.f32 %v1840_v51, %v642_v56 }
 0x143   :  { %1273 = vst [vmem:[%s1901_s3 + $0x50] sm:$0xff] %v1237_v63   ;;  %v1262_v4 = vpack.c.bf16 %v872_v26, %v871_v0  ;;  %v645_v5 = vadd.f32 %v1366_v1, %v1800_v44  ;;  %v870_v8 = vmax.f32 %v830_v2, 0.0 }
 0x144   :  { %v863_v10 = vmax.f32 %v803_v3, 0.0 }
 0x145   :  { %1278 = vst [vmem:[%s1901_s3 + $0x78] sm:$0xff] %v1262_v4   ;;  %v806_v31 = vadd.f32 %v1846_v59, %v645_v5  ;;  %v1257_v9 = vpack.c.bf16 %v870_v8, %v869_v7 }
 0x147   :  { %v864_v12 = vmax.f32 %v806_v31, 0.0  ;;  %1277 = vst [vmem:[%s1901_s3 + $0x70] sm:$0xff] %v1257_v9  }
 0x149   :  { %v1242_v13 = vpack.c.bf16 %v864_v12, %v863_v10 }
 0x14b   :  { %1274 = vst [vmem:[%s1901_s3 + $0x58] sm:$0xff] %v1242_v13  }

// kernel: vae_forward.13
= control target key start
LH: loop header
LB: loop body
LE: loop exit
PB: predicated region body
PF: predicated region fallthrough
CT: control target
= control target key end

     0   :  { %s2915_s12 = smov 0   ;;  %s3503_s0 = inlined_call_operand.vmem [shape: bf16[1024,288], index: 0, kind: input, shape index: {}]   ;;  %s3504_s1 = inlined_call_operand.vmem [shape: bf16[288,4], index: 1, kind: input, shape index: {}]   ;;  %s3505_s2 = inlined_call_operand.vmem [shape: f32[1,4], index: 2, kind: input, shape index: {}]   ;;  %s3506_s3 = inlined_call_operand.vmem [shape: f32[1024,4], index: 3, kind: output, shape index: {}]  }
   0x1 LB: > { %s2117_s13 = sadd.s32 4294967295, %s2892_s12   ;;  %p2121_p0 = scmp.ge.s32.totalorder %s2892_s12, 1  ;;  %s2892_s12 = sphi %s2915_s12, %s13_s12  }
   0x2   : > { %p139_p1 = scmp.lt.s32.totalorder %s2892_s12, 3 }
   0x4   : > { %p140_p2 = pnand %p2121_p0, %p139_p1 }
   0x5   : > { %s2122_s16 = sshll.u32 (!%p140_p2), %s2117_s13, 6 }
   0x6   : > { %143 = sbr.rel (%p140_p2) target bundleno = 507 (0x1fb), region = 32  ;;  %p165_p3 = scmp.lt.s32.totalorder (!%p140_p2), %s2122_s16, 127 }
   0xb   : > { %v2483_v0 = vld [vmem:[%s3504_s1 + $0x38] sm:$0xff]   ;;  %v2894_v1 = vmov 0   ;;  %v2484_v2 = vld [vmem:[%s3504_s1 + $0x30] sm:$0xff]   ;;  %v2485_v3 = vld [vmem:[%s3504_s1 + $0x28] sm:$0xff]   ;;  %s3508_s16 = smov (!%p165_p3, %s2122_s16), 127  ;;  %vm937_vm0 = vcmask 261120  }
   0xc   : > { %1034 = vmatprep.subr.bf16.mxu0 %v2894_v1  ;;  %2441 = vmatprep.subr.bf16.mxu1 %v2894_v1  ;;  %v2486_v4 = vld [vmem:[%s3504_s1 + $0x20] sm:$0xff]   ;;  %s2473_s23 = smul.u32 12, %s3508_s16  ;;  %v2487_v5 = vld [vmem:[%s3504_s1 + $0x18] sm:$0xff]   ;;  %v2488_v7 = vld [vmem:[%s3504_s1 + $0x10] sm:$0xff]   ;;  %s2125_s5 = sshll.u32 %s3508_s16, 3  ;;  %vm1996_vm1 = vcmask 31744  }
   0xd   : > { %1035 = vmatpush1.bf16.msra.mxu0 %v2483_v0  ;;  %2457 = vmatpush1.bf16.msra.mxu1 %v2483_v0  ;;  %v2489_v9 = vld [vmem:[%s3504_s1 + $0x8] sm:$0xff]   ;;  %v2490_v10 = vld [vmem:[%s3504_s1] sm:$0xff]   ;;  %v2491_v11 = vld [vmem:[%s3504_s1 + $0x78] sm:$0xff]   ;;  %s3257_s8 = scalar_lea.vmem %s3506_s3, %s2125_s5 }
   0xe   : > { %1036 = vmatprep.subr.bf16.mxu0 %v2894_v1  ;;  %2442 = vmatprep.subr.bf16.mxu1 %v2894_v1  ;;  %s2952_s28 = scalar_lea.vmem %s3503_s0, %s2473_s23  ;;  %v2492_v12 = vld [vmem:[%s3504_s1 + $0x70] sm:$0xff]   ;;  %v2493_v13 = vld [vmem:[%s3504_s1 + $0x68] sm:$0xff]   ;;  %v2494_v14 = vld [vmem:[%s3504_s1 + $0x60] sm:$0xff]  }
   0xf   : > { %v2501_v6 = vld [vmem:[%s2952_s28 + $0x4] ss:$12 sps:$4 sm:$0xff]   ;;  %v2495_v15 = vld [vmem:[%s3504_s1 + $0x58] sm:$0xff]   ;;  %v2497_v17 = vld [vmem:[%s3504_s1 + $0x48] sm:$0xff]  }
  0x10   : > { %v2504_v8 = vld [vmem:[%s2952_s28 + $0x244] ss:$12 sps:$4 sm:$0xff]   ;;  %1066 = vmatprep.mubr.bf16.mxu0 %v2501_v6  ;;  %v2505_v19 = vld [vmem:[%s3504_s1 + $0x88] sm:$0xff]   ;;  %v2512_v27 = vld [vmem:[%s2952_s28 + $0x34] ss:$12 sps:$4 sm:$0xff]  }
  0x11   : > { %1037 = vmatpush1.bf16.msra.mxu0 %v2484_v2  ;;  %2458 = vmatpush1.bf16.msra.mxu1 %v2484_v2  ;;  %v2496_v16 = vld [vmem:[%s3504_s1 + $0x50] sm:$0xff]   ;;  %v2498_v18 = vld [vmem:[%s3504_s1 + $0x40] sm:$0xff]   ;;  %v2506_v22 = vld [vmem:[%s2952_s28 + $0x1c] ss:$12 sps:$4 sm:$0xff]  }
  0x12   : > { %1038 = vmatprep.subr.bf16.mxu0 %v2894_v1  ;;  %2443 = vmatprep.subr.bf16.mxu1 %v2894_v1  ;;  %v2499_v20 = vld [vmem:[%s2952_s28] ss:$12 sps:$4 sm:$0xff]   ;;  %v2508_v23 = vld [vmem:[%s2952_s28 + $0x25c] ss:$12 sps:$4 sm:$0xff]   ;;  %v2510_v25 = vld [vmem:[%s2952_s28 + $0x18] ss:$12 sps:$4 sm:$0xff]  }
  0x13   : > { %1258 = vmatprep.mubr.bf16.mxu1 %v2504_v8  ;;  %v2502_v21 = vld [vmem:[%s2952_s28 + $0x240] ss:$12 sps:$4 sm:$0xff]   ;;  %v2511_v26 = vld [vmem:[%s2952_s28 + $0x258] ss:$12 sps:$4 sm:$0xff]   ;;  %v2516_v29 = vld [vmem:[%s2952_s28 + $0x30] ss:$12 sps:$4 sm:$0xff]  }
  0x14   : > { %v2530_v24 = vld [vmem:[%s3504_s1 + $0x80] sm:$0xff]   ;;  %v2517_v30 = vld [vmem:[%s2952_s28 + $0x270] ss:$12 sps:$4 sm:$0xff]   ;;  %v2518_v31 = vld [vmem:[%s2952_s28 + $0x4c] ss:$12 sps:$4 sm:$0xff]  }
  0x15   : > { %1039 = vmatpush1.bf16.msra.mxu0 %v2485_v3  ;;  %2459 = vmatpush1.bf16.msra.mxu1 %v2485_v3  ;;  %v2514_v28 = vld [vmem:[%s2952_s28 + $0x274] ss:$12 sps:$4 sm:$0xff]   ;;  %v2520_v32 = vld [vmem:[%s2952_s28 + $0x28c] ss:$12 sps:$4 sm:$0xff]   ;;  %v2524_v35 = vld [vmem:[%s2952_s28 + $0x64] ss:$12 sps:$4 sm:$0xff]  }
  0x16   : > { %1040 = vmatprep.subr.bf16.mxu0 %v2894_v1  ;;  %2444 = vmatprep.subr.bf16.mxu1 %v2894_v1  ;;  %v2522_v33 = vld [vmem:[%s2952_s28 + $0x48] ss:$12 sps:$4 sm:$0xff]   ;;  %v2526_v36 = vld [vmem:[%s2952_s28 + $0x2a4] ss:$12 sps:$4 sm:$0xff]   ;;  %v2528_v37 = vld [vmem:[%s2952_s28 + $0x60] ss:$12 sps:$4 sm:$0xff]  }
  0x17   : > { %v2523_v34 = vld [vmem:[%s2952_s28 + $0x288] ss:$12 sps:$4 sm:$0xff]   ;;  %v2529_v38 = vld [vmem:[%s2952_s28 + $0x2a0] ss:$12 sps:$4 sm:$0xff]   ;;  %v2535_v41 = vld [vmem:[%s2952_s28 + $0x78] ss:$12 sps:$4 sm:$0xff]  }
  0x18   : > { %v2531_v39 = vld [vmem:[%s2952_s28 + $0x7c] ss:$12 sps:$4 sm:$0xff]   ;;  %v2536_v42 = vld [vmem:[%s2952_s28 + $0x2b8] ss:$12 sps:$4 sm:$0xff]   ;;  %v2537_v43 = vld [vmem:[%s2952_s28 + $0x94] ss:$12 sps:$4 sm:$0xff]  }
  0x19   : > { %1041 = vmatpush1.bf16.msra.mxu0 %v2486_v4  ;;  %2460 = vmatpush1.bf16.msra.mxu1 %v2486_v4  ;;  %v2533_v40 = vld [vmem:[%s2952_s28 + $0x2bc] ss:$12 sps:$4 sm:$0xff]   ;;  %v2539_v44 = vld [vmem:[%s2952_s28 + $0x2d4] ss:$12 sps:$4 sm:$0xff]   ;;  %v2543_v47 = vld [vmem:[%s2952_s28 + $0xac] ss:$12 sps:$4 sm:$0xff]  }
  0x1a   : > { %1042 = vmatprep.subr.bf16.mxu0 %v2894_v1  ;;  %2445 = vmatprep.subr.bf16.mxu1 %v2894_v1  ;;  %v2541_v45 = vld [vmem:[%s2952_s28 + $0x90] ss:$12 sps:$4 sm:$0xff]   ;;  %v2545_v48 = vld [vmem:[%s2952_s28 + $0x2ec] ss:$12 sps:$4 sm:$0xff]   ;;  %v2547_v49 = vld [vmem:[%s2952_s28 + $0xa8] ss:$12 sps:$4 sm:$0xff]  }
  0x1b   : > { %v2542_v46 = vld [vmem:[%s2952_s28 + $0x2d0] ss:$12 sps:$4 sm:$0xff]   ;;  %v2548_v50 = vld [vmem:[%s2952_s28 + $0x2e8] ss:$12 sps:$4 sm:$0xff]   ;;  %v2552_v53 = vld [vmem:[%s2952_s28 + $0xc0] ss:$12 sps:$4 sm:$0xff]  }
  0x1c   : > { %v2549_v51 = vld [vmem:[%s2952_s28 + $0xc4] ss:$12 sps:$4 sm:$0xff]   ;;  %v2551_v52 = vld [vmem:[%s2952_s28 + $0x8] ss:$12 sps:$4 sm:$0xff]   ;;  %v2553_v54 = vld [vmem:[%s2952_s28 + $0x20] ss:$12 sps:$4 sm:$0xff]  }
  0x1d   : > { %1043 = vmatpush1.bf16.msra.mxu0 %v2487_v5  ;;  %2461 = vmatpush1.bf16.msra.mxu1 %v2487_v5  ;;  %v2554_v55 = vld [vmem:[%s2952_s28 + $0xdc] ss:$12 sps:$4 sm:$0xff]   ;;  %v2556_v56 = vld [vmem:[%s2952_s28 + $0x38] ss:$12 sps:$4 sm:$0xff]   ;;  %v2559_v59 = vld [vmem:[%s2952_s28 + $0xf4] ss:$12 sps:$4 sm:$0xff]  }
  0x1e   : > { %1044 = vmatprep.subr.bf16.mxu0 %v2894_v1  ;;  %2446 = vmatprep.subr.bf16.mxu1 %v2894_v1  ;;  %v2557_v57 = vld [vmem:[%s2952_s28 + $0xd8] ss:$12 sps:$4 sm:$0xff]   ;;  %v2558_v58 = vld [vmem:[%s2952_s28 + $0x50] ss:$12 sps:$4 sm:$0xff]   ;;  %v2561_v60 = vld [vmem:[%s2952_s28 + $0x68] ss:$12 sps:$4 sm:$0xff]  }
  0x1f   : > { %v2562_v61 = vld [vmem:[%s2952_s28 + $0xf0] ss:$12 sps:$4 sm:$0xff]   ;;  %v2563_v62 = vld [vmem:[%s2952_s28 + $0x80] ss:$12 sps:$4 sm:$0xff]   ;;  %v2566_v0 = vld [vmem:[%s2952_s28 + $0x98] ss:$12 sps:$4 sm:$0xff]  }
  0x20   : > { %v2564_v63 = vld [vmem:[%s2952_s28 + $0x10c] ss:$12 sps:$4 sm:$0xff]   ;;  %v2568_v2 = vld [vmem:[%s2952_s28 + $0xb0] ss:$12 sps:$4 sm:$0xff]   ;;  %v2571_v4 = vld [vmem:[%s2952_s28 + $0xc8] ss:$12 sps:$4 sm:$0xff]  }
  0x21   : > { %1045 = vmatpush1.bf16.msra.mxu0 %v2488_v7  ;;  %2462 = vmatpush1.bf16.msra.mxu1 %v2488_v7  ;;  %v2569_v3 = vld [vmem:[%s2952_s28 + $0x124] ss:$12 sps:$4 sm:$0xff]   ;;  %v2572_v5 = vld [vmem:[%s2952_s28 + $0x120] ss:$12 sps:$4 sm:$0xff]   ;;  %v2574_v7 = vld [vmem:[%s2952_s28 + $0x13c] ss:$12 sps:$4 sm:$0xff]  }
  0x22   : > { %1046 = vmatprep.subr.bf16.mxu0 %v2894_v1  ;;  %2447 = vmatprep.subr.bf16.mxu1 %v2894_v1  ;;  %v2573_v6 = vld [vmem:[%s2952_s28 + $0xe0] ss:$12 sps:$4 sm:$0xff]   ;;  %v2576_v8 = vld [vmem:[%s2952_s28 + $0xf8] ss:$12 sps:$4 sm:$0xff]  }
  0x25   : > { %1047 = vmatpush1.bf16.msra.mxu0 %v2489_v9  ;;  %2463 = vmatpush1.bf16.msra.mxu1 %v2489_v9  ;;  %v2577_v9 = vld [vmem:[%s2952_s28 + $0x138] ss:$12 sps:$4 sm:$0xff]  }
  0x26   : > { %1048 = vmatprep.subr.bf16.mxu0 %v2894_v1  ;;  %2448 = vmatprep.subr.bf16.mxu1 %v2894_v1 }
  0x29   : > { %1049 = vmatpush1.bf16.msra.mxu0 %v2490_v10  ;;  %2464 = vmatpush1.bf16.msra.mxu1 %v2490_v10  ;;  %v2578_v10 = vld [vmem:[%s2952_s28 + $0x110] ss:$12 sps:$4 sm:$0xff]  }
  0x2a   : > { %1050 = vmatprep.subr.bf16.mxu0 %v2894_v1  ;;  %2449 = vmatprep.subr.bf16.mxu1 %v2894_v1 }
  0x2d   : > { %1051 = vmatpush2.bf16.msra.mxu0 %v2491_v11  ;;  %2465 = vmatpush2.bf16.msra.mxu1 %v2491_v11  ;;  %v2579_v11 = vld [vmem:[%s2952_s28 + $0x154] ss:$12 sps:$4 sm:$0xff]  }
  0x2e   : > { %1052 = vmatprep.subr.bf16.mxu0 %v2894_v1  ;;  %2450 = vmatprep.subr.bf16.mxu1 %v2894_v1 }
  0x31   : > { %1053 = vmatpush2.bf16.msra.mxu0 %v2492_v12  ;;  %2466 = vmatpush2.bf16.msra.mxu1 %v2492_v12  ;;  %v2581_v12 = vld [vmem:[%s2952_s28 + $0x128] ss:$12 sps:$4 sm:$0xff]  }
  0x32   : > { %1054 = vmatprep.subr.bf16.mxu0 %v2894_v1  ;;  %2451 = vmatprep.subr.bf16.mxu1 %v2894_v1 }
  0x35   : > { %1055 = vmatpush2.bf16.msra.mxu0 %v2493_v13  ;;  %2467 = vmatpush2.bf16.msra.mxu1 %v2493_v13  ;;  %v2582_v13 = vld [vmem:[%s2952_s28 + $0x150] ss:$12 sps:$4 sm:$0xff]  }
  0x36   : > { %1056 = vmatprep.subr.bf16.mxu0 %v2894_v1  ;;  %2452 = vmatprep.subr.bf16.mxu1 %v2894_v1 }
  0x39   : > { %1057 = vmatpush2.bf16.msra.mxu0 %v2494_v14  ;;  %2468 = vmatpush2.bf16.msra.mxu1 %v2494_v14  ;;  %v2583_v14 = vld [vmem:[%s2952_s28 + $0x140] ss:$12 sps:$4 sm:$0xff]  }
  0x3a   : > { %1058 = vmatprep.subr.bf16.mxu0 %v2894_v1  ;;  %2453 = vmatprep.subr.bf16.mxu1 %v2894_v1 }
  0x3d   : > { %1059 = vmatpush2.bf16.msra.mxu0 %v2495_v15  ;;  %2469 = vmatpush2.bf16.msra.mxu1 %v2495_v15  ;;  %v2584_v15 = vld [vmem:[%s2952_s28 + $0x16c] ss:$12 sps:$4 sm:$0xff]  }
  0x3e   : > { %1060 = vmatprep.subr.bf16.mxu0 %v2894_v1  ;;  %2454 = vmatprep.subr.bf16.mxu1 %v2894_v1 }
  0x41   : > { %1061 = vmatpush2.bf16.msra.mxu0 %v2496_v16  ;;  %2470 = vmatpush2.bf16.msra.mxu1 %v2496_v16  ;;  %v2586_v16 = vld [vmem:[%s2952_s28 + $0x158] ss:$12 sps:$4 sm:$0xff]  }
  0x42   : > { %1062 = vmatprep.subr.bf16.mxu0 %v2894_v1  ;;  %2455 = vmatprep.subr.bf16.mxu1 %v2894_v1 }
  0x45   : > { %1063 = vmatpush2.bf16.msra.mxu0 %v2497_v17  ;;  %2471 = vmatpush2.bf16.msra.mxu1 %v2497_v17  ;;  %v2587_v17 = vld [vmem:[%s2952_s28 + $0x168] ss:$12 sps:$4 sm:$0xff]  }
  0x46   : > { %1064 = vmatprep.subr.bf16.mxu0 %v2894_v1  ;;  %2456 = vmatprep.subr.bf16.mxu1 %v2894_v1  ;;  %v2567_v1 = vld [vmem:[%s2952_s28 + $0x108] ss:$12 sps:$4 sm:$0xff]  }
  0x49   : > { %1065 = vmatpush2.bf16.msra.mxu0 %v2498_v18  ;;  %2472 = vmatpush2.bf16.msra.mxu1 %v2498_v18  ;;  %v2588_v18 = vld [vmem:[%s2952_s28 + $0x170] ss:$12 sps:$4 sm:$0xff]  }
  0x4a   : > { %2373 = vmatprep.subr.bf16.mxu1 %v2505_v19 }
  0x4c   : > { %1067 = vmatmul.mubr.bf16.vlgmr.msra.gmra.mxu0 %v2499_v20  ;;  %1259 = vmatmul.mubr.bf16.vlgmr.msra.gmra.mxu1 %v2502_v21  ;;  %v2591_v20 = vld [vmem:[%s2952_s28 + $0x188] ss:$12 sps:$4 sm:$0xff]   ;;  %v2592_v21 = vld [vmem:[%s2952_s28 + $0x180] ss:$12 sps:$4 sm:$0xff]  }
  0x4d   : > { %2374 = vmatpush3.bf16.msra.mxu1 %v2505_v19  ;;  %1074 = vmatprep.mubr.bf16.mxu0 %v2506_v22  ;;  %v2589_v19 = vld [vmem:[%s2952_s28 + $0x184] ss:$12 sps:$4 sm:$0xff]   ;;  %v2593_v22 = vld [vmem:[%s2952_s28 + $0x1a0] ss:$12 sps:$4 sm:$0xff]  }
  0x4e   : > { %1266 = vmatprep.mubr.bf16.mxu1 %v2508_v23  ;;  %2375 = vmatprep.subr.bf16.mxu1 %v2530_v24  ;;  %v2594_v23 = vld [vmem:[%s2952_s28 + $0x19c] ss:$12 sps:$4 sm:$0xff]  }
  0x51   : > { %2376 = vmatpush3.bf16.msra.mxu1 %v2530_v24  ;;  %v2596_v24 = vld [vmem:[%s2952_s28 + $0x1b8] ss:$12 sps:$4 sm:$0xff]  }
  0x54   : > { %1075 = vmatmul.mubr.bf16.gmra.mxu0 %v2510_v25  ;;  %1267 = vmatmul.mubr.bf16.gmra.mxu1 %v2511_v26  ;;  %v2597_v25 = vld [vmem:[%s2952_s28 + $0x198] ss:$12 sps:$4 sm:$0xff]   ;;  %v2598_v26 = vld [vmem:[%s2952_s28 + $0x1d0] ss:$12 sps:$4 sm:$0xff]  }
  0x55   : > { %1082 = vmatprep.mubr.bf16.mxu0 %v2512_v27  ;;  %1274 = vmatprep.mubr.bf16.mxu1 %v2514_v28  ;;  %v2599_v27 = vld [vmem:[%s2952_s28 + $0x1b4] ss:$12 sps:$4 sm:$0xff]  }
  0x56   : > { %v2601_v28 = vld [vmem:[%s2952_s28 + $0x1e8] ss:$12 sps:$4 sm:$0xff]  }
  0x5c   : > { %1083 = vmatmul.mubr.bf16.gmra.mxu0 %v2516_v29  ;;  %1275 = vmatmul.mubr.bf16.gmra.mxu1 %v2517_v30  ;;  %v2602_v29 = vld [vmem:[%s2952_s28 + $0x1b0] ss:$12 sps:$4 sm:$0xff]   ;;  %v2603_v30 = vld [vmem:[%s2952_s28 + $0x200] ss:$12 sps:$4 sm:$0xff]  }
  0x5d   : > { %1090 = vmatprep.mubr.bf16.mxu0 %v2518_v31  ;;  %1282 = vmatprep.mubr.bf16.mxu1 %v2520_v32  ;;  %v2604_v31 = vld [vmem:[%s2952_s28 + $0x1cc] ss:$12 sps:$4 sm:$0xff]  }
  0x5e   : > { %v2606_v32 = vld [vmem:[%s2952_s28 + $0x218] ss:$12 sps:$4 sm:$0xff]  }
  0x64   : > { %1091 = vmatmul.mubr.bf16.gmra.mxu0 %v2522_v33  ;;  %1283 = vmatmul.mubr.bf16.gmra.mxu1 %v2523_v34  ;;  %v2607_v33 = vld [vmem:[%s2952_s28 + $0x1c8] ss:$12 sps:$4 sm:$0xff]   ;;  %v2608_v34 = vld [vmem:[%s2952_s28 + $0x230] ss:$12 sps:$4 sm:$0xff]  }
  0x65   : > { %1098 = vmatprep.mubr.bf16.mxu0 %v2524_v35  ;;  %1290 = vmatprep.mubr.bf16.mxu1 %v2526_v36  ;;  %v2609_v35 = vld [vmem:[%s2952_s28 + $0x1e4] ss:$12 sps:$4 sm:$0xff]   ;;  %v2611_v36 = vld [vmem:[%s2952_s28 + $0x248] ss:$12 sps:$4 sm:$0xff]  }
  0x6c   : > { %1099 = vmatmul.mubr.bf16.gmra.mxu0 %v2528_v37  ;;  %1291 = vmatmul.mubr.bf16.gmra.mxu1 %v2529_v38  ;;  %v2612_v37 = vld [vmem:[%s2952_s28 + $0x1e0] ss:$12 sps:$4 sm:$0xff]  }
  0x6d   : > { %1106 = vmatprep.mubr.bf16.mxu0 %v2531_v39  ;;  %1298 = vmatprep.mubr.bf16.mxu1 %v2533_v40  ;;  %v2613_v38 = vld [vmem:[%s2952_s28 + $0x260] ss:$12 sps:$4 sm:$0xff]   ;;  %v2614_v39 = vld [vmem:[%s2952_s28 + $0x1fc] ss:$12 sps:$4 sm:$0xff]   ;;  %v2616_v40 = vld [vmem:[%s2952_s28 + $0x278] ss:$12 sps:$4 sm:$0xff]  }
  0x74   : > { %1107 = vmatmul.mubr.bf16.gmra.mxu0 %v2535_v41  ;;  %1299 = vmatmul.mubr.bf16.gmra.mxu1 %v2536_v42  ;;  %v2617_v41 = vld [vmem:[%s2952_s28 + $0x1f8] ss:$12 sps:$4 sm:$0xff]   ;;  %v2618_v42 = vld [vmem:[%s2952_s28 + $0x290] ss:$12 sps:$4 sm:$0xff]  }
  0x75   : > { %1114 = vmatprep.mubr.bf16.mxu0 %v2537_v43  ;;  %1306 = vmatprep.mubr.bf16.mxu1 %v2539_v44  ;;  %v2619_v43 = vld [vmem:[%s2952_s28 + $0x214] ss:$12 sps:$4 sm:$0xff]  }
  0x76   : > { %v2621_v44 = vld [vmem:[%s2952_s28 + $0x2a8] ss:$12 sps:$4 sm:$0xff]  }
  0x7c   : > { %1115 = vmatmul.mubr.bf16.gmra.mxu0 %v2541_v45  ;;  %1307 = vmatmul.mubr.bf16.gmra.mxu1 %v2542_v46  ;;  %v2622_v45 = vld [vmem:[%s2952_s28 + $0x210] ss:$12 sps:$4 sm:$0xff]   ;;  %v2623_v46 = vld [vmem:[%s2952_s28 + $0x2c0] ss:$12 sps:$4 sm:$0xff]  }
  0x7d   : > { %1122 = vmatprep.mubr.bf16.mxu0 %v2543_v47  ;;  %1314 = vmatprep.mubr.bf16.mxu1 %v2545_v48  ;;  %v2624_v47 = vld [vmem:[%s2952_s28 + $0x22c] ss:$12 sps:$4 sm:$0xff]  }
  0x7e   : > { %v2626_v48 = vld [vmem:[%s2952_s28 + $0x2d8] ss:$12 sps:$4 sm:$0xff]  }
  0x84   : > { %1123 = vmatmul.mubr.bf16.gmra.mxu0 %v2547_v49  ;;  %1315 = vmatmul.mubr.bf16.gmra.mxu1 %v2548_v50  ;;  %v2627_v49 = vld [vmem:[%s2952_s28 + $0x228] ss:$12 sps:$4 sm:$0xff]   ;;  %v2628_v50 = vld [vmem:[%s2952_s28 + $0x2f0] ss:$12 sps:$4 sm:$0xff]  }
  0x85   : > { %1130 = vmatprep.mubr.bf16.mxu0 %v2549_v51  ;;  %2377 = vmatprep.mubr.msk.bf16.mxu1 %vm937_vm0, %v2551_v52 }
  0x8c   : > { %1131 = vmatmul.mubr.bf16.gmra.mxu0 %v2552_v53  ;;  %2378 = vmatmul.mubr.msk.bf16.vlgmr.msra.gmra.mxu1 %vm937_vm0, %v2553_v54 }
  0x8d   : > { %1138 = vmatprep.mubr.bf16.mxu0 %v2554_v55  ;;  %2381 = vmatprep.mubr.msk.bf16.mxu1 %vm937_vm0, %v2556_v56 }
  0x94   : > { %1139 = vmatmul.mubr.bf16.gmra.mxu0 %v2557_v57  ;;  %2382 = vmatmul.mubr.msk.bf16.gmra.mxu1 %vm937_vm0, %v2558_v58 }
  0x95   : > { %1146 = vmatprep.mubr.bf16.mxu0 %v2559_v59  ;;  %2385 = vmatprep.mubr.msk.bf16.mxu1 %vm937_vm0, %v2561_v60 }
  0x9c   : > { %1147 = vmatmul.mubr.bf16.gmra.mxu0 %v2562_v61  ;;  %2386 = vmatmul.mubr.msk.bf16.gmra.mxu1 %vm937_vm0, %v2563_v62 }
  0x9d   : > { %1154 = vmatprep.mubr.bf16.mxu0 %v2564_v63  ;;  %2389 = vmatprep.mubr.msk.bf16.mxu1 %vm937_vm0, %v2566_v0 }
  0xa4   : > { %1155 = vmatmul.mubr.bf16.gmra.mxu0 %v2567_v1  ;;  %2390 = vmatmul.mubr.msk.bf16.gmra.mxu1 %vm937_vm0, %v2568_v2 }
  0xa5   : > { %1162 = vmatprep.mubr.bf16.mxu0 %v2569_v3  ;;  %2393 = vmatprep.mubr.msk.bf16.mxu1 %vm937_vm0, %v2571_v4 }
  0xac   : > { %1163 = vmatmul.mubr.bf16.gmra.mxu0 %v2572_v5  ;;  %2394 = vmatmul.mubr.msk.bf16.gmra.mxu1 %vm937_vm0, %v2573_v6 }
  0xad   : > { %1170 = vmatprep.mubr.bf16.mxu0 %v2574_v7  ;;  %2397 = vmatprep.mubr.msk.bf16.mxu1 %vm937_vm0, %v2576_v8 }
  0xb4   : > { %1171 = vmatmul.mubr.bf16.gmra.mxu0 %v2577_v9  ;;  %2398 = vmatmul.mubr.msk.bf16.gmra.mxu1 %vm937_vm0, %v2578_v10 }
  0xb5   : > { %1178 = vmatprep.mubr.bf16.mxu0 %v2579_v11  ;;  %2401 = vmatprep.mubr.msk.bf16.mxu1 %vm937_vm0, %v2581_v12 }
  0xbc   : > { %1179 = vmatmul.mubr.bf16.gmra.mxu0 %v2582_v13  ;;  %2402 = vmatmul.mubr.msk.bf16.gmra.mxu1 %vm937_vm0, %v2583_v14 }
  0xbd   : > { %1186 = vmatprep.mubr.bf16.mxu0 %v2584_v15  ;;  %2405 = vmatprep.mubr.msk.bf16.mxu1 %vm937_vm0, %v2586_v16 }
  0xc4   : > { %1187 = vmatmul.mubr.bf16.gmra.mxu0 %v2587_v17  ;;  %2406 = vmatmul.mubr.msk.bf16.gmra.mxu1 %vm937_vm0, %v2588_v18 }
  0xc5   : > { %1194 = vmatprep.mubr.bf16.mxu0 %v2589_v19  ;;  %2409 = vmatprep.mubr.msk.bf16.mxu1 %vm937_vm0, %v2591_v20 }
  0xcc   : > { %1195 = vmatmul.mubr.bf16.gmra.mxu0 %v2592_v21  ;;  %2410 = vmatmul.mubr.msk.bf16.gmra.mxu1 %vm937_vm0, %v2593_v22 }
  0xcd   : > { %1202 = vmatprep.mubr.bf16.mxu0 %v2594_v23  ;;  %2413 = vmatprep.mubr.msk.bf16.mxu1 %vm937_vm0, %v2596_v24 }
  0xd4   : > { %1203 = vmatmul.mubr.bf16.gmra.mxu0 %v2597_v25  ;;  %2414 = vmatmul.mubr.msk.bf16.gmra.mxu1 %vm937_vm0, %v2598_v26 }
  0xd5   : > { %1210 = vmatprep.mubr.bf16.mxu0 %v2599_v27  ;;  %2417 = vmatprep.mubr.msk.bf16.mxu1 %vm937_vm0, %v2601_v28 }
  0xdc   : > { %1211 = vmatmul.mubr.bf16.gmra.mxu0 %v2602_v29  ;;  %2418 = vmatmul.mubr.msk.bf16.gmra.mxu1 %vm937_vm0, %v2603_v30 }
  0xdd   : > { %1218 = vmatprep.mubr.bf16.mxu0 %v2604_v31  ;;  %2421 = vmatprep.mubr.msk.bf16.mxu1 %vm937_vm0, %v2606_v32 }
  0xe4   : > { %1219 = vmatmul.mubr.bf16.gmra.mxu0 %v2607_v33  ;;  %2422 = vmatmul.mubr.msk.bf16.gmra.mxu1 %vm937_vm0, %v2608_v34 }
  0xe5   : > { %1226 = vmatprep.mubr.bf16.mxu0 %v2609_v35  ;;  %2425 = vmatprep.mubr.msk.bf16.mxu1 %vm937_vm0, %v2611_v36 }
  0xec   : > { %1227 = vmatmul.mubr.bf16.gmra.mxu0 %v2612_v37  ;;  %2426 = vmatmul.mubr.msk.bf16.gmra.mxu1 %vm937_vm0, %v2613_v38 }
  0xed   : > { %1234 = vmatprep.mubr.bf16.mxu0 %v2614_v39  ;;  %2429 = vmatprep.mubr.msk.bf16.mxu1 %vm937_vm0, %v2616_v40 }
  0xf4   : > { %1235 = vmatmul.mubr.bf16.gmra.mxu0 %v2617_v41  ;;  %2430 = vmatmul.mubr.msk.bf16.gmra.mxu1 %vm937_vm0, %v2618_v42 }
  0xf5   : > { %1242 = vmatprep.mubr.bf16.mxu0 %v2619_v43  ;;  %2433 = vmatprep.mubr.msk.bf16.mxu1 %vm937_vm0, %v2621_v44 }
  0xfc   : > { %1243 = vmatmul.mubr.bf16.gmra.mxu0 %v2622_v45  ;;  %2434 = vmatmul.mubr.msk.bf16.gmra.mxu1 %vm937_vm0, %v2623_v46 }
  0xfd   : > { %1250 = vmatprep.mubr.bf16.mxu0 %v2624_v47  ;;  %2437 = vmatprep.mubr.msk.bf16.mxu1 %vm937_vm0, %v2626_v48 }
 0x104   : > { %1251 = vmatmul.mubr.bf16.gmra.mxu0 %v2627_v49  ;;  %2438 = vmatmul.mubr.msk.bf16.gmra.mxu1 %vm937_vm0, %v2628_v50  ;;  %v3206_v49 = vld [vmem:[%s3505_s2] ss:$0 sm:$0xff] }
 0x10c   : > { %v3145_v51 = vpop.f32.mrf.mxu0  ;;  %v3147_v52 = vpop.f32.mrf.mxu1 }
 0x10e   : > { %v1070_v53 = vpop.f32.mrf.mxu0  ;;  %v1262_v54 = vpop.f32.mrf.mxu1 }
 0x110   : > { %v3149_v55 = vpop.f32.mrf.mxu0  ;;  %v3151_v56 = vpop.f32.mrf.mxu1 }
 0x112   : > { %v1073_v57 = vpop.f32.mrf.mxu0  ;;  %v1265_v58 = vpop.f32.mrf.mxu1 }
 0x114   : > { %v1076_v59 = vpop.f32.mrf.mxu0  ;;  %v3153_v60 = vpop.f32.mrf.mxu1 }
 0x115   : > { %v1077_v54 = vadd.f32 %v3206_v49, %v1076_v59 }
 0x116   : > { %v1078_v61 = vpop.f32.mrf.mxu0  ;;  %v1270_v62 = vpop.f32.mrf.mxu1 }
 0x117   : > { %v1069_v61 = vadd.f32 %v3206_v49, %v3145_v51 }
 0x118   : > { %v1079_v63 = vpop.f32.mrf.mxu0  ;;  %v3155_v0 = vpop.f32.mrf.mxu1 }
 0x11a   : > { %v1081_v1 = vpop.f32.mrf.mxu0  ;;  %v1273_v2 = vpop.f32.mrf.mxu1 }
 0x11c   : > { %v3157_v3 = vpop.f32.mrf.mxu0  ;;  %v3159_v4 = vpop.f32.mrf.mxu1 }
 0x11e   : > { %v1086_v5 = vpop.f32.mrf.mxu0  ;;  %v1278_v6 = vpop.f32.mrf.mxu1 }
 0x11f   : > { %v1080_v5 = vadd.f32 %v3206_v49, %v1079_v63 }
 0x120   : > { %v3161_v7 = vpop.f32.mrf.mxu0  ;;  %v3163_v8 = vpop.f32.mrf.mxu1 }
 0x122   : > { %v1089_v9 = vpop.f32.mrf.mxu0  ;;  %v1281_v10 = vpop.f32.mrf.mxu1 }
 0x124   : > { %v1092_v11 = vpop.f32.mrf.mxu0  ;;  %v3165_v12 = vpop.f32.mrf.mxu1 }
 0x125   : > { %v1093_v51 = vadd.f32 %v3206_v49, %v1092_v11 }
 0x126   : > { %v1094_v13 = vpop.f32.mrf.mxu0  ;;  %v1286_v14 = vpop.f32.mrf.mxu1 }
 0x127   : > { %v1072_v14 = vadd.f32 %v3206_v49, %v3149_v55 }
 0x128   : > { %v3167_v15 = vpop.f32.mrf.mxu0  ;;  %v3169_v16 = vpop.f32.mrf.mxu1 }
 0x12a   : > { %v1097_v17 = vpop.f32.mrf.mxu0  ;;  %v1289_v18 = vpop.f32.mrf.mxu1 }
 0x12c   : > { %v3171_v19 = vpop.f32.mrf.mxu0  ;;  %v3173_v20 = vpop.f32.mrf.mxu1 }
 0x12e   : > { %v1102_v21 = vpop.f32.mrf.mxu0  ;;  %v1294_v22 = vpop.f32.mrf.mxu1 }
 0x130   : > { %v3175_v23 = vpop.f32.mrf.mxu0  ;;  %v3177_v24 = vpop.f32.mrf.mxu1 }
 0x132   : > { %v1105_v25 = vpop.f32.mrf.mxu0  ;;  %v1297_v26 = vpop.f32.mrf.mxu1 }
 0x134   : > { %v3179_v27 = vpop.f32.mrf.mxu0  ;;  %v3181_v28 = vpop.f32.mrf.mxu1 }
 0x136   : > { %v1110_v29 = vpop.f32.mrf.mxu0  ;;  %v1302_v30 = vpop.f32.mrf.mxu1 }
 0x137   : > { %v1085_v29 = vadd.f32 %v3206_v49, %v3157_v3 }
 0x138   : > { %v3183_v31 = vpop.f32.mrf.mxu0  ;;  %v3185_v32 = vpop.f32.mrf.mxu1 }
 0x13a   : > { %v1113_v33 = vpop.f32.mrf.mxu0  ;;  %v1305_v34 = vpop.f32.mrf.mxu1 }
 0x13c   : > { %v3187_v35 = vpop.f32.mrf.mxu0  ;;  %v3189_v36 = vpop.f32.mrf.mxu1 }
 0x13e   : > { %v1118_v37 = vpop.f32.mrf.mxu0  ;;  %v1310_v38 = vpop.f32.mrf.mxu1 }
 0x13f   : > { %v1096_v37 = vadd.f32 %v3206_v49, %v3167_v15 }
 0x140   : > { %v3191_v39 = vpop.f32.mrf.mxu0  ;;  %v3193_v40 = vpop.f32.mrf.mxu1 }
 0x142   : > { %v1121_v41 = vpop.f32.mrf.mxu0  ;;  %v1313_v42 = vpop.f32.mrf.mxu1 }
 0x144   : > { %v3195_v43 = vpop.f32.mrf.mxu0  ;;  %v3197_v44 = vpop.f32.mrf.mxu1 }
 0x146   : > { %v1126_v45 = vpop.f32.mrf.mxu0  ;;  %v1318_v46 = vpop.f32.mrf.mxu1 }
 0x147   : > { %v1088_v45 = vadd.f32 %v3206_v49, %v3161_v7 }
 0x148   : > { %v3199_v47 = vpop.f32.mrf.mxu0  ;;  %v3201_v48 = vpop.f32.mrf.mxu1 }
 0x14a   : > { %v1129_v50 = vpop.f32.mrf.mxu0  ;;  %v1321_v53 = vpop.f32.mrf.mxu1 }
 0x14c   : > { %v3209_v57 = vpop.f32.mrf.mxu0  ;;  %v2379_v58 = vpop.f32.mrf.mxu1 }
 0x14d   : > { %v1366_v62 = vadd.f32 %v2379_v58, %v1077_v54  ;;  %v1109_v54 = vadd.f32 %v3206_v49, %v3179_v27 }
 0x14e   : > { %v1134_v1 = vpop.f32.mrf.mxu0  ;;  %v1357_v2 = vpop.f32.mrf.mxu1 }
 0x14f   : > { %v2275_v6 = vmul.f32 -1.442695, %v1366_v62  ;;  %v1358_v9 = vadd.f32 %v1357_v2, %v1069_v61  ;;  %v1101_v1 = vadd.f32 %v3206_v49, %v3171_v19  ;;  %v1104_v19 = vadd.f32 %v3206_v49, %v3175_v23 }
 0x150   : > { %v3214_v10 = vpop.f32.mrf.mxu0  ;;  %v2380_v13 = vpop.f32.mrf.mxu1 }
 0x151   : > { %2629 = vpow2.f32 %v2275_v6  ;;  %v2273_v59 = vmul.f32 -1.442695, %v1358_v9  ;;  %v1369_v17 = vadd.f32 %v2380_v13, %v1080_v5 }
 0x152   : > { %v1137_v18 = vpop.f32.mrf.mxu0  ;;  %v1360_v21 = vpop.f32.mrf.mxu1 }
 0x153   : > { %2631 = vpow2.f32 %v2273_v59  ;;  %v2276_v22 = vmul.f32 -1.442695, %v1369_v17  ;;  %v1361_v25 = vadd.f32 %v1360_v21, %v1072_v14  ;;  %v1112_v17 = vadd.f32 %v3206_v49, %v3183_v31 }
 0x154   : > { %v3219_v26 = vpop.f32.mrf.mxu0  ;;  %v2383_v63 = vpop.f32.mrf.mxu1  ;;  %v1125_v31 = vadd.f32 %v3206_v49, %v3195_v43 }
 0x155   : > { %2633 = vpow2.f32 %v2276_v22  ;;  %v2274_v30 = vmul.f32 -1.442695, %v1361_v25  ;;  %v1382_v33 = vadd.f32 %v2383_v63, %v1093_v51 }
 0x156   : > { %v1142_v55 = vpop.f32.mrf.mxu0  ;;  %v1373_v34 = vpop.f32.mrf.mxu1 }
 0x157   : > { %2635 = vpow2.f32 %v2274_v30  ;;  %v2279_v38 = vmul.f32 -1.442695, %v1382_v33  ;;  %v1374_v11 = vadd.f32 %v1373_v34, %v1085_v29 }
 0x158   : > { %v3225_v41 = vpop.f32.mrf.mxu0  ;;  %v2384_v42 = vpop.f32.mrf.mxu1 }
 0x159   : > { %2637 = vpow2.f32 %v2279_v38  ;;  %v2277_v46 = vmul.f32 -1.442695, %v1374_v11  ;;  %v1385_v3 = vadd.f32 %v2384_v42, %v1096_v37  ;;  %v1117_v11 = vadd.f32 %v3206_v49, %v3187_v35 }
 0x15a   : > { %v1145_v50 = vpop.f32.mrf.mxu0  ;;  %v1376_v53 = vpop.f32.mrf.mxu1 }
 0x15b   : > { %2639 = vpow2.f32 %v2277_v46  ;;  %v2280_v58 = vmul.f32 -1.442695, %v1385_v3  ;;  %v1377_v15 = vadd.f32 %v1376_v53, %v1088_v45 }
 0x15c   : > { %v3231_v61 = vpop.f32.mrf.mxu0  ;;  %v2387_v62 = vpop.f32.mrf.mxu1 }
 0x15d   : > { %2641 = vpow2.f32 %v2280_v58  ;;  %v2278_v2 = vmul.f32 -1.442695, %v1377_v15  ;;  %v1398_v7 = vadd.f32 %v2387_v62, %v1109_v54  ;;  %v1128_v15 = vadd.f32 %v3206_v49, %v3199_v47 }
 0x15e   : > { %v2630_v5 = vpop.eup %2629  ;;  %v1150_v6 = vpop.f32.mrf.mxu0 }
 0x15f   : > { %v1389_v9 = vpop.f32.mrf.mxu1  ;;  %v1806_v13 = vadd.f32 1.0, %v2630_v5  ;;  %2643 = vpow2.f32 %v2278_v2  ;;  %v2283_v14 = vmul.f32 -1.442695, %v1398_v7  ;;  %v1120_v2 = vadd.f32 %v3206_v49, %v3191_v39 }
 0x160   : > { %v1390_v59 = vadd.f32 %v1389_v9, %v1101_v1  ;;  %v2632_v27 = vpop.eup %2631  ;;  %v3237_v18 = vpop.f32.mrf.mxu0  ;;  %v1141_v39 = vadd.f32 %v3206_v49, %v3219_v26  ;;  %v1144_v26 = vadd.f32 %v3206_v49, %v3225_v41 }
 0x161   : > { %v2388_v21 = vpop.f32.mrf.mxu1  ;;  %2645 = vrcp.f32 %v1806_v13  ;;  %v1804_v51 = vadd.f32 1.0, %v2632_v27 }
 0x162   : > { %v2281_v22 = vmul.f32 -1.442695, %v1390_v59  ;;  %v2634_v25 = vpop.eup %2633  ;;  %2647 = vpow2.f32 %v2283_v14  ;;  %v1401_v63 = vadd.f32 %v2388_v21, %v1112_v17  ;;  %v1153_v29 = vpop.f32.mrf.mxu0 }
 0x163   : > { %v1392_v30 = vpop.f32.mrf.mxu1  ;;  %2649 = vrcp.f32 %v1804_v51  ;;  %v1807_v33 = vadd.f32 1.0, %v2634_v25  ;;  %v1133_v51 = vadd.f32 %v3206_v49, %v3209_v57 }
 0x164   : > { %v1393_v55 = vadd.f32 %v1392_v30, %v1104_v19  ;;  %v2636_v34 = vpop.eup %2635  ;;  %2651 = vpow2.f32 %v2281_v22  ;;  %v2284_v37 = vmul.f32 -1.442695, %v1401_v63  ;;  %v3243_v38 = vpop.f32.mrf.mxu0 }
 0x165   : > { %v2391_v23 = vpop.f32.mrf.mxu1  ;;  %2653 = vrcp.f32 %v1807_v33  ;;  %v1805_v42 = vadd.f32 1.0, %v2636_v34 }
 0x166   : > { %v2282_v45 = vmul.f32 -1.442695, %v1393_v55  ;;  %v2638_v46 = vpop.eup %2637  ;;  %2655 = vpow2.f32 %v2284_v37  ;;  %v1414_v3 = vadd.f32 %v2391_v23, %v1125_v31  ;;  %v1158_v50 = vpop.f32.mrf.mxu0 }
 0x167   : > { %v1405_v53 = vpop.f32.mrf.mxu1  ;;  %2657 = vrcp.f32 %v1805_v42  ;;  %v1810_v54 = vadd.f32 1.0, %v2638_v46 }
 0x168   : > { %v1406_v43 = vadd.f32 %v1405_v53, %v1117_v11  ;;  %v2640_v58 = vpop.eup %2639  ;;  %2659 = vpow2.f32 %v2282_v45  ;;  %v2287_v62 = vmul.f32 -1.442695, %v1414_v3  ;;  %v3249_v1 = vpop.f32.mrf.mxu0  ;;  %v1136_v45 = vadd.f32 %v3206_v49, %v3214_v10 }
 0x169   : > { %v2392_v35 = vpop.f32.mrf.mxu1  ;;  %2661 = vrcp.f32 %v1810_v54  ;;  %v1808_v7 = vadd.f32 1.0, %v2640_v58  ;;  %v1157_v58 = vadd.f32 %v3206_v49, %v3243_v38 }
 0x16a   : > { %v2285_v5 = vmul.f32 -1.442695, %v1406_v43  ;;  %v2642_v6 = vpop.eup %2641  ;;  %2663 = vpow2.f32 %v2287_v62  ;;  %v1417_v9 = vadd.f32 %v2392_v35, %v1128_v15  ;;  %v1161_v13 = vpop.f32.mrf.mxu0 }
 0x16b   : > { %v1408_v14 = vpop.f32.mrf.mxu1  ;;  %2665 = vrcp.f32 %v1808_v7  ;;  %v1811_v59 = vadd.f32 1.0, %v2642_v6  ;;  %v1149_v6 = vadd.f32 %v3206_v49, %v3231_v61 }
 0x16c   : > { %v1409_v47 = vadd.f32 %v1408_v14, %v1120_v2  ;;  %v2644_v27 = vpop.eup %2643  ;;  %2667 = vpow2.f32 %v2285_v5  ;;  %v2288_v17 = vmul.f32 -1.442695, %v1417_v9  ;;  %v3261_v21 = vpop.f32.mrf.mxu0 }
 0x16d   : > { %v2395_v19 = vpop.f32.mrf.mxu1  ;;  %2669 = vrcp.f32 %v1811_v59  ;;  %v1809_v22 = vadd.f32 1.0, %v2644_v27 }
 0x16e   : > { %v2286_v25 = vmul.f32 -1.442695, %v1409_v47  ;;  %v2646_v63 = vpop.eup %2645  ;;  %2671 = vpow2.f32 %v2288_v17  ;;  %v1430_v29 = vadd.f32 %v2395_v19, %v1141_v39  ;;  %v1166_v30 = vpop.f32.mrf.mxu0  ;;  %v1160_v39 = vadd.f32 %v3206_v49, %v3249_v1 }
 0x16f   : > { %v1421_v33 = vpop.f32.mrf.mxu1  ;;  %v2648_v55 = vpop.eup %2647  ;;  %1999 = vst.msk [vmem:[%s3257_s8 + $0x10] sm:$0xff] %vm1996_vm1, %v2646_v63  ;;  %2673 = vrcp.f32 %v1809_v22 }
 0x170   : > { %v1422_v34 = vadd.f32 %v1421_v33, %v1133_v51  ;;  %v2650_v31 = vpop.eup %2649  ;;  %v1814_v37 = vadd.f32 1.0, %v2648_v55  ;;  %2675 = vpow2.f32 %v2286_v25  ;;  %v2291_v57 = vmul.f32 -1.442695, %v1430_v29  ;;  %v3269_v23 = vpop.f32.mrf.mxu0 }
 0x171   : > { %v2396_v11 = vpop.f32.mrf.mxu1  ;;  %v2652_v42 = vpop.eup %2651  ;;  %1997 = vst.msk [vmem:[%s3257_s8] sm:$0xff] %vm1996_vm1, %v2650_v31  ;;  %v1152_v29 = vadd.f32 %v3206_v49, %v3237_v18 }
 0x172   : > { %v2289_v46 = vmul.f32 -1.442695, %v1422_v34  ;;  %v1433_v3 = vadd.f32 %v2396_v11, %v1144_v26  ;;  %v2654_v50 = vpop.eup %2653  ;;  %2677 = vrcp.f32 %v1814_v37  ;;  %v1812_v41 = vadd.f32 1.0, %v2652_v42  ;;  %v1169_v53 = vpop.f32.mrf.mxu0 }
 0x173   : > { %v1424_v54 = vpop.f32.mrf.mxu1  ;;  %v2656_v43 = vpop.eup %2655  ;;  %2000 = vst.msk [vmem:[%s3257_s8 + $0x18] sm:$0xff] %vm1996_vm1, %v2654_v50  ;;  %2679 = vpow2.f32 %v2291_v57  ;;  %v1165_v50 = vadd.f32 %v3206_v49, %v3261_v21 }
 0x174   : > { %v2292_v15 = vmul.f32 -1.442695, %v1433_v3  ;;  %v1425_v62 = vadd.f32 %v1424_v54, %v1136_v45  ;;  %v2658_v35 = vpop.eup %2657  ;;  %2681 = vrcp.f32 %v1812_v41  ;;  %v1815_v10 = vadd.f32 1.0, %v2656_v43  ;;  %v1172_v2 = vpop.f32.mrf.mxu0 }
 0x175   : > { %v2399_v7 = vpop.f32.mrf.mxu1  ;;  %v2660_v5 = vpop.eup %2659  ;;  %1998 = vst.msk [vmem:[%s3257_s8 + $0x8] sm:$0xff] %vm1996_vm1, %v2658_v35  ;;  %2683 = vpow2.f32 %v2289_v46  ;;  %v1173_v37 = vadd.f32 %v3206_v49, %v1172_v2 }
 0x176   : > { %v2290_v9 = vmul.f32 -1.442695, %v1425_v62  ;;  %v1446_v13 = vadd.f32 %v2399_v7, %v1157_v58  ;;  %v2662_v14 = vpop.eup %2661  ;;  %2685 = vrcp.f32 %v1815_v10  ;;  %v1813_v38 = vadd.f32 1.0, %v2660_v5  ;;  %v1174_v59 = vpop.f32.mrf.mxu0 }
 0x177   : > { %v1437_v47 = vpop.f32.mrf.mxu1  ;;  %v2664_v27 = vpop.eup %2663  ;;  %2003 = vst.msk [vmem:[%s3257_s8 + $0x30] sm:$0xff] %vm1996_vm1, %v2662_v14  ;;  %2687 = vpow2.f32 %v2292_v15 }
 0x178   : > { %v2295_v17 = vmul.f32 -1.442695, %v1446_v13  ;;  %v1438_v19 = vadd.f32 %v1437_v47, %v1149_v6  ;;  %v2666_v51 = vpop.eup %2665  ;;  %2689 = vrcp.f32 %v1813_v38  ;;  %v1818_v61 = vadd.f32 1.0, %v2664_v27  ;;  %v1175_v22 = vpop.f32.mrf.mxu0 }
 0x179   : > { %v2400_v25 = vpop.f32.mrf.mxu1  ;;  %v2668_v63 = vpop.eup %2667  ;;  %2001 = vst.msk [vmem:[%s3257_s8 + $0x20] sm:$0xff] %vm1996_vm1, %v2666_v51  ;;  %2691 = vpow2.f32 %v2290_v9  ;;  %v1176_v2 = vadd.f32 %v3206_v49, %v1175_v22  ;;  %v1168_v9 = vadd.f32 %v3206_v49, %v3269_v23 }
 0x17a   : > { %v2293_v30 = vmul.f32 -1.442695, %v1438_v19  ;;  %v1449_v33 = vadd.f32 %v2400_v25, %v1160_v39  ;;  %v2670_v55 = vpop.eup %2669  ;;  %2693 = vrcp.f32 %v1818_v61  ;;  %v1816_v1 = vadd.f32 1.0, %v2668_v63  ;;  %v1177_v26 = vpop.f32.mrf.mxu0 }
 0x17b   : > { %v1440_v34 = vpop.f32.mrf.mxu1  ;;  %v2672_v31 = vpop.eup %2671  ;;  %2004 = vst.msk [vmem:[%s3257_s8 + $0x38] sm:$0xff] %vm1996_vm1, %v2670_v55  ;;  %2695 = vpow2.f32 %v2295_v17 }
 0x17c   : > { %v2296_v57 = vmul.f32 -1.442695, %v1449_v33  ;;  %v1441_v11 = vadd.f32 %v1440_v34, %v1152_v29  ;;  %v2674_v42 = vpop.eup %2673  ;;  %2697 = vrcp.f32 %v1816_v1  ;;  %v1819_v18 = vadd.f32 1.0, %v2672_v31  ;;  %v1180_v45 = vpop.f32.mrf.mxu0 }
 0x17d   : > { %v2403_v46 = vpop.f32.mrf.mxu1  ;;  %v2676_v3 = vpop.eup %2675  ;;  %2002 = vst.msk [vmem:[%s3257_s8 + $0x28] sm:$0xff] %vm1996_vm1, %v2674_v42  ;;  %2699 = vpow2.f32 %v2293_v30  ;;  %v1181_v51 = vadd.f32 %v3206_v49, %v1180_v45 }
 0x17e   : > { %v2294_v41 = vmul.f32 -1.442695, %v1441_v11  ;;  %v1462_v53 = vadd.f32 %v2403_v46, %v1173_v37  ;;  %2701 = vrcp.f32 %v1819_v18  ;;  %v1817_v54 = vadd.f32 1.0, %v2676_v3  ;;  %v1182_v43 = vpop.f32.mrf.mxu0 }
 0x17f   : > { %v1453_v58 = vpop.f32.mrf.mxu1  ;;  %v2678_v15 = vpop.eup %2677  ;;  %2703 = vpow2.f32 %v2296_v57 }
 0x180   : > { %v2299_v62 = vmul.f32 -1.442695, %v1462_v53  ;;  %v1454_v35 = vadd.f32 %v1453_v58, %v1165_v50  ;;  %v2680_v10 = vpop.eup %2679  ;;  %2007 = vst.msk [vmem:[%s3257_s8 + $0x50] sm:$0xff] %vm1996_vm1, %v2678_v15  ;;  %2705 = vrcp.f32 %v1817_v54  ;;  %v1183_v7 = vpop.f32.mrf.mxu0 }
 0x181   : > { %v2404_v21 = vpop.f32.mrf.mxu1  ;;  %v2682_v5 = vpop.eup %2681  ;;  %v1822_v6 = vadd.f32 1.0, %v2680_v10  ;;  %2707 = vpow2.f32 %v2294_v41  ;;  %v1184_v46 = vadd.f32 %v3206_v49, %v1183_v7 }
 0x182   : > { %v2297_v13 = vmul.f32 -1.442695, %v1454_v35  ;;  %v2684_v14 = vpop.eup %2683  ;;  %2005 = vst.msk [vmem:[%s3257_s8 + $0x40] sm:$0xff] %vm1996_vm1, %v2682_v5  ;;  %2709 = vpow2.f32 %v2299_v62  ;;  %v1465_v38 = vadd.f32 %v2404_v21, %v1176_v2  ;;  %v1185_v59 = vpop.f32.mrf.mxu0 }
 0x183   : > { %v1456_v47 = vpop.f32.mrf.mxu1  ;;  %v2686_v27 = vpop.eup %2685  ;;  %2711 = vrcp.f32 %v1822_v6  ;;  %v1820_v39 = vadd.f32 1.0, %v2684_v14 }
 0x184   : > { %v1457_v17 = vadd.f32 %v1456_v47, %v1168_v9  ;;  %v2688_v19 = vpop.eup %2687  ;;  %2008 = vst.msk [vmem:[%s3257_s8 + $0x58] sm:$0xff] %vm1996_vm1, %v2686_v27  ;;  %2713 = vpow2.f32 %v2297_v13  ;;  %v2300_v23 = vmul.f32 -1.442695, %v1465_v38  ;;  %v1188_v61 = vpop.f32.mrf.mxu0 }
 0x185   : > { %v2407_v22 = vpop.f32.mrf.mxu1  ;;  %v2690_v25 = vpop.eup %2689  ;;  %2715 = vrcp.f32 %v1820_v39  ;;  %v1823_v63 = vadd.f32 1.0, %v2688_v19  ;;  %v1189_v30 = vadd.f32 %v3206_v49, %v1188_v61 }
 0x186   : > { %v2298_v29 = vmul.f32 -1.442695, %v1457_v17  ;;  %v2692_v33 = vpop.eup %2691  ;;  %2006 = vst.msk [vmem:[%s3257_s8 + $0x48] sm:$0xff] %vm1996_vm1, %v2690_v25  ;;  %2717 = vpow2.f32 %v2300_v23  ;;  %v1190_v55 = vpop.f32.mrf.mxu0 }
 0x187   : > { %v1469_v1 = vpop.f32.mrf.mxu1  ;;  %v2694_v26 = vpop.eup %2693  ;;  %2719 = vrcp.f32 %v1823_v63  ;;  %v1821_v34 = vadd.f32 1.0, %v2692_v33  ;;  %v1478_v31 = vadd.f32 %v2407_v22, %v1189_v30 }
 0x188   : > { %v1470_v37 = vadd.f32 %v1469_v1, %v1181_v51  ;;  %v2696_v57 = vpop.eup %2695  ;;  %2011 = vst.msk [vmem:[%s3257_s8 + $0x70] sm:$0xff] %vm1996_vm1, %v2694_v26  ;;  %2721 = vpow2.f32 %v2298_v29  ;;  %v1191_v11 = vpop.f32.mrf.mxu0 }
 0x189   : > { %v2408_v42 = vpop.f32.mrf.mxu1  ;;  %v2698_v18 = vpop.eup %2697  ;;  %2723 = vrcp.f32 %v1821_v34  ;;  %v1826_v45 = vadd.f32 1.0, %v2696_v57  ;;  %v2303_v3 = vmul.f32 -1.442695, %v1478_v31  ;;  %v1192_v53 = vadd.f32 %v3206_v49, %v1191_v11 }
 0x18a   : > { %v2700_v50 = vpop.eup %2699  ;;  %2009 = vst.msk [vmem:[%s3257_s8 + $0x60] sm:$0xff] %vm1996_vm1, %v2698_v18  ;;  %v2301_v41 = vmul.f32 -1.442695, %v1470_v37  ;;  %v1193_v54 = vpop.f32.mrf.mxu0 }
 0x18b   : > { %v1472_v43 = vpop.f32.mrf.mxu1  ;;  %v2702_v58 = vpop.eup %2701  ;;  %2725 = vrcp.f32 %v1826_v45  ;;  %v1824_v15 = vadd.f32 1.0, %v2700_v50  ;;  %v1481_v10 = vadd.f32 %v2408_v42, %v1192_v53 }
 0x18c   : > { %v1473_v62 = vadd.f32 %v1472_v43, %v1184_v46  ;;  %v2704_v35 = vpop.eup %2703  ;;  %2012 = vst.msk [vmem:[%s3257_s8 + $0x78] sm:$0xff] %vm1996_vm1, %v2702_v58  ;;  %2727 = vpow2.f32 %v2303_v3  ;;  %v1196_v2 = vpop.f32.mrf.mxu0 }
 0x18d   : > { %v2411_v7 = vpop.f32.mrf.mxu1  ;;  %v2706_v21 = vpop.eup %2705  ;;  %2729 = vrcp.f32 %v1824_v15  ;;  %v1827_v5 = vadd.f32 1.0, %v2704_v35  ;;  %v1197_v6 = vadd.f32 %v3206_v49, %v1196_v2  ;;  %v2304_v13 = vmul.f32 -1.442695, %v1481_v10 }
 0x18e   : > { %v2708_v9 = vpop.eup %2707  ;;  %2010 = vst.msk [vmem:[%s3257_s8 + $0x68] sm:$0xff] %vm1996_vm1, %v2706_v21  ;;  %2731 = vpow2.f32 %v2301_v41  ;;  %v1198_v14 = vpop.f32.mrf.mxu0  ;;  %v2302_v27 = vmul.f32 -1.442695, %v1473_v62 }
 0x18f   : > { %v1485_v38 = vpop.f32.mrf.mxu1  ;;  %v2710_v59 = vpop.eup %2709  ;;  %2733 = vrcp.f32 %v1827_v5  ;;  %v1825_v47 = vadd.f32 1.0, %v2708_v9 }
 0x190   : > { %v1486_v39 = vadd.f32 %v1485_v38, %v1197_v6  ;;  %v2712_v17 = vpop.eup %2711  ;;  %v1830_v19 = vadd.f32 1.0, %v2710_v59  ;;  %2735 = vpow2.f32 %v2304_v13  ;;  %v1199_v51 = vpop.f32.mrf.mxu0 }
 0x191   : > { %v2412_v23 = vpop.f32.mrf.mxu1  ;;  %v2714_v61 = vpop.eup %2713  ;;  %2015 = vst.msk [vmem:[%s3257_s8 + $0x90] sm:$0xff] %vm1996_vm1, %v2712_v17  ;;  %2737 = vrcp.f32 %v1825_v47  ;;  %v1200_v25 = vadd.f32 %v3206_v49, %v1199_v51 }
 0x192   : > { %v2305_v22 = vmul.f32 -1.442695, %v1486_v39  ;;  %v2716_v63 = vpop.eup %2715  ;;  %2739 = vrcp.f32 %v1830_v19  ;;  %v1828_v29 = vadd.f32 1.0, %v2714_v61  ;;  %v1201_v30 = vpop.f32.mrf.mxu0 }
 0x193   : > { %v1488_v33 = vpop.f32.mrf.mxu1  ;;  %v2718_v55 = vpop.eup %2717  ;;  %2013 = vst.msk [vmem:[%s3257_s8 + $0x80] sm:$0xff] %vm1996_vm1, %v2716_v63  ;;  %2741 = vpow2.f32 %v2302_v27 }
 0x194   : > { %v1489_v1 = vadd.f32 %v1488_v33, %v1200_v25  ;;  %v2720_v26 = vpop.eup %2719  ;;  %2743 = vrcp.f32 %v1828_v29  ;;  %v1831_v34 = vadd.f32 1.0, %v2718_v55  ;;  %v1204_v31 = vpop.f32.mrf.mxu0 }
 0x195   : > { %v3327_v37 = vpop.f32.mrf.mxu1  ;;  %v2722_v57 = vpop.eup %2721  ;;  %2016 = vst.msk [vmem:[%s3257_s8 + $0x98] sm:$0xff] %vm1996_vm1, %v2720_v26  ;;  %2745 = vpow2.f32 %v2305_v22  ;;  %v1205_v42 = vadd.f32 %v3206_v49, %v1204_v31 }
 0x196   : > { %v2306_v11 = vmul.f32 -1.442695, %v1489_v1  ;;  %v2724_v18 = vpop.eup %2723  ;;  %2747 = vrcp.f32 %v1831_v34  ;;  %v1829_v45 = vadd.f32 1.0, %v2722_v57  ;;  %v1206_v46 = vpop.f32.mrf.mxu0 }
 0x197   : > { %v1501_v3 = vpop.f32.mrf.mxu1  ;;  %2014 = vst.msk [vmem:[%s3257_s8 + $0x88] sm:$0xff] %vm1996_vm1, %v2724_v18  ;;  %v1494_v50 = vadd.f32 %v2411_v7, %v1205_v42 }
 0x198   : > { %2749 = vpow2.f32 %v2306_v11  ;;  %v2726_v41 = vpop.eup %2725  ;;  %v1207_v53 = vpop.f32.mrf.mxu0 }
 0x199   : > { %2751 = vrcp.f32 %v1829_v45  ;;  %v3334_v54 = vpop.f32.mrf.mxu1  ;;  %v2728_v43 = vpop.eup %2727  ;;  %2019 = vst.msk [vmem:[%s3257_s8 + $0xb0] sm:$0xff] %vm1996_vm1, %v2726_v41  ;;  %v2307_v58 = vmul.f32 -1.442695, %v1494_v50  ;;  %v1208_v15 = vadd.f32 %v3206_v49, %v1207_v53 }
 0x19a   : > { %v2730_v62 = vpop.eup %2729  ;;  %v1834_v35 = vadd.f32 1.0, %v2728_v43  ;;  %v1209_v10 = vpop.f32.mrf.mxu0 }
 0x19b   : > { %v1504_v2 = vpop.f32.mrf.mxu1  ;;  %v2732_v21 = vpop.eup %2731  ;;  %2017 = vst.msk [vmem:[%s3257_s8 + $0xa0] sm:$0xff] %vm1996_vm1, %v2730_v62  ;;  %2753 = vpow2.f32 %v2307_v58  ;;  %v1497_v7 = vadd.f32 %v2412_v23, %v1208_v15 }
 0x19c   : > { %v2734_v5 = vpop.eup %2733  ;;  %2755 = vrcp.f32 %v1834_v35  ;;  %v1832_v6 = vadd.f32 1.0, %v2732_v21  ;;  %v1212_v9 = vpop.f32.mrf.mxu0 }
 0x19d   : > { %v3341_v13 = vpop.f32.mrf.mxu1  ;;  %v2736_v14 = vpop.eup %2735  ;;  %2020 = vst.msk [vmem:[%s3257_s8 + $0xb8] sm:$0xff] %vm1996_vm1, %v2734_v5  ;;  %v2308_v38 = vmul.f32 -1.442695, %v1497_v7  ;;  %v1213_v59 = vadd.f32 %v3206_v49, %v1212_v9 }
 0x19e   : > { %v2738_v47 = vpop.eup %2737  ;;  %2757 = vrcp.f32 %v1832_v6  ;;  %v1835_v27 = vadd.f32 1.0, %v2736_v14  ;;  %v1214_v39 = vpop.f32.mrf.mxu0  ;;  %v1261_v14 = vadd.f32 %v3206_v49, %v3147_v52 }
 0x19f   : > { %v3346_v17 = vpop.f32.mrf.mxu1  ;;  %v2740_v19 = vpop.eup %2739  ;;  %2018 = vst.msk [vmem:[%s3257_s8 + $0xa8] sm:$0xff] %vm1996_vm1, %v2738_v47  ;;  %2759 = vpow2.f32 %v2308_v38  ;;  %v1502_v51 = vadd.f32 %v1501_v3, %v1213_v59 }
 0x1a0   : > { %v2742_v23 = vpop.eup %2741  ;;  %2023 = vst.msk [vmem:[%s3257_s8 + $0xd0] sm:$0xff] %vm1996_vm1, %v2740_v19  ;;  %2761 = vrcp.f32 %v1835_v27  ;;  %v1215_v61 = vpop.f32.mrf.mxu0 }
 0x1a1   : > { %v3352_v22 = vpop.f32.mrf.mxu1  ;;  %v2744_v25 = vpop.eup %2743  ;;  %v1833_v63 = vadd.f32 1.0, %v2742_v23  ;;  %v2309_v29 = vmul.f32 -1.442695, %v1502_v51  ;;  %v1216_v30 = vadd.f32 %v3206_v49, %v1215_v61 }
 0x1a2   : > { %v2746_v33 = vpop.eup %2745  ;;  %2021 = vst.msk [vmem:[%s3257_s8 + $0xc0] sm:$0xff] %vm1996_vm1, %v2744_v25  ;;  %v1217_v55 = vpop.f32.mrf.mxu0 }
 0x1a3   : > { %v3357_v1 = vpop.f32.mrf.mxu1  ;;  %v2748_v26 = vpop.eup %2747  ;;  %2763 = vrcp.f32 %v1833_v63  ;;  %v1836_v34 = vadd.f32 1.0, %v2746_v33  ;;  %v1505_v31 = vadd.f32 %v1504_v2, %v1216_v30  ;;  %v1264_v63 = vadd.f32 %v3206_v49, %v3151_v56 }
 0x1a4   : > { %2024 = vst.msk [vmem:[%s3257_s8 + $0xd8] sm:$0xff] %vm1996_vm1, %v2748_v26  ;;  %2765 = vpow2.f32 %v2309_v29  ;;  %v1220_v11 = vpop.f32.mrf.mxu0  ;;  %v1272_v29 = vadd.f32 %v3206_v49, %v3155_v0 }
 0x1a5   : > { %v2750_v57 = vpop.eup %2749  ;;  %v3361_v42 = vpop.f32.mrf.mxu1  ;;  %2767 = vrcp.f32 %v1836_v34  ;;  %v2310_v46 = vmul.f32 -1.442695, %v1505_v31  ;;  %v1221_v3 = vadd.f32 %v3206_v49, %v1220_v11 }
 0x1a6   : > { %v2752_v18 = vpop.eup %2751  ;;  %v1837_v45 = vadd.f32 1.0, %v2750_v57  ;;  %v1222_v50 = vpop.f32.mrf.mxu0 }
 0x1a7   : > { %2022 = vst.msk [vmem:[%s3257_s8 + $0xc8] sm:$0xff] %vm1996_vm1, %v2752_v18  ;;  %v3366_v41 = vpop.f32.mrf.mxu1  ;;  %v1510_v53 = vadd.f32 %v3327_v37, %v1221_v3  ;;  %v1269_v37 = vadd.f32 %v3206_v49, %v3153_v60  ;;  %v1277_v3 = vadd.f32 %v3206_v49, %v3159_v4  ;;  %v1285_v50 = vadd.f32 %v3206_v49, %v3165_v12 }
 0x1a8   : > { %2769 = vrcp.f32 %v1837_v45  ;;  %v2754_v43 = vpop.eup %2753  ;;  %v1223_v58 = vpop.f32.mrf.mxu0 }
 0x1a9   : > { %2771 = vpow2.f32 %v2310_v46  ;;  %v3369_v15 = vpop.f32.mrf.mxu1  ;;  %v2756_v62 = vpop.eup %2755  ;;  %v1838_v35 = vadd.f32 1.0, %v2754_v43  ;;  %v2311_v10 = vmul.f32 -1.442695, %v1510_v53  ;;  %v1224_v2 = vadd.f32 %v3206_v49, %v1223_v58 }
 0x1aa   : > { %2027 = vst.msk [vmem:[%s3257_s8 + $0xf0] sm:$0xff] %vm1996_vm1, %v2756_v62  ;;  %v1225_v21 = vpop.f32.mrf.mxu0 }
 0x1ab   : > { %v3374_v7 = vpop.f32.mrf.mxu1  ;;  %v2758_v5 = vpop.eup %2757  ;;  %2773 = vrcp.f32 %v1838_v35  ;;  %v1513_v6 = vadd.f32 %v3334_v54, %v1224_v2 }
 0x1ac   : > { %v2760_v9 = vpop.eup %2759  ;;  %2025 = vst.msk [vmem:[%s3257_s8 + $0xe0] sm:$0xff] %vm1996_vm1, %v2758_v5  ;;  %2775 = vpow2.f32 %v2311_v10  ;;  %v1228_v38 = vpop.f32.mrf.mxu0 }
 0x1ad   : > { %v2427_v59 = vpop.f32.mrf.mxu1  ;;  %v2762_v47 = vpop.eup %2761  ;;  %v1839_v27 = vadd.f32 1.0, %v2760_v9  ;;  %v2312_v39 = vmul.f32 -1.442695, %v1513_v6  ;;  %v1229_v19 = vadd.f32 %v3206_v49, %v1228_v38  ;;  %v1280_v9 = vadd.f32 %v3206_v49, %v3163_v8 }
 0x1ae   : > { %v1558_v51 = vadd.f32 %v2427_v59, %v1269_v37  ;;  %2028 = vst.msk [vmem:[%s3257_s8 + $0xf8] sm:$0xff] %vm1996_vm1, %v2762_v47  ;;  %v1230_v60 = vpop.f32.mrf.mxu0 }
 0x1af   : > { %v1549_v54 = vpop.f32.mrf.mxu1  ;;  %2777 = vrcp.f32 %v1839_v27  ;;  %v1518_v23 = vadd.f32 %v3346_v17, %v1229_v19 }
 0x1b0   : > { %v2323_v52 = vmul.f32 -1.442695, %v1558_v51  ;;  %v1550_v61 = vadd.f32 %v1549_v54, %v1261_v14  ;;  %v2764_v25 = vpop.eup %2763  ;;  %2779 = vpow2.f32 %v2312_v39  ;;  %v1231_v30 = vpop.f32.mrf.mxu0  ;;  %v1288_v14 = vadd.f32 %v3206_v49, %v3169_v16 }
 0x1b1   : > { %v2428_v33 = vpop.f32.mrf.mxu1  ;;  %v2766_v55 = vpop.eup %2765  ;;  %2026 = vst.msk [vmem:[%s3257_s8 + $0xe8] sm:$0xff] %vm1996_vm1, %v2764_v25  ;;  %v2313_v26 = vmul.f32 -1.442695, %v1518_v23  ;;  %v1232_v17 = vadd.f32 %v3206_v49, %v1231_v30 }
 0x1b2   : > { %2781 = vpow2.f32 %v2323_v52  ;;  %v2321_v34 = vmul.f32 -1.442695, %v1550_v61  ;;  %v2768_v31 = vpop.eup %2767  ;;  %v1840_v57 = vadd.f32 1.0, %v2766_v55  ;;  %v1561_v11 = vadd.f32 %v2428_v33, %v1272_v29  ;;  %v1233_v56 = vpop.f32.mrf.mxu0 }
 0x1b3   : > { %v1552_v18 = vpop.f32.mrf.mxu1  ;;  %2029 = vst.msk [vmem:[%s3257_s8 + $0x100] sm:$0xff] %vm1996_vm1, %v2768_v31  ;;  %2783 = vpow2.f32 %v2313_v26  ;;  %v1521_v0 = vadd.f32 %v3357_v1, %v1232_v17 }
 0x1b4   : > { %v1553_v45 = vadd.f32 %v1552_v18, %v1264_v63  ;;  %2785 = vrcp.f32 %v1840_v57  ;;  %v2324_v53 = vmul.f32 -1.442695, %v1561_v11  ;;  %v1236_v43 = vpop.f32.mrf.mxu0 }
 0x1b5   : > { %v2770_v46 = vpop.eup %2769  ;;  %v2431_v58 = vpop.f32.mrf.mxu1  ;;  %2787 = vpow2.f32 %v2321_v34  ;;  %v2314_v35 = vmul.f32 -1.442695, %v1521_v0  ;;  %v1237_v1 = vadd.f32 %v3206_v49, %v1236_v43 }
 0x1b6   : > { %v2772_v62 = vpop.eup %2771  ;;  %2030 = vst.msk [vmem:[%s3257_s8 + $0x108] sm:$0xff] %vm1996_vm1, %v2770_v46  ;;  %v2322_v10 = vmul.f32 -1.442695, %v1553_v45  ;;  %2789 = vpow2.f32 %v2324_v53  ;;  %v1574_v21 = vadd.f32 %v2431_v58, %v1285_v50  ;;  %v1238_v4 = vpop.f32.mrf.mxu0 }
 0x1b7   : > { %v1841_v2 = vadd.f32 1.0, %v2772_v62  ;;  %v1565_v5 = vpop.f32.mrf.mxu1  ;;  %2791 = vpow2.f32 %v2314_v35  ;;  %v1526_v12 = vadd.f32 %v3341_v13, %v1237_v1 }
 0x1b8   : > { %v1566_v37 = vadd.f32 %v1565_v5, %v1277_v3  ;;  %v2774_v6 = vpop.eup %2773  ;;  %v2327_v38 = vmul.f32 -1.442695, %v1574_v21  ;;  %v1239_v59 = vpop.f32.mrf.mxu0 }
 0x1b9   : > { %2793 = vrcp.f32 %v1841_v2  ;;  %v2432_v47 = vpop.f32.mrf.mxu1  ;;  %v2776_v27 = vpop.eup %2775  ;;  %2031 = vst.msk [vmem:[%s3257_s8 + $0x110] sm:$0xff] %vm1996_vm1, %v2774_v6  ;;  %v2315_v39 = vmul.f32 -1.442695, %v1526_v12  ;;  %v1240_v13 = vadd.f32 %v3206_v49, %v1239_v59  ;;  %v3418_v49 = vld [vmem:[%s3505_s2] ss:$0 sm:$0xff] }
 0x1ba   : > { %2795 = vpow2.f32 %v2322_v10  ;;  %v2325_v19 = vmul.f32 -1.442695, %v1566_v37  ;;  %v1842_v51 = vadd.f32 1.0, %v2776_v27  ;;  %v1577_v60 = vadd.f32 %v2432_v47, %v1288_v14  ;;  %v1241_v8 = vpop.f32.mrf.mxu0 }
 0x1bb   : > { %2797 = vpow2.f32 %v2327_v38  ;;  %v1568_v54 = vpop.f32.mrf.mxu1  ;;  %v1529_v16 = vadd.f32 %v3352_v22, %v1240_v13  ;;  %v1301_v22 = vadd.f32 %v3418_v49, %v3181_v28  ;;  %v1293_v3 = vadd.f32 %v3418_v49, %v3173_v20 }
 0x1bc   : > { %2799 = vpow2.f32 %v2315_v39  ;;  %v1569_v23 = vadd.f32 %v1568_v54, %v1280_v9  ;;  %v2778_v52 = vpop.eup %2777  ;;  %v2328_v61 = vmul.f32 -1.442695, %v1577_v60  ;;  %v1244_v25 = vpop.f32.mrf.mxu0  ;;  %v1304_v6 = vadd.f32 %v3418_v49, %v3185_v32 }
 0x1bd   : > { %2801 = vrcp.f32 %v1842_v51  ;;  %v2435_v63 = vpop.f32.mrf.mxu1  ;;  %v2780_v29 = vpop.eup %2779  ;;  %2032 = vst.msk [vmem:[%s3257_s8 + $0x118] sm:$0xff] %vm1996_vm1, %v2778_v52  ;;  %v2316_v30 = vmul.f32 -1.442695, %v1529_v16  ;;  %v1245_v33 = vadd.f32 %v3418_v49, %v1244_v25  ;;  %v1296_v32 = vadd.f32 %v3418_v49, %v3177_v24 }
 0x1be   : > { %2803 = vpow2.f32 %v2325_v19  ;;  %v1843_v26 = vadd.f32 1.0, %v2780_v29  ;;  %v2326_v34 = vmul.f32 -1.442695, %v1569_v23  ;;  %v1246_v17 = vpop.f32.mrf.mxu0  ;;  %v1590_v18 = vadd.f32 %v2435_v63, %v1301_v22 }
 0x1bf   : > { %v2782_v55 = vpop.eup %2781  ;;  %2805 = vpow2.f32 %v2328_v61  ;;  %v1581_v31 = vpop.f32.mrf.mxu1  ;;  %v1534_v11 = vadd.f32 %v3366_v41, %v1245_v33  ;;  %v1309_v23 = vadd.f32 %v3418_v49, %v3189_v36  ;;  %v1317_v61 = vadd.f32 %v3418_v49, %v3197_v44 }
 0x1c0   : > { %v1854_v57 = vadd.f32 1.0, %v2782_v55  ;;  %2807 = vpow2.f32 %v2316_v30  ;;  %v2784_v56 = vpop.eup %2783  ;;  %v1247_v0 = vpop.f32.mrf.mxu0  ;;  %v1582_v35 = vadd.f32 %v1581_v31, %v1293_v3  ;;  %v2331_v2 = vmul.f32 -1.442695, %v1590_v18 }
 0x1c1   : > { %2809 = vrcp.f32 %v1843_v26  ;;  %v2436_v45 = vpop.f32.mrf.mxu1  ;;  %v2786_v46 = vpop.eup %2785  ;;  %v1844_v28 = vadd.f32 1.0, %v2784_v56  ;;  %v2317_v50 = vmul.f32 -1.442695, %v1534_v11  ;;  %v1248_v20 = vadd.f32 %v3418_v49, %v1247_v0 }
 0x1c2   : > { %2811 = vrcp.f32 %v1854_v57  ;;  %v2788_v53 = vpop.eup %2787  ;;  %2033 = vst.msk [vmem:[%s3257_s8 + $0x120] sm:$0xff] %vm1996_vm1, %v2786_v46  ;;  %v1249_v43 = vpop.f32.mrf.mxu0  ;;  %v2329_v59 = vmul.f32 -1.442695, %v1582_v35  ;;  %v1593_v19 = vadd.f32 %v2436_v45, %v1304_v6  ;;  %v1320_v18 = vadd.f32 %v3418_v49, %v3201_v48 }
 0x1c3   : > { %2813 = vpow2.f32 %v2326_v34  ;;  %v1584_v58 = vpop.f32.mrf.mxu1  ;;  %v2790_v62 = vpop.eup %2789  ;;  %v1852_v41 = vadd.f32 1.0, %v2788_v53  ;;  %v1537_v39 = vadd.f32 %v3374_v7, %v1248_v20  ;;  %v1312_v46 = vadd.f32 %v3418_v49, %v3193_v40 }
 0x1c4   : > { %2815 = vrcp.f32 %v1844_v28  ;;  %v2792_v10 = vpop.eup %2791  ;;  %v1855_v1 = vadd.f32 1.0, %v2790_v62  ;;  %v1252_v21 = vpop.f32.mrf.mxu0  ;;  %v1585_v24 = vadd.f32 %v1584_v58, %v1296_v32  ;;  %v2332_v33 = vmul.f32 -1.442695, %v1593_v19 }
 0x1c5   : > { %2817 = vpow2.f32 %v2317_v50  ;;  %v2439_v4 = vpop.f32.mrf.mxu1  ;;  %v1845_v12 = vadd.f32 1.0, %v2792_v10  ;;  %v1253_v54 = vadd.f32 %v3418_v49, %v1252_v21  ;;  %v2318_v30 = vmul.f32 -1.442695, %v1537_v39 }
 0x1c6   : > { %v2794_v5 = vpop.eup %2793  ;;  %2819 = vrcp.f32 %v1852_v41  ;;  %v1254_v9 = vpop.f32.mrf.mxu0  ;;  %v1606_v44 = vadd.f32 %v2439_v4, %v1317_v61  ;;  %v2330_v57 = vmul.f32 -1.442695, %v1585_v24 }
 0x1c7   : > { %v2796_v37 = vpop.eup %2795  ;;  %2034 = vst.msk [vmem:[%s3257_s8 + $0x128] sm:$0xff] %vm1996_vm1, %v2794_v5  ;;  %2821 = vrcp.f32 %v1855_v1  ;;  %v1597_v13 = vpop.f32.mrf.mxu1  ;;  %v1542_v26 = vadd.f32 %v3361_v42, %v1253_v54 }
 0x1c8   : > { %v2798_v14 = vpop.eup %2797  ;;  %2823 = vrcp.f32 %v1845_v12  ;;  %v1853_v38 = vadd.f32 1.0, %v2796_v37  ;;  %v1255_v51 = vpop.f32.mrf.mxu0  ;;  %v1598_v11 = vadd.f32 %v1597_v13, %v1309_v23  ;;  %v2335_v48 = vmul.f32 -1.442695, %v1606_v44 }
 0x1c9   : > { %v2800_v47 = vpop.eup %2799  ;;  %v1858_v27 = vadd.f32 1.0, %v2798_v14  ;;  %2825 = vpow2.f32 %v2331_v2  ;;  %v2440_v55 = vpop.f32.mrf.mxu1  ;;  %v1256_v34 = vadd.f32 %v3418_v49, %v1255_v51  ;;  %v2319_v3 = vmul.f32 -1.442695, %v1542_v26 }
 0x1ca   : > { %v2802_v60 = vpop.eup %2801  ;;  %2827 = vrcp.f32 %v1853_v38  ;;  %v1846_v8 = vadd.f32 1.0, %v2800_v47  ;;  %v1257_v52 = vpop.f32.mrf.mxu0  ;;  %v1609_v43 = vadd.f32 %v2440_v55, %v1320_v18  ;;  %v2333_v62 = vmul.f32 -1.442695, %v1598_v11 }
 0x1cb   : > { %v2804_v16 = vpop.eup %2803  ;;  %2035 = vst.msk [vmem:[%s3257_s8 + $0x130] sm:$0xff] %vm1996_vm1, %v2802_v60  ;;  %2829 = vrcp.f32 %v1858_v27  ;;  %v1600_v0 = vpop.f32.mrf.mxu1  ;;  %v1545_v28 = vadd.f32 %v3369_v15, %v1256_v34 }
 0x1cc   : > { %v2806_v7 = vpop.eup %2805  ;;  %2831 = vrcp.f32 %v1846_v8  ;;  %v1856_v25 = vadd.f32 1.0, %v2804_v16  ;;  %v1601_v40 = vadd.f32 %v1600_v0, %v1312_v46  ;;  %v2336_v1 = vmul.f32 -1.442695, %v1609_v43 }
 0x1cd   : > { %v2808_v63 = vpop.eup %2807  ;;  %v1859_v29 = vadd.f32 1.0, %v2806_v7  ;;  %2833 = vpow2.f32 %v2329_v59  ;;  %v2320_v15 = vmul.f32 -1.442695, %v1545_v28 }
 0x1ce   : > { %v2810_v36 = vpop.eup %2809  ;;  %2835 = vrcp.f32 %v1856_v25  ;;  %v1847_v22 = vadd.f32 1.0, %v2808_v63  ;;  %v2334_v20 = vmul.f32 -1.442695, %v1601_v40 }
 0x1cf   : > { %v2812_v17 = vpop.eup %2811  ;;  %2036 = vst.msk [vmem:[%s3257_s8 + $0x138] sm:$0xff] %vm1996_vm1, %v2810_v36  ;;  %2837 = vrcp.f32 %v1859_v29 }
 0x1d0   : > { %v2814_v31 = vpop.eup %2813  ;;  %2047 = vst.msk [vmem:[%s3257_s8 + $0x190] sm:$0xff] %vm1996_vm1, %v2812_v17  ;;  %2839 = vrcp.f32 %v1847_v22 }
 0x1d1   : > { %v2816_v56 = vpop.eup %2815  ;;  %v1857_v42 = vadd.f32 1.0, %v2814_v31  ;;  %2841 = vpow2.f32 %v2318_v30 }
 0x1d2   : > { %v2818_v45 = vpop.eup %2817  ;;  %2037 = vst.msk [vmem:[%s3257_s8 + $0x140] sm:$0xff] %vm1996_vm1, %v2816_v56  ;;  %2843 = vpow2.f32 %v2332_v33 }
 0x1d3   : > { %v2820_v50 = vpop.eup %2819  ;;  %2845 = vrcp.f32 %v1857_v42  ;;  %v1848_v53 = vadd.f32 1.0, %v2818_v45 }
 0x1d4   : > { %v2822_v58 = vpop.eup %2821  ;;  %2045 = vst.msk [vmem:[%s3257_s8 + $0x180] sm:$0xff] %vm1996_vm1, %v2820_v50  ;;  %2847 = vpow2.f32 %v2330_v57 }
 0x1d5   : > { %v2824_v49 = vpop.eup %2823  ;;  %2048 = vst.msk [vmem:[%s3257_s8 + $0x198] sm:$0xff] %vm1996_vm1, %v2822_v58  ;;  %2849 = vrcp.f32 %v1848_v53 }
 0x1d6   : > { %v2826_v41 = vpop.eup %2825  ;;  %2038 = vst.msk [vmem:[%s3257_s8 + $0x148] sm:$0xff] %vm1996_vm1, %v2824_v49  ;;  %2851 = vpow2.f32 %v2319_v3 }
 0x1d7   : > { %v2828_v35 = vpop.eup %2827  ;;  %v1862_v10 = vadd.f32 1.0, %v2826_v41  ;;  %2853 = vpow2.f32 %v2335_v48 }
 0x1d8   : > { %v2830_v2 = vpop.eup %2829  ;;  %2046 = vst.msk [vmem:[%s3257_s8 + $0x188] sm:$0xff] %vm1996_vm1, %v2828_v35  ;;  %2855 = vpow2.f32 %v2333_v62 }
 0x1d9   : > { %v2832_v21 = vpop.eup %2831  ;;  %2051 = vst.msk [vmem:[%s3257_s8 + $0x1b0] sm:$0xff] %vm1996_vm1, %v2830_v2  ;;  %2857 = vrcp.f32 %v1862_v10 }
 0x1da   : > { %v2834_v4 = vpop.eup %2833  ;;  %2039 = vst.msk [vmem:[%s3257_s8 + $0x150] sm:$0xff] %vm1996_vm1, %v2832_v21  ;;  %2859 = vpow2.f32 %v2320_v15 }
 0x1db   : > { %v2836_v5 = vpop.eup %2835  ;;  %v1860_v12 = vadd.f32 1.0, %v2834_v4  ;;  %2861 = vpow2.f32 %v2336_v1 }
 0x1dc   : > { %v2838_v37 = vpop.eup %2837  ;;  %2049 = vst.msk [vmem:[%s3257_s8 + $0x1a0] sm:$0xff] %vm1996_vm1, %v2836_v5  ;;  %2863 = vpow2.f32 %v2334_v20 }
 0x1dd   : > { %v2840_v6 = vpop.eup %2839  ;;  %2052 = vst.msk [vmem:[%s3257_s8 + $0x1b8] sm:$0xff] %vm1996_vm1, %v2838_v37  ;;  %2865 = vrcp.f32 %v1860_v12 }
 0x1de   : > { %v2842_v9 = vpop.eup %2841  ;;  %2040 = vst.msk [vmem:[%s3257_s8 + $0x158] sm:$0xff] %vm1996_vm1, %v2840_v6 }
 0x1df   : > { %v2844_v14 = vpop.eup %2843  ;;  %v1849_v38 = vadd.f32 1.0, %v2842_v9 }
 0x1e0   : > { %v2846_v59 = vpop.eup %2845  ;;  %v1863_v47 = vadd.f32 1.0, %v2844_v14 }
 0x1e1   : > { %v2848_v27 = vpop.eup %2847  ;;  %2050 = vst.msk [vmem:[%s3257_s8 + $0x1a8] sm:$0xff] %vm1996_vm1, %v2846_v59  ;;  %2867 = vrcp.f32 %v1849_v38 }
 0x1e2   : > { %v2850_v39 = vpop.eup %2849  ;;  %2869 = vrcp.f32 %v1863_v47  ;;  %v1861_v19 = vadd.f32 1.0, %v2848_v27 }
 0x1e3   : > { %v2852_v13 = vpop.eup %2851  ;;  %2041 = vst.msk [vmem:[%s3257_s8 + $0x160] sm:$0xff] %vm1996_vm1, %v2850_v39 }
 0x1e4   : > { %v2854_v51 = vpop.eup %2853  ;;  %2871 = vrcp.f32 %v1861_v19  ;;  %v1850_v60 = vadd.f32 1.0, %v2852_v13 }
 0x1e5   : > { %v2856_v32 = vpop.eup %2855  ;;  %v1866_v8 = vadd.f32 1.0, %v2854_v51 }
 0x1e6   : > { %v2858_v54 = vpop.eup %2857  ;;  %2873 = vrcp.f32 %v1850_v60  ;;  %v1864_v16 = vadd.f32 1.0, %v2856_v32 }
 0x1e7   : > { %v2860_v23 = vpop.eup %2859  ;;  %2055 = vst.msk [vmem:[%s3257_s8 + $0x1d0] sm:$0xff] %vm1996_vm1, %v2858_v54  ;;  %2875 = vrcp.f32 %v1866_v8 }
 0x1e8   : > { %v2862_v52 = vpop.eup %2861  ;;  %2877 = vrcp.f32 %v1864_v16  ;;  %v1851_v7 = vadd.f32 1.0, %v2860_v23 }
 0x1e9   : > { %v2864_v61 = vpop.eup %2863  ;;  %v1867_v25 = vadd.f32 1.0, %v2862_v52 }
 0x1ea   : > { %v2866_v24 = vpop.eup %2865  ;;  %2879 = vrcp.f32 %v1851_v7  ;;  %v1865_v63 = vadd.f32 1.0, %v2864_v61 }
 0x1eb   : > { %2053 = vst.msk [vmem:[%s3257_s8 + $0x1c0] sm:$0xff] %vm1996_vm1, %v2866_v24  ;;  %2881 = vrcp.f32 %v1867_v25 }
 0x1ec   : > { %2883 = vrcp.f32 %v1865_v63 }
 0x1ee   : > { %v2868_v29 = vpop.eup %2867 }
 0x1ef   : > { %v2870_v30 = vpop.eup %2869  ;;  %2042 = vst.msk [vmem:[%s3257_s8 + $0x168] sm:$0xff] %vm1996_vm1, %v2868_v29 }
 0x1f0   : > { %2056 = vst.msk [vmem:[%s3257_s8 + $0x1d8] sm:$0xff] %vm1996_vm1, %v2870_v30 }
 0x1f1   : > { %v2872_v33 = vpop.eup %2871 }
 0x1f2   : > { %2054 = vst.msk [vmem:[%s3257_s8 + $0x1c8] sm:$0xff] %vm1996_vm1, %v2872_v33 }
 0x1f3   : > { %v2874_v55 = vpop.eup %2873 }
 0x1f4   : > { %v2876_v36 = vpop.eup %2875  ;;  %2043 = vst.msk [vmem:[%s3257_s8 + $0x170] sm:$0xff] %vm1996_vm1, %v2874_v55 }
 0x1f5   : > { %v2878_v22 = vpop.eup %2877  ;;  %2059 = vst.msk [vmem:[%s3257_s8 + $0x1f0] sm:$0xff] %vm1996_vm1, %v2876_v36 }
 0x1f6   : > { %2057 = vst.msk [vmem:[%s3257_s8 + $0x1e0] sm:$0xff] %vm1996_vm1, %v2878_v22 }
 0x1f7   : > { %v2880_v26 = vpop.eup %2879 }
 0x1f8   : > { %v2882_v34 = vpop.eup %2881  ;;  %2044 = vst.msk [vmem:[%s3257_s8 + $0x178] sm:$0xff] %vm1996_vm1, %v2880_v26 }
 0x1f9   : > { %v2884_v17 = vpop.eup %2883  ;;  %2060 = vst.msk [vmem:[%s3257_s8 + $0x1f8] sm:$0xff] %vm1996_vm1, %v2882_v34 }
 0x1fa   : > { %2058 = vst.msk [vmem:[%s3257_s8 + $0x1e8] sm:$0xff] %vm1996_vm1, %v2884_v17 }
 0x1fb PF: > { %s13_s12 = sadd.s32 1, %s2892_s12  }
 0x1fc   : > { %p10_p4 = scmp.ge.s32.totalorder %s13_s12, 4  }
 0x1fe   :  { %12 = sbr.rel (!%p10_p4) target bundleno = 1 (0x1), region = 62 }

</bundles_post_ra>
